<compile_context>
chip_gen: v7x
topology: tpu7x:2x2x1
jax: 0.10.0
libtpu: 0.0.40
codegen_flags: <defaults>
</compile_context>

<pallas_src>
import jax
import jax.numpy as jnp
import numpy as np
from jax.experimental import pallas as pl
from jax.experimental.pallas import tpu as pltpu

f32 = jnp.float32
bf16 = jnp.bfloat16


def _make_kernel(H, W, Cp, LPAD, PADLEN):
    HW = H * W
    BIGLEN = HW + 2 * W
    eps = 1e-5

    def kernel(x_ref, bpe_ref, ml_ref, mr_ref,
               a1_ref, g1w_ref, g1b_ref, w1_ref,
               a2_ref, g2w_ref, g2b_ref, w2_ref,
               b2r_ref, wr_ref,
               out_ref, pad_ref):
        # Zero only the halo rows (interior rows are fully rewritten before each
        # conv).  Done every step so it is safe under "parallel" megacore
        # sharding where each core owns its own scratch.
        pad_ref[:LPAD, :] = jnp.zeros((LPAD, Cp), f32)
        pad_ref[LPAD + HW:PADLEN, :] = jnp.zeros((PADLEN - LPAD - HW, Cp), f32)

        x2 = x_ref[0]                         # (HW, Cp) f32 (P packed images)
        ml = ml_ref[...]                      # (BIGLEN, Cp) lane-broadcast masks
        mr = mr_ref[...]

        def gn_swish(v, a_ref, w_ref, b_ref):
            # a_ref: (Cp, Cp) block-diagonal group-averaging matrix (includes
            # 1/(HW*cpg)); per-image statistics stay inside each lane slot.
            A = a_ref[...]
            mean = jnp.dot(jnp.sum(v, axis=0, keepdims=True), A,
                           preferred_element_type=f32)            # (1, Cp)
            d = v - mean                                          # centered var
            var = jnp.dot(jnp.sum(d * d, axis=0, keepdims=True), A,
                          preferred_element_type=f32)
            scale = w_ref[...] * jax.lax.rsqrt(var + eps)         # folded affine
            hn = d * scale + b_ref[...]
            return hn * jax.nn.sigmoid(hn)                        # swish

        def conv3x3(w_ref):
            # w_ref: (3, 3*Cp, Cp) bf16, dx blocks packed along K, block-diagonal
            # over the packed images.  Only the two +-1 shifted reads are
            # sublane-misaligned; dy taps are aligned row slices.
            big_c = pad_ref[LPAD - W:LPAD - W + BIGLEN, :]
            big_l = pad_ref[LPAD - W - 1:LPAD - W - 1 + BIGLEN, :] * ml
            big_r = pad_ref[LPAD - W + 1:LPAD - W + 1 + BIGLEN, :] * mr
            big = jnp.concatenate([big_l, big_c, big_r],
                                  axis=1).astype(bf16)            # (BIGLEN, 3*Cp)
            acc = jnp.dot(big[0:HW, :], w_ref[0],
                          preferred_element_type=f32)             # dy = 0
            for dy in range(1, 3):
                acc = acc + jnp.dot(big[dy * W:dy * W + HW, :], w_ref[dy],
                                    preferred_element_type=f32)
            return acc

        # h = swish(GroupNorm1(x))
        h = gn_swish(x2, a1_ref, g1w_ref, g1b_ref)

        # h = conv1(h) + (conv1 bias + swish(time emb) + swish(class emb))
        pad_ref[LPAD:LPAD + HW, :] = h
        h = conv3x3(w1_ref) + bpe_ref[0]

        # h = swish(GroupNorm2(h))
        # TODO(synk): nn.Dropout train-mode randomness not replicated; eval identity.
        h = gn_swish(h, a2_ref, g2w_ref, g2b_ref)

        # h = conv2(h)
        pad_ref[LPAD:LPAD + HW, :] = h
        h = conv3x3(w2_ref)

        # residual 1x1 (bf16 operands, f32 accumulate); biases folded in glue
        res = jnp.dot(x2.astype(bf16), wr_ref[...], preferred_element_type=f32)
        out_ref[0] = h + res + b2r_ref[...]

    return kernel


def unet_residual_block_pallas(x_nchw, t, c, params, num_groups=8):
    N, Cin, H, W = x_nchw.shape
    assert W >= 2, "3x3 conv edge masks assume W >= 2"
    Cout = params["conv1_w"].shape[0]
    HW = H * W

    # Batch-lane packing: P images per grid step share the 128 lanes.
    Cslot = max(Cin, Cout)
    Cp = ((Cslot + 127) // 128) * 128           # lane-dense channel padding
    P = max(1, Cp // Cslot)                     # images packed per grid step
    NP = -(-N // P)                             # grid steps
    Npad = NP * P

    LPAD = W + 8                                # >= W+1 and LPAD - W % 8 == 0
    PADLEN = ((2 * LPAD + HW + 7) // 8) * 8
    BIGLEN = HW + 2 * W
    G1 = min(num_groups, Cin)
    G2 = min(num_groups, Cout)

    def swish(v):
        return v * jax.nn.sigmoid(v)

    # ---- glue: layout / parameter prep (plain JAX / numpy) ----
    # pack activations: image n -> grid step n // P, lane slot (n % P) * Cslot
    x2 = jnp.transpose(x_nchw, (0, 2, 3, 1)).reshape(N, HW, Cin).astype(f32)
    x2 = jnp.pad(x2, ((0, Npad - N), (0, 0), (0, Cslot - Cin)))
    x2p = jnp.transpose(x2.reshape(NP, P, HW, Cslot),
                        (0, 2, 1, 3)).reshape(NP, HW, P * Cslot)
    if P * Cslot < Cp:
        x2p = jnp.pad(x2p, ((0, 0), (0, 0), (0, Cp - P * Cslot)))

    # time/class embeddings (tiny M=1 matmuls) + conv1 bias -> one packed vector
    emb = swish(t.astype(f32) @ params["time_w"].T.astype(f32) + params["time_b"])
    if c is not None:
        emb = emb + swish(c.astype(f32) @ params["class_w"].T.astype(f32)
                          + params["class_b"])
    bvec = emb + params["conv1_b"][None, :].astype(f32)          # (N, Cout)
    bvec = jnp.pad(bvec, ((0, Npad - N), (0, Cslot - Cout)))
    bpe = bvec.reshape(NP, 1, P * Cslot)
    if P * Cslot < Cp:
        bpe = jnp.pad(bpe, ((0, 0), (0, 0), (0, Cp - P * Cslot)))

    # left/right tap masks, pre-broadcast across all lanes (no in-kernel splat)
    j = np.arange(BIGLEN)
    ml = jnp.asarray(np.broadcast_to(((j % W) != 0)[:, None],
                                     (BIGLEN, Cp)).astype(np.float32))
    mr = jnp.asarray(np.broadcast_to(((j % W) != W - 1)[:, None],
                                     (BIGLEN, Cp)).astype(np.float32))

    # block-diagonal group-averaging matrices (include 1/(HW*cpg))
    def group_avg(Creal, G):
        cpg = Creal // G
        grp = np.arange(Creal) // cpg
        blk = (grp[:, None] == grp[None, :]).astype(np.float32) / float(HW * cpg)
        A = np.zeros((Cp, Cp), np.float32)
        for s in range(P):
            o = s * Cslot
            A[o:o + Creal, o:o + Creal] = blk
        return jnp.asarray(A)

    a1 = group_avg(Cin, G1)
    a2 = group_avg(Cout, G2)

    def pad_vec_slots(v, n_real):
        out = jnp.zeros((1, Cp), f32)
        vv = v.astype(f32)
        for s in range(P):
            out = out.at[0, s * Cslot:s * Cslot + n_real].set(vv)
        return out

    g1w = pad_vec_slots(params["gn1_w"], Cin)
    g1b = pad_vec_slots(params["gn1_b"], Cin)
    g2w = pad_vec_slots(params["gn2_w"], Cout)
    g2b = pad_vec_slots(params["gn2_b"], Cout)

    # torch conv weight (O, I, 3, 3) -> packed (3, 3*Cp, Cp) bf16, dx blocks on
    # K, each dx block block-diagonal over the P packed images.
    def pack_conv(w, ci, co):
        wt = jnp.transpose(w, (2, 3, 1, 0)).astype(f32)          # (ky, kx, ci, co)
        wp = jnp.zeros((3, 3 * Cp, Cp), f32)
        for dx in range(3):
            for s in range(P):
                o = s * Cslot
                wp = wp.at[:, dx * Cp + o:dx * Cp + o + ci, o:o + co].set(wt[:, dx])
        return wp.astype(bf16)

    w1pk = pack_conv(params["conv1_w"], Cin, Cout)
    w2pk = pack_conv(params["conv2_w"], Cout, Cout)

    # residual 1x1 (identity when in==out and no explicit conv), block-diagonal,
    # bf16 operands (f32 accumulate in the kernel).
    if "res_w" in params:
        wr_real = params["res_w"].reshape(Cout, Cin).T.astype(f32)   # (Cin, Cout)
        br_real = params["res_b"].astype(f32)
    else:
        wr_real = jnp.eye(Cin, Cout, dtype=f32)
        br_real = jnp.zeros((Cout,), f32)
    wrp = jnp.zeros((Cp, Cp), f32)
    for s in range(P):
        o = s * Cslot
        wrp = wrp.at[o:o + Cin, o:o + Cout].set(wr_real)
    wrp = wrp.astype(bf16)
    b2r = pad_vec_slots(params["conv2_b"].astype(f32) + br_real, Cout)

    operands = [x2p, bpe, ml, mr,
                a1, g1w, g1b, w1pk,
                a2, g2w, g2b, w2pk,
                b2r, wrp]

    def full_spec(a):
        nd = a.ndim
        return pl.BlockSpec(a.shape, lambda n, _nd=nd: (0,) * _nd)

    in_specs = [
        pl.BlockSpec((1, HW, Cp), lambda n: (n, 0, 0)),   # packed x
        pl.BlockSpec((1, 1, Cp), lambda n: (n, 0, 0)),    # folded bias + embeddings
    ] + [full_spec(a) for a in operands[2:]]

    # generation-aware VMEM limit: ~48 MiB on v7x (64 MiB physical per TC),
    # 64 MiB on v5e/v6e (128 MiB physical).
    try:
        vmem_cap = int(pltpu.get_tpu_info().vmem_capacity_bytes)
    except Exception:
        vmem_cap = 64 * 1024 * 1024
    vmem_limit = int(min(64 * 1024 * 1024, (vmem_cap * 3) // 4))

    kernel = _make_kernel(H, W, Cp, LPAD, PADLEN)
    out = pl.pallas_call(
        kernel,
        out_shape=jax.ShapeDtypeStruct((NP, HW, Cp), f32),
        grid_spec=pltpu.PrefetchScalarGridSpec(
            num_scalar_prefetch=0,
            grid=(NP,),
            in_specs=in_specs,
            out_specs=pl.BlockSpec((1, HW, Cp), lambda n: (n, 0, 0)),
            scratch_shapes=[pltpu.VMEM((PADLEN, Cp), f32)]),
        compiler_params=pltpu.CompilerParams(
            dimension_semantics=("parallel",),
            vmem_limit_bytes=vmem_limit),
    )(*operands)

    # unpack lanes -> (N, Cout, H, W)
    outp = out[:, :, :P * Cslot].reshape(NP, HW, P, Cslot)
    outp = jnp.transpose(outp, (0, 2, 1, 3)).reshape(Npad, HW, Cslot)[:N, :, :Cout]
    return jnp.transpose(outp.reshape(N, H, W, Cout), (0, 3, 1, 2))


# ----- plain-JAX reference (NCHW, mirrors the PyTorch forward) -----
def reference_forward(x, t, c, p, num_groups=8):
    def swish(v):
        return v * jax.nn.sigmoid(v)

    def gn(v, g, w, b):
        N, C, H, W = v.shape
        vg = v.reshape(N, g, C // g, H, W)
        mean = vg.mean(axis=(2, 3, 4), keepdims=True)
        var = ((vg - mean) ** 2).mean(axis=(2, 3, 4), keepdims=True)
        vn = ((vg - mean) / jnp.sqrt(var + 1e-5)).reshape(N, C, H, W)
        return vn * w[None, :, None, None] + b[None, :, None, None]

    def conv(v, w, b, pad):
        y = jax.lax.conv_general_dilated(
            v, w, (1, 1), [(pad, pad), (pad, pad)],
            dimension_numbers=("NCHW", "OIHW", "NCHW"))
        return y + b[None, :, None, None]

    Cin = x.shape[1]
    Cout = p["conv1_w"].shape[0]
    h = swish(gn(x, min(num_groups, Cin), p["gn1_w"], p["gn1_b"]))
    h = conv(h, p["conv1_w"], p["conv1_b"], 1)
    te = swish(t @ p["time_w"].T + p["time_b"])
    h = h + te[:, :, None, None]
    ce = swish(c @ p["class_w"].T + p["class_b"])
    h = h + ce[:, :, None, None]
    h = swish(gn(h, min(num_groups, Cout), p["gn2_w"], p["gn2_b"]))
    h = conv(h, p["conv2_w"], p["conv2_b"], 1)
    res = conv(x, p["res_w"], p["res_b"], 0)
    return h + res


def init_params(key, Cin, Cout, d_time):
    ks = jax.random.split(key, 14)

    def rnd(k, shape, s=0.2):
        return s * jax.random.normal(k, shape, jnp.float32)

    return {
        "gn1_w": 1.0 + rnd(ks[0], (Cin,), 0.1),
        "gn1_b": rnd(ks[1], (Cin,), 0.1),
        "conv1_w": rnd(ks[2], (Cout, Cin, 3, 3)),
        "conv1_b": rnd(ks[3], (Cout,), 0.1),
        "time_w": rnd(ks[4], (Cout, d_time)),
        "time_b": rnd(ks[5], (Cout,), 0.1),
        "class_w": rnd(ks[6], (Cout, d_time)),
        "class_b": rnd(ks[7], (Cout,), 0.1),
        "gn2_w": 1.0 + rnd(ks[8], (Cout,), 0.1),
        "gn2_b": rnd(ks[9], (Cout,), 0.1),
        "conv2_w": rnd(ks[10], (Cout, Cout, 3, 3)),
        "conv2_b": rnd(ks[11], (Cout,), 0.1),
        "res_w": rnd(ks[12], (Cout, Cin, 1, 1)),
        "res_b": rnd(ks[13], (Cout,), 0.1),
    }


if __name__ == "__main__":
    N, Cin, Cout, H, W, d_time = 2, 4, 8, 16, 16, 16
    key = jax.random.PRNGKey(0)
    kx, kt, kc, kp = jax.random.split(key, 4)
    x = jax.random.normal(kx, (N, Cin, H, W), jnp.float32)
    t = jax.random.normal(kt, (N, d_time), jnp.float32)
    c = jax.random.normal(kc, (N, d_time), jnp.float32)
    params = init_params(kp, Cin, Cout, d_time)

    out = unet_residual_block_pallas(x, t, c, params)
    out = jax.block_until_ready(out)

    ref = reference_forward(x, t, c, params)
    np.testing.assert_allclose(np.asarray(out), np.asarray(ref),
                               rtol=5e-2, atol=5e-2)
    print("KERNEL_OK")
</pallas_src>

<mosaic_0001>
module attributes {stable_mosaic.version = 11 : i64} {
  func.func @kernel(%arg0: i32, %arg1: memref<1x256x128xf32, #tpu.memory_space<vmem>>, %arg2: memref<1x1x128xf32, #tpu.memory_space<vmem>>, %arg3: memref<288x128xf32, #tpu.memory_space<vmem>>, %arg4: memref<288x128xf32, #tpu.memory_space<vmem>>, %arg5: memref<128x128xf32, #tpu.memory_space<vmem>>, %arg6: memref<1x128xf32, #tpu.memory_space<vmem>>, %arg7: memref<1x128xf32, #tpu.memory_space<vmem>>, %arg8: memref<3x384x128xbf16, #tpu.memory_space<vmem>>, %arg9: memref<128x128xf32, #tpu.memory_space<vmem>>, %arg10: memref<1x128xf32, #tpu.memory_space<vmem>>, %arg11: memref<1x128xf32, #tpu.memory_space<vmem>>, %arg12: memref<3x384x128xbf16, #tpu.memory_space<vmem>>, %arg13: memref<1x128xf32, #tpu.memory_space<vmem>>, %arg14: memref<128x128xbf16, #tpu.memory_space<vmem>>, %arg15: memref<1x256x128xf32, #tpu.memory_space<vmem>>, %arg16: memref<304x128xf32, #tpu.memory_space<vmem>>) attributes {dimension_semantics = [#tpu.dimension_semantics<parallel>], iteration_bounds = array<i64: 1>, scalar_prefetch = 0 : i64, scratch_operands = 1 : i64, tpu.core_type = #tpu.core_type<tc>, window_params = [{transform_indices = @transform_0, window_bounds = array<i64: 1, 256, 128>}, {transform_indices = @transform_1, window_bounds = array<i64: 1, 1, 128>}, {pipeline_mode = #tpu.pipeline_mode<synchronous>, transform_indices = @transform_2, window_bounds = array<i64: 288, 128>}, {pipeline_mode = #tpu.pipeline_mode<synchronous>, transform_indices = @transform_3, window_bounds = array<i64: 288, 128>}, {pipeline_mode = #tpu.pipeline_mode<synchronous>, transform_indices = @transform_4, window_bounds = array<i64: 128, 128>}, {pipeline_mode = #tpu.pipeline_mode<synchronous>, transform_indices = @transform_5, window_bounds = array<i64: 1, 128>}, {pipeline_mode = #tpu.pipeline_mode<synchronous>, transform_indices = @transform_6, window_bounds = array<i64: 1, 128>}, {pipeline_mode = #tpu.pipeline_mode<synchronous>, transform_indices = @transform_7, window_bounds = array<i64: 3, 384, 128>}, {pipeline_mode = #tpu.pipeline_mode<synchronous>, transform_indices = @transform_8, window_bounds = array<i64: 128, 128>}, {pipeline_mode = #tpu.pipeline_mode<synchronous>, transform_indices = @transform_9, window_bounds = array<i64: 1, 128>}, {pipeline_mode = #tpu.pipeline_mode<synchronous>, transform_indices = @transform_10, window_bounds = array<i64: 1, 128>}, {pipeline_mode = #tpu.pipeline_mode<synchronous>, transform_indices = @transform_11, window_bounds = array<i64: 3, 384, 128>}, {pipeline_mode = #tpu.pipeline_mode<synchronous>, transform_indices = @transform_12, window_bounds = array<i64: 1, 128>}, {pipeline_mode = #tpu.pipeline_mode<synchronous>, transform_indices = @transform_13, window_bounds = array<i64: 128, 128>}, {transform_indices = @transform_14, window_bounds = array<i64: 1, 256, 128>}]} {
    %cst = arith.constant 0.000000e+00 : f32
    %0 = vector.broadcast %cst : f32 to vector<24x128xf32>
    %c0 = arith.constant 0 : index
    %c0_0 = arith.constant 0 : index
    %1 = vector.load %arg16[%c0, %c0_0] : memref<304x128xf32, #tpu.memory_space<vmem>>, vector<24x128xf32>
    tpu.vector_store %arg16[%c0, %c0_0], %0 {strides = array<i32>} : memref<304x128xf32, #tpu.memory_space<vmem>>, vector<24x128xf32>,
    %cst_1 = arith.constant 0.000000e+00 : f32
    %2 = vector.broadcast %cst_1 : f32 to vector<24x128xf32>
    %c280 = arith.constant 280 : index
    %c0_2 = arith.constant 0 : index
    %3 = vector.load %arg16[%c280, %c0_2] : memref<304x128xf32, #tpu.memory_space<vmem>>, vector<24x128xf32>
    tpu.vector_store %arg16[%c280, %c0_2], %2 {strides = array<i32>} : memref<304x128xf32, #tpu.memory_space<vmem>>, vector<24x128xf32>,
    %c0_3 = arith.constant 0 : index
    %c0_4 = arith.constant 0 : index
    %c0_5 = arith.constant 0 : index
    %4 = vector.load %arg1[%c0_3, %c0_4, %c0_5] : memref<1x256x128xf32, #tpu.memory_space<vmem>>, vector<1x256x128xf32>
    %5 = vector.shape_cast %4 : vector<1x256x128xf32> to vector<256x128xf32>
    %c0_6 = arith.constant 0 : index
    %c0_7 = arith.constant 0 : index
    %6 = vector.load %arg3[%c0_6, %c0_7] : memref<288x128xf32, #tpu.memory_space<vmem>>, vector<288x128xf32>
    %c0_8 = arith.constant 0 : index
    %c0_9 = arith.constant 0 : index
    %7 = vector.load %arg4[%c0_8, %c0_9] : memref<288x128xf32, #tpu.memory_space<vmem>>, vector<288x128xf32>
    %c0_10 = arith.constant 0 : index
    %c0_11 = arith.constant 0 : index
    %8 = vector.load %arg5[%c0_10, %c0_11] : memref<128x128xf32, #tpu.memory_space<vmem>>, vector<128x128xf32>
    %cst_12 = arith.constant dense<0.000000e+00> : vector<128xf32>
    %9 = vector.multi_reduction <add>, %5, %cst_12 [0] : vector<256x128xf32> to vector<128xf32>
    %10 = vector.shape_cast %9 : vector<128xf32> to vector<1x128xf32>
    %cst_13 = arith.constant dense<0.000000e+00> : vector<1x128xf32>
    %11 = tpu.matmul %10, %8, %cst_13 {dimension_numbers = #tpu.dot_dimension_numbers<[1], [0], [0], [1], [0, 0, 1, 1], [], []>} : vector<1x128xf32>, vector<128x128xf32>, vector<1x128xf32> -> vector<1x128xf32>
    %12 = vector.broadcast %11 : vector<1x128xf32> to vector<256x128xf32>
    %13 = arith.subf %5, %12 : vector<256x128xf32>
    %14 = arith.mulf %13, %13 : vector<256x128xf32>
    %cst_14 = arith.constant dense<0.000000e+00> : vector<128xf32>
    %15 = vector.multi_reduction <add>, %14, %cst_14 [0] : vector<256x128xf32> to vector<128xf32>
    %16 = vector.shape_cast %15 : vector<128xf32> to vector<1x128xf32>
    %cst_15 = arith.constant dense<0.000000e+00> : vector<1x128xf32>
    %17 = tpu.matmul %16, %8, %cst_15 {dimension_numbers = #tpu.dot_dimension_numbers<[1], [0], [0], [1], [0, 0, 1, 1], [], []>} : vector<1x128xf32>, vector<128x128xf32>, vector<1x128xf32> -> vector<1x128xf32>
    %c0_16 = arith.constant 0 : index
    %c0_17 = arith.constant 0 : index
    %18 = vector.load %arg6[%c0_16, %c0_17] : memref<1x128xf32, #tpu.memory_space<vmem>>, vector<1x128xf32>
    %cst_18 = arith.constant 9.99999974E-6 : f32
    %19 = vector.broadcast %cst_18 : f32 to vector<1x128xf32>
    %20 = arith.addf %17, %19 : vector<1x128xf32>
    %21 = math.rsqrt %20 : vector<1x128xf32>
    %22 = arith.mulf %18, %21 : vector<1x128xf32>
    %23 = vector.broadcast %22 : vector<1x128xf32> to vector<256x128xf32>
    %24 = arith.mulf %13, %23 : vector<256x128xf32>
    %c0_19 = arith.constant 0 : index
    %c0_20 = arith.constant 0 : index
    %25 = vector.load %arg7[%c0_19, %c0_20] : memref<1x128xf32, #tpu.memory_space<vmem>>, vector<1x128xf32>
    %26 = vector.broadcast %25 : vector<1x128xf32> to vector<256x128xf32>
    %27 = arith.addf %24, %26 : vector<256x128xf32>
    %28 = arith.negf %27 : vector<256x128xf32>
    %29 = math.exp %28 : vector<256x128xf32>
    %cst_21 = arith.constant 1.000000e+00 : f32
    %30 = vector.broadcast %cst_21 : f32 to vector<256x128xf32>
    %31 = arith.addf %30, %29 : vector<256x128xf32>
    %32 = arith.divf %30, %31 : vector<256x128xf32>
    %33 = arith.mulf %27, %32 : vector<256x128xf32>
    %c24 = arith.constant 24 : index
    %c0_22 = arith.constant 0 : index
    %34 = vector.load %arg16[%c24, %c0_22] : memref<304x128xf32, #tpu.memory_space<vmem>>, vector<256x128xf32>
    tpu.vector_store %arg16[%c24, %c0_22], %33 {strides = array<i32>} : memref<304x128xf32, #tpu.memory_space<vmem>>, vector<256x128xf32>,
    %c8 = arith.constant 8 : index
    %c0_23 = arith.constant 0 : index
    %35 = vector.load %arg16[%c8, %c0_23] : memref<304x128xf32, #tpu.memory_space<vmem>>, vector<288x128xf32>
    %c7 = arith.constant 7 : index
    %c0_24 = arith.constant 0 : index
    %36 = vector.load %arg16[%c7, %c0_24] : memref<304x128xf32, #tpu.memory_space<vmem>>, vector<288x128xf32>
    %37 = arith.mulf %36, %6 : vector<288x128xf32>
    %c9 = arith.constant 9 : index
    %c0_25 = arith.constant 0 : index
    %38 = vector.load %arg16[%c9, %c0_25] : memref<304x128xf32, #tpu.memory_space<vmem>>, vector<288x128xf32>
    %39 = arith.mulf %38, %7 : vector<288x128xf32>
    %40 = tpu.concatenate %37, %35, %39 in 1 : vector<288x128xf32>, vector<288x128xf32>, vector<288x128xf32> -> vector<288x384xf32>
    %41 = arith.truncf %40 : vector<288x384xf32> to vector<288x384xbf16>
    %42 = vector.extract_strided_slice %41 {offsets = [0, 0], sizes = [256, 384], strides = [1, 1]} : vector<288x384xbf16> to vector<256x384xbf16>
    %c0_26 = arith.constant 0 : index
    %c0_27 = arith.constant 0 : index
    %c0_28 = arith.constant 0 : index
    %43 = vector.load %arg8[%c0_26, %c0_27, %c0_28] : memref<3x384x128xbf16, #tpu.memory_space<vmem>>, vector<1x384x128xbf16>
    %44 = vector.shape_cast %43 : vector<1x384x128xbf16> to vector<384x128xbf16>
    %cst_29 = arith.constant dense<0.000000e+00> : vector<256x128xf32>
    %45 = tpu.matmul %42, %44, %cst_29 {dimension_numbers = #tpu.dot_dimension_numbers<[1], [0], [0], [1], [0, 0, 1, 1], [], []>} : vector<256x384xbf16>, vector<384x128xbf16>, vector<256x128xf32> -> vector<256x128xf32>
    %46 = vector.extract_strided_slice %41 {offsets = [16, 0], sizes = [256, 384], strides = [1, 1]} : vector<288x384xbf16> to vector<256x384xbf16>
    %c1 = arith.constant 1 : index
    %c0_30 = arith.constant 0 : index
    %c0_31 = arith.constant 0 : index
    %47 = vector.load %arg8[%c1, %c0_30, %c0_31] : memref<3x384x128xbf16, #tpu.memory_space<vmem>>, vector<1x384x128xbf16>
    %48 = vector.shape_cast %47 : vector<1x384x128xbf16> to vector<384x128xbf16>
    %cst_32 = arith.constant dense<0.000000e+00> : vector<256x128xf32>
    %49 = tpu.matmul %46, %48, %cst_32 {dimension_numbers = #tpu.dot_dimension_numbers<[1], [0], [0], [1], [0, 0, 1, 1], [], []>} : vector<256x384xbf16>, vector<384x128xbf16>, vector<256x128xf32> -> vector<256x128xf32>
    %50 = arith.addf %45, %49 : vector<256x128xf32>
    %51 = vector.extract_strided_slice %41 {offsets = [32, 0], sizes = [256, 384], strides = [1, 1]} : vector<288x384xbf16> to vector<256x384xbf16>
    %c2 = arith.constant 2 : index
    %c0_33 = arith.constant 0 : index
    %c0_34 = arith.constant 0 : index
    %52 = vector.load %arg8[%c2, %c0_33, %c0_34] : memref<3x384x128xbf16, #tpu.memory_space<vmem>>, vector<1x384x128xbf16>
    %53 = vector.shape_cast %52 : vector<1x384x128xbf16> to vector<384x128xbf16>
    %cst_35 = arith.constant dense<0.000000e+00> : vector<256x128xf32>
    %54 = tpu.matmul %51, %53, %cst_35 {dimension_numbers = #tpu.dot_dimension_numbers<[1], [0], [0], [1], [0, 0, 1, 1], [], []>} : vector<256x384xbf16>, vector<384x128xbf16>, vector<256x128xf32> -> vector<256x128xf32>
    %55 = arith.addf %50, %54 : vector<256x128xf32>
    %c0_36 = arith.constant 0 : index
    %c0_37 = arith.constant 0 : index
    %c0_38 = arith.constant 0 : index
    %56 = vector.load %arg2[%c0_36, %c0_37, %c0_38] : memref<1x1x128xf32, #tpu.memory_space<vmem>>, vector<1x1x128xf32>
    %57 = vector.shape_cast %56 : vector<1x1x128xf32> to vector<1x128xf32>
    %58 = vector.broadcast %57 : vector<1x128xf32> to vector<256x128xf32>
    %59 = arith.addf %55, %58 : vector<256x128xf32>
    %c0_39 = arith.constant 0 : index
    %c0_40 = arith.constant 0 : index
    %60 = vector.load %arg9[%c0_39, %c0_40] : memref<128x128xf32, #tpu.memory_space<vmem>>, vector<128x128xf32>
    %cst_41 = arith.constant dense<0.000000e+00> : vector<128xf32>
    %61 = vector.multi_reduction <add>, %59, %cst_41 [0] : vector<256x128xf32> to vector<128xf32>
    %62 = vector.shape_cast %61 : vector<128xf32> to vector<1x128xf32>
    %cst_42 = arith.constant dense<0.000000e+00> : vector<1x128xf32>
    %63 = tpu.matmul %62, %60, %cst_42 {dimension_numbers = #tpu.dot_dimension_numbers<[1], [0], [0], [1], [0, 0, 1, 1], [], []>} : vector<1x128xf32>, vector<128x128xf32>, vector<1x128xf32> -> vector<1x128xf32>
    %64 = vector.broadcast %63 : vector<1x128xf32> to vector<256x128xf32>
    %65 = arith.subf %59, %64 : vector<256x128xf32>
    %66 = arith.mulf %65, %65 : vector<256x128xf32>
    %cst_43 = arith.constant dense<0.000000e+00> : vector<128xf32>
    %67 = vector.multi_reduction <add>, %66, %cst_43 [0] : vector<256x128xf32> to vector<128xf32>
    %68 = vector.shape_cast %67 : vector<128xf32> to vector<1x128xf32>
    %cst_44 = arith.constant dense<0.000000e+00> : vector<1x128xf32>
    %69 = tpu.matmul %68, %60, %cst_44 {dimension_numbers = #tpu.dot_dimension_numbers<[1], [0], [0], [1], [0, 0, 1, 1], [], []>} : vector<1x128xf32>, vector<128x128xf32>, vector<1x128xf32> -> vector<1x128xf32>
    %c0_45 = arith.constant 0 : index
    %c0_46 = arith.constant 0 : index
    %70 = vector.load %arg10[%c0_45, %c0_46] : memref<1x128xf32, #tpu.memory_space<vmem>>, vector<1x128xf32>
    %cst_47 = arith.constant 9.99999974E-6 : f32
    %71 = vector.broadcast %cst_47 : f32 to vector<1x128xf32>
    %72 = arith.addf %69, %71 : vector<1x128xf32>
    %73 = math.rsqrt %72 : vector<1x128xf32>
    %74 = arith.mulf %70, %73 : vector<1x128xf32>
    %75 = vector.broadcast %74 : vector<1x128xf32> to vector<256x128xf32>
    %76 = arith.mulf %65, %75 : vector<256x128xf32>
    %c0_48 = arith.constant 0 : index
    %c0_49 = arith.constant 0 : index
    %77 = vector.load %arg11[%c0_48, %c0_49] : memref<1x128xf32, #tpu.memory_space<vmem>>, vector<1x128xf32>
    %78 = vector.broadcast %77 : vector<1x128xf32> to vector<256x128xf32>
    %79 = arith.addf %76, %78 : vector<256x128xf32>
    %80 = arith.negf %79 : vector<256x128xf32>
    %81 = math.exp %80 : vector<256x128xf32>
    %cst_50 = arith.constant 1.000000e+00 : f32
    %82 = vector.broadcast %cst_50 : f32 to vector<256x128xf32>
    %83 = arith.addf %82, %81 : vector<256x128xf32>
    %84 = arith.divf %82, %83 : vector<256x128xf32>
    %85 = arith.mulf %79, %84 : vector<256x128xf32>
    %c24_51 = arith.constant 24 : index
    %c0_52 = arith.constant 0 : index
    %86 = vector.load %arg16[%c24_51, %c0_52] : memref<304x128xf32, #tpu.memory_space<vmem>>, vector<256x128xf32>
    tpu.vector_store %arg16[%c24_51, %c0_52], %85 {strides = array<i32>} : memref<304x128xf32, #tpu.memory_space<vmem>>, vector<256x128xf32>,
    %c8_53 = arith.constant 8 : index
    %c0_54 = arith.constant 0 : index
    %87 = vector.load %arg16[%c8_53, %c0_54] : memref<304x128xf32, #tpu.memory_space<vmem>>, vector<288x128xf32>
    %c7_55 = arith.constant 7 : index
    %c0_56 = arith.constant 0 : index
    %88 = vector.load %arg16[%c7_55, %c0_56] : memref<304x128xf32, #tpu.memory_space<vmem>>, vector<288x128xf32>
    %89 = arith.mulf %88, %6 : vector<288x128xf32>
    %c9_57 = arith.constant 9 : index
    %c0_58 = arith.constant 0 : index
    %90 = vector.load %arg16[%c9_57, %c0_58] : memref<304x128xf32, #tpu.memory_space<vmem>>, vector<288x128xf32>
    %91 = arith.mulf %90, %7 : vector<288x128xf32>
    %92 = tpu.concatenate %89, %87, %91 in 1 : vector<288x128xf32>, vector<288x128xf32>, vector<288x128xf32> -> vector<288x384xf32>
    %93 = arith.truncf %92 : vector<288x384xf32> to vector<288x384xbf16>
    %94 = vector.extract_strided_slice %93 {offsets = [0, 0], sizes = [256, 384], strides = [1, 1]} : vector<288x384xbf16> to vector<256x384xbf16>
    %c0_59 = arith.constant 0 : index
    %c0_60 = arith.constant 0 : index
    %c0_61 = arith.constant 0 : index
    %95 = vector.load %arg12[%c0_59, %c0_60, %c0_61] : memref<3x384x128xbf16, #tpu.memory_space<vmem>>, vector<1x384x128xbf16>
    %96 = vector.shape_cast %95 : vector<1x384x128xbf16> to vector<384x128xbf16>
    %cst_62 = arith.constant dense<0.000000e+00> : vector<256x128xf32>
    %97 = tpu.matmul %94, %96, %cst_62 {dimension_numbers = #tpu.dot_dimension_numbers<[1], [0], [0], [1], [0, 0, 1, 1], [], []>} : vector<256x384xbf16>, vector<384x128xbf16>, vector<256x128xf32> -> vector<256x128xf32>
    %98 = vector.extract_strided_slice %93 {offsets = [16, 0], sizes = [256, 384], strides = [1, 1]} : vector<288x384xbf16> to vector<256x384xbf16>
    %c1_63 = arith.constant 1 : index
    %c0_64 = arith.constant 0 : index
    %c0_65 = arith.constant 0 : index
    %99 = vector.load %arg12[%c1_63, %c0_64, %c0_65] : memref<3x384x128xbf16, #tpu.memory_space<vmem>>, vector<1x384x128xbf16>
    %100 = vector.shape_cast %99 : vector<1x384x128xbf16> to vector<384x128xbf16>
    %cst_66 = arith.constant dense<0.000000e+00> : vector<256x128xf32>
    %101 = tpu.matmul %98, %100, %cst_66 {dimension_numbers = #tpu.dot_dimension_numbers<[1], [0], [0], [1], [0, 0, 1, 1], [], []>} : vector<256x384xbf16>, vector<384x128xbf16>, vector<256x128xf32> -> vector<256x128xf32>
    %102 = arith.addf %97, %101 : vector<256x128xf32>
    %103 = vector.extract_strided_slice %93 {offsets = [32, 0], sizes = [256, 384], strides = [1, 1]} : vector<288x384xbf16> to vector<256x384xbf16>
    %c2_67 = arith.constant 2 : index
    %c0_68 = arith.constant 0 : index
    %c0_69 = arith.constant 0 : index
    %104 = vector.load %arg12[%c2_67, %c0_68, %c0_69] : memref<3x384x128xbf16, #tpu.memory_space<vmem>>, vector<1x384x128xbf16>
    %105 = vector.shape_cast %104 : vector<1x384x128xbf16> to vector<384x128xbf16>
    %cst_70 = arith.constant dense<0.000000e+00> : vector<256x128xf32>
    %106 = tpu.matmul %103, %105, %cst_70 {dimension_numbers = #tpu.dot_dimension_numbers<[1], [0], [0], [1], [0, 0, 1, 1], [], []>} : vector<256x384xbf16>, vector<384x128xbf16>, vector<256x128xf32> -> vector<256x128xf32>
    %107 = arith.addf %102, %106 : vector<256x128xf32>
    %108 = arith.truncf %5 : vector<256x128xf32> to vector<256x128xbf16>
    %c0_71 = arith.constant 0 : index
    %c0_72 = arith.constant 0 : index
    %109 = vector.load %arg14[%c0_71, %c0_72] : memref<128x128xbf16, #tpu.memory_space<vmem>>, vector<128x128xbf16>
    %cst_73 = arith.constant dense<0.000000e+00> : vector<256x128xf32>
    %110 = tpu.matmul %108, %109, %cst_73 {dimension_numbers = #tpu.dot_dimension_numbers<[1], [0], [0], [1], [0, 0, 1, 1], [], []>} : vector<256x128xbf16>, vector<128x128xbf16>, vector<256x128xf32> -> vector<256x128xf32>
    %111 = arith.addf %107, %110 : vector<256x128xf32>
    %c0_74 = arith.constant 0 : index
    %c0_75 = arith.constant 0 : index
    %112 = vector.load %arg13[%c0_74, %c0_75] : memref<1x128xf32, #tpu.memory_space<vmem>>, vector<1x128xf32>
    %113 = vector.broadcast %112 : vector<1x128xf32> to vector<256x128xf32>
    %114 = arith.addf %111, %113 : vector<256x128xf32>
    %c0_76 = arith.constant 0 : index
    %c0_77 = arith.constant 0 : index
    %c0_78 = arith.constant 0 : index
    %115 = vector.load %arg15[%c0_76, %c0_77, %c0_78] : memref<1x256x128xf32, #tpu.memory_space<vmem>>, vector<1x256x128xf32>
    %116 = vector.shape_cast %115 : vector<1x256x128xf32> to vector<256x128xf32>
    %117 = vector.shape_cast %114 : vector<256x128xf32> to vector<1x256x128xf32>
    tpu.vector_store %arg15[%c0_76, %c0_77, %c0_78], %117 {strides = array<i32>} : memref<1x256x128xf32, #tpu.memory_space<vmem>>, vector<1x256x128xf32>,
    return
  }
  func.func @transform_0(%arg0: i32) -> (i32, i32, i32) {
    %c0_i32 = arith.constant 0 : i32
    %c0_i32_0 = arith.constant 0 : i32
    %c0_i32_1 = arith.constant 0 : i32
    return %arg0, %c0_i32, %c0_i32_0 : i32, i32, i32
  }
  func.func @transform_1(%arg0: i32) -> (i32, i32, i32) {
    %c0_i32 = arith.constant 0 : i32
    %c0_i32_0 = arith.constant 0 : i32
    %c0_i32_1 = arith.constant 0 : i32
    return %arg0, %c0_i32, %c0_i32_0 : i32, i32, i32
  }
  func.func @transform_2(%arg0: i32) -> (i32, i32) {
    %c0_i32 = arith.constant 0 : i32
    %c0_i32_0 = arith.constant 0 : i32
    %c0_i32_1 = arith.constant 0 : i32
    return %c0_i32, %c0_i32_0 : i32, i32
  }
  func.func @transform_3(%arg0: i32) -> (i32, i32) {
    %c0_i32 = arith.constant 0 : i32
    %c0_i32_0 = arith.constant 0 : i32
    %c0_i32_1 = arith.constant 0 : i32
    return %c0_i32, %c0_i32_0 : i32, i32
  }
  func.func @transform_4(%arg0: i32) -> (i32, i32) {
    %c0_i32 = arith.constant 0 : i32
    %c0_i32_0 = arith.constant 0 : i32
    %c0_i32_1 = arith.constant 0 : i32
    return %c0_i32, %c0_i32_0 : i32, i32
  }
  func.func @transform_5(%arg0: i32) -> (i32, i32) {
    %c0_i32 = arith.constant 0 : i32
    %c0_i32_0 = arith.constant 0 : i32
    %c0_i32_1 = arith.constant 0 : i32
    return %c0_i32, %c0_i32_0 : i32, i32
  }
  func.func @transform_6(%arg0: i32) -> (i32, i32) {
    %c0_i32 = arith.constant 0 : i32
    %c0_i32_0 = arith.constant 0 : i32
    %c0_i32_1 = arith.constant 0 : i32
    return %c0_i32, %c0_i32_0 : i32, i32
  }
  func.func @transform_7(%arg0: i32) -> (i32, i32, i32) {
    %c0_i32 = arith.constant 0 : i32
    %c0_i32_0 = arith.constant 0 : i32
    %c0_i32_1 = arith.constant 0 : i32
    %c0_i32_2 = arith.constant 0 : i32
    return %c0_i32, %c0_i32_0, %c0_i32_1 : i32, i32, i32
  }
  func.func @transform_8(%arg0: i32) -> (i32, i32) {
    %c0_i32 = arith.constant 0 : i32
    %c0_i32_0 = arith.constant 0 : i32
    %c0_i32_1 = arith.constant 0 : i32
    return %c0_i32, %c0_i32_0 : i32, i32
  }
  func.func @transform_9(%arg0: i32) -> (i32, i32) {
    %c0_i32 = arith.constant 0 : i32
    %c0_i32_0 = arith.constant 0 : i32
    %c0_i32_1 = arith.constant 0 : i32
    return %c0_i32, %c0_i32_0 : i32, i32
  }
  func.func @transform_10(%arg0: i32) -> (i32, i32) {
    %c0_i32 = arith.constant 0 : i32
    %c0_i32_0 = arith.constant 0 : i32
    %c0_i32_1 = arith.constant 0 : i32
    return %c0_i32, %c0_i32_0 : i32, i32
  }
  func.func @transform_11(%arg0: i32) -> (i32, i32, i32) {
    %c0_i32 = arith.constant 0 : i32
    %c0_i32_0 = arith.constant 0 : i32
    %c0_i32_1 = arith.constant 0 : i32
    %c0_i32_2 = arith.constant 0 : i32
    return %c0_i32, %c0_i32_0, %c0_i32_1 : i32, i32, i32
  }
  func.func @transform_12(%arg0: i32) -> (i32, i32) {
    %c0_i32 = arith.constant 0 : i32
    %c0_i32_0 = arith.constant 0 : i32
    %c0_i32_1 = arith.constant 0 : i32
    return %c0_i32, %c0_i32_0 : i32, i32
  }
  func.func @transform_13(%arg0: i32) -> (i32, i32) {
    %c0_i32 = arith.constant 0 : i32
    %c0_i32_0 = arith.constant 0 : i32
    %c0_i32_1 = arith.constant 0 : i32
    return %c0_i32, %c0_i32_0 : i32, i32
  }
  func.func @transform_14(%arg0: i32) -> (i32, i32, i32) {
    %c0_i32 = arith.constant 0 : i32
    %c0_i32_0 = arith.constant 0 : i32
    %c0_i32_1 = arith.constant 0 : i32
    return %arg0, %c0_i32, %c0_i32_0 : i32, i32, i32
  }
}

</mosaic_0001>

<bundles_post_ra>
// kernel: tpu_custom_call.1
= control target key start
LH: loop header
LB: loop body
LE: loop exit
PB: predicated region body
PF: predicated region fallthrough
CT: control target
= control target key end

     0   :  { %19 = vsyncpa [#allocation4], 0  ;;  %s11187_s0 = inlined_call_operand.hbm [shape: f32[1,256,128], index: 0, kind: input, shape index: {}]   ;;  %s11188_s1 = inlined_call_operand.vmem [shape: f32[1,1,128], index: 1, kind: input, shape index: {}]   ;;  %s11189_s2 = inlined_call_operand.hbm [shape: f32[288,128], index: 2, kind: input, shape index: {}]   ;;  %s11190_s3 = inlined_call_operand.hbm [shape: f32[288,128], index: 3, kind: input, shape index: {}]   ;;  %s11191_s4 = inlined_call_operand.hbm [shape: f32[128,128], index: 4, kind: input, shape index: {}]   ;;  %s11192_s5 = inlined_call_operand.vmem [shape: f32[1,128], index: 5, kind: input, shape index: {}]   ;;  %s11193_s6 = inlined_call_operand.vmem [shape: f32[1,128], index: 6, kind: input, shape index: {}]   ;;  %s11194_s7 = inlined_call_operand.hbm [shape: bf16[3,384,128], index: 7, kind: input, shape index: {}]   ;;  %s11195_s8 = inlined_call_operand.hbm [shape: f32[128,128], index: 8, kind: input, shape index: {}]   ;;  %s11196_s9 = inlined_call_operand.vmem [shape: f32[1,128], index: 9, kind: input, shape index: {}]   ;;  %s11197_s10 = inlined_call_operand.vmem [shape: f32[1,128], index: 10, kind: input, shape index: {}]   ;;  %s11198_s11 = inlined_call_operand.hbm [shape: bf16[3,384,128], index: 11, kind: input, shape index: {}]   ;;  %s11199_s12 = inlined_call_operand.vmem [shape: f32[1,128], index: 12, kind: input, shape index: {}]   ;;  %s11200_s13 = inlined_call_operand.hbm [shape: bf16[128,128], index: 13, kind: input, shape index: {}]   ;;  %s11201_s14 = inlined_call_operand.hbm [shape: f32[1,256,128], index: 14, kind: output, shape index: {}]  }
   0x1   :  { %20 = vsyncpa [#allocation7], 0 }
   0x2   :  { %21 = vsyncpa [#allocation10], 0 }
   0x3   :  { %22 = vsyncpa [#allocation13], 0 }
   0x4   :  { %23 = vsyncpa [#allocation16], 0 }
   0x5   :  { %24 = vsyncpa [#allocation5], 0  ;;  %s8354_s29 = smov [#allocation6]   ;;  %s8355_s15 = smov [#allocation9]  }
   0x6   :  { %s44_s30 = sshll.u32 %s8354_s29, 4  ;;  %s68_s16 = sshll.u32 %s8355_s15, 4  ;;  %s45_s30 = int_to_ptr.vmem [resolvable:$true] %s44_s30  ;;  %s8445_s16 = int_to_ptr.vmem [resolvable:$true] %s68_s16 }
   0x7   :  { %s8144_s19 = scalar_lea.hbm %s11189_s2, 4608 }
   0x8   :  { %p8145_p0 = scmp.ne.s32.totalorder %s11189_s2, %s8144_s19  ;;  %p8148_p1 = scmp.lt.u32.totalorder %s8144_s19, %s11189_s2 }
   0xa   :  { %p8150_p2 = pnand %p8148_p1, %p8145_p0 }
   0xc   :  { %8153 = shalt.err (!%p8150_p2)
}
   0xd   :  { %s8154_s24 = scalar_lea.vmem %s45_s30, 4608  ;;  %p8159_p4 = scmp.lt.s32.totalorder %s45_s30, %s45_s30 }
   0xe   :  { %p8155_p3 = scmp.ne.s32.totalorder %s45_s30, %s8154_s24  ;;  %p8160_p5 = scmp.lt.s32.totalorder %s8154_s24, %s8154_s24 }
  0x10   :  { %p8161_p6 = por %p8160_p5, %p8159_p4 }
  0x12   :  { %p8162_p7 = pnand %p8161_p6, %p8155_p3 }
  0x14   :  { %8165 = shalt.err (!%p8162_p7)
}
  0x15   :  { %s8356_s25 = smov 128   ;;  %s8357_s26 = smov 8  }
  0x16   :  { %50 = dma.hbm_to_vmem [thread:$0]  %s11189_s2, 4608, %s45_s30, [#allocation7], %s8356_s25, %s8356_s25, %s8357_s26  }
  0x17   :  { %s8166_s17 = scalar_lea.hbm %s11191_s4, 2048 }
  0x18   :  { %p8167_p8 = scmp.ne.s32.totalorder %s11191_s4, %s8166_s17  ;;  %p8170_p9 = scmp.lt.u32.totalorder %s8166_s17, %s11191_s4 }
  0x1a   :  { %p8172_p10 = pnand %p8170_p9, %p8167_p8 }
  0x1c   :  { %8175 = shalt.err (!%p8172_p10)
}
  0x1d   :  { %s8176_s22 = scalar_lea.vmem %s8445_s16, 2048  ;;  %p8181_p12 = scmp.lt.s32.totalorder %s8445_s16, %s8445_s16 }
  0x1e   :  { %p8177_p11 = scmp.ne.s32.totalorder %s8445_s16, %s8176_s22  ;;  %p8182_p13 = scmp.lt.s32.totalorder %s8176_s22, %s8176_s22 }
  0x20   :  { %p8183_p0 = por %p8182_p13, %p8181_p12 }
  0x22   :  { %p8184_p1 = pnand %p8183_p0, %p8177_p11 }
  0x24   :  { %8187 = shalt.err (!%p8184_p1)
}
  0x25   :  { %74 = dma.hbm_to_vmem [thread:$0]  %s11191_s4, 2048, %s8445_s16, [#allocation10], %s8356_s25, %s8356_s25, %s8357_s26  }
  0x26   :  { %s8358_s23 = smov [#allocation12]   ;;  %s8359_s27 = smov [#allocation3]  }
  0x27   :  { %s96_s24 = sshll.u32 %s8358_s23, 4  ;;  %s30_s28 = sshll.u32 %s8359_s27, 4  ;;  %s97_s24 = int_to_ptr.vmem [resolvable:$true] %s96_s24  ;;  %s8482_s28 = int_to_ptr.vmem [resolvable:$true] %s30_s28 }
  0x28   :  { %s8188_s17 = scalar_lea.hbm %s11195_s8, 2048 }
  0x29   :  { %p8189_p2 = scmp.ne.s32.totalorder %s11195_s8, %s8188_s17  ;;  %p8192_p3 = scmp.lt.u32.totalorder %s8188_s17, %s11195_s8 }
  0x2b   :  { %p8194_p4 = pnand %p8192_p3, %p8189_p2 }
  0x2d   :  { %8197 = shalt.err (!%p8194_p4)
}
  0x2e   :  { %s8198_s4 = scalar_lea.vmem %s97_s24, 2048  ;;  %p8203_p6 = scmp.lt.s32.totalorder %s97_s24, %s97_s24 }
  0x2f   :  { %p8199_p5 = scmp.ne.s32.totalorder %s97_s24, %s8198_s4  ;;  %p8204_p7 = scmp.lt.s32.totalorder %s8198_s4, %s8198_s4 }
  0x31   :  { %p8205_p8 = por %p8204_p7, %p8203_p6 }
  0x33   :  { %p8206_p9 = pnand %p8205_p8, %p8199_p5 }
  0x35   :  { %8209 = shalt.err (!%p8206_p9)
}
  0x36   :  { %102 = dma.hbm_to_vmem [thread:$0]  %s11195_s8, 2048, %s97_s24, [#allocation13], %s8356_s25, %s8356_s25, %s8357_s26  }
  0x37   :  { %s8210_s23 = scalar_lea.hbm %s11187_s0, 4096 }
  0x38   :  { %p8211_p10 = scmp.ne.s32.totalorder %s11187_s0, %s8210_s23  ;;  %p8214_p11 = scmp.lt.u32.totalorder %s8210_s23, %s11187_s0 }
  0x3a   :  { %p8216_p12 = pnand %p8214_p11, %p8211_p10 }
  0x3c   :  { %8219 = shalt.err (!%p8216_p12)
}
  0x3d   :  { %s8220_s18 = scalar_lea.vmem %s8482_s28, 4096  ;;  %p8225_p0 = scmp.lt.s32.totalorder %s8482_s28, %s8482_s28 }
  0x3e   :  { %p8221_p13 = scmp.ne.s32.totalorder %s8482_s28, %s8220_s18  ;;  %p8226_p1 = scmp.lt.s32.totalorder %s8220_s18, %s8220_s18 }
  0x40   :  { %p8227_p2 = por %p8226_p1, %p8225_p0 }
  0x42   :  { %p8228_p3 = pnand %p8227_p2, %p8221_p13 }
  0x44   :  { %8231 = shalt.err (!%p8228_p3)
}
  0x45   :  { %36 = dma.hbm_to_vmem [thread:$0]  %s11187_s0, 4096, %s8482_s28, [#allocation4], %s8356_s25, %s8356_s25, %s8357_s26  }
  0x46   :  { %s8360_s19 = smov [#allocation8]   ;;  %s8361_s21 = smov [#allocation11]  }
  0x47   :  { %s56_s20 = sshll.u32 %s8360_s19, 4  ;;  %s84_s4 = sshll.u32 %s8361_s21, 4  ;;  %s57_s20 = int_to_ptr.vmem [resolvable:$true] %s56_s20  ;;  %s8519_s4 = int_to_ptr.vmem [resolvable:$true] %s84_s4 }
  0x48   :  { %s8232_s2 = scalar_lea.hbm %s11190_s3, 4608 }
  0x49   :  { %p8233_p4 = scmp.ne.s32.totalorder %s11190_s3, %s8232_s2  ;;  %p8236_p5 = scmp.lt.u32.totalorder %s8232_s2, %s11190_s3 }
  0x4b   :  { %p8238_p6 = pnand %p8236_p5, %p8233_p4 }
  0x4d   :  { %8241 = shalt.err (!%p8238_p6)
}
  0x4e   :  { %s8242_s0 = scalar_lea.vmem %s57_s20, 4608  ;;  %p8247_p8 = scmp.lt.s32.totalorder %s57_s20, %s57_s20 }
  0x4f   :  { %p8243_p7 = scmp.ne.s32.totalorder %s57_s20, %s8242_s0  ;;  %p8248_p9 = scmp.lt.s32.totalorder %s8242_s0, %s8242_s0 }
  0x51   :  { %p8249_p10 = por %p8248_p9, %p8247_p8 }
  0x53   :  { %p8250_p11 = pnand %p8249_p10, %p8243_p7 }
  0x55   :  { %8253 = shalt.err (!%p8250_p11)
}
  0x56   :  { %62 = dma.hbm_to_vmem [thread:$0]  %s11190_s3, 4608, %s57_s20, [#allocation7], %s8356_s25, %s8356_s25, %s8357_s26  }
  0x57   :  { %s8254_s8 = scalar_lea.hbm %s11194_s7, 9216 }
  0x58   :  { %p8255_p12 = scmp.ne.s32.totalorder %s11194_s7, %s8254_s8  ;;  %p8258_p13 = scmp.lt.u32.totalorder %s8254_s8, %s11194_s7 }
  0x5a   :  { %p8260_p0 = pnand %p8258_p13, %p8255_p12 }
  0x5c   :  { %8263 = shalt.err (!%p8260_p0)
}
  0x5d   :  { %s8264_s22 = scalar_lea.vmem %s8519_s4, 9216  ;;  %p8269_p2 = scmp.lt.s32.totalorder %s8519_s4, %s8519_s4 }
  0x5e   :  { %p8265_p1 = scmp.ne.s32.totalorder %s8519_s4, %s8264_s22  ;;  %p8270_p3 = scmp.lt.s32.totalorder %s8264_s22, %s8264_s22 }
  0x60   :  { %p8271_p4 = por %p8270_p3, %p8269_p2 }
  0x62   :  { %p8272_p5 = pnand %p8271_p4, %p8265_p1 }
  0x64   :  { %8275 = shalt.err (!%p8272_p5)
}
  0x65   :  { %s8362_s3 = smov 64   ;;  %s8363_s20 = smov 4  }
  0x66   :  { %90 = dma.hbm_to_vmem [thread:$0]  %s11194_s7, 9216, %s8519_s4, [#allocation10], %s8362_s3, %s8362_s3, %s8363_s20  }
  0x67   :  { %s8364_s23 = smov [#allocation14]   ;;  %s8365_s29 = smov [#allocation15]  }
  0x68   :  { %s112_s27 = sshll.u32 %s8364_s23, 4  ;;  %s126_s0 = sshll.u32 %s8365_s29, 4  ;;  %s113_s27 = int_to_ptr.vmem [resolvable:$true] %s112_s27  ;;  %s8556_s0 = int_to_ptr.vmem [resolvable:$true] %s126_s0 }
  0x69   :  { %s8276_s17 = scalar_lea.hbm %s11198_s11, 9216 }
  0x6a   :  { %p8277_p6 = scmp.ne.s32.totalorder %s11198_s11, %s8276_s17  ;;  %p8280_p7 = scmp.lt.u32.totalorder %s8276_s17, %s11198_s11 }
  0x6c   :  { %p8282_p8 = pnand %p8280_p7, %p8277_p6 }
  0x6e   :  { %8285 = shalt.err (!%p8282_p8)
}
  0x6f   :  { %s8286_s7 = scalar_lea.vmem %s113_s27, 9216  ;;  %p8291_p10 = scmp.lt.s32.totalorder %s113_s27, %s113_s27 }
  0x70   :  { %p8287_p9 = scmp.ne.s32.totalorder %s113_s27, %s8286_s7  ;;  %p8292_p11 = scmp.lt.s32.totalorder %s8286_s7, %s8286_s7 }
  0x72   :  { %p8293_p12 = por %p8292_p11, %p8291_p10 }
  0x74   :  { %p8294_p13 = pnand %p8293_p12, %p8287_p9 }
  0x76   :  { %8297 = shalt.err (!%p8294_p13)
}
  0x77   :  { %118 = dma.hbm_to_vmem [thread:$0]  %s11198_s11, 9216, %s113_s27, [#allocation13], %s8362_s3, %s8362_s3, %s8363_s20  }
  0x78   :  { %s8298_s2 = scalar_lea.hbm %s11200_s13, 1024 }
  0x79   :  { %p8299_p0 = scmp.ne.s32.totalorder %s11200_s13, %s8298_s2  ;;  %p8302_p1 = scmp.lt.u32.totalorder %s8298_s2, %s11200_s13 }
  0x7b   :  { %p8304_p2 = pnand %p8302_p1, %p8299_p0 }
  0x7d   :  { %8307 = shalt.err (!%p8304_p2)
}
  0x7e   :  { %s8308_s15 = scalar_lea.vmem %s8556_s0, 1024  ;;  %p8313_p4 = scmp.lt.s32.totalorder %s8556_s0, %s8556_s0 }
  0x7f   :  { %p8309_p3 = scmp.ne.s32.totalorder %s8556_s0, %s8308_s15  ;;  %p8314_p5 = scmp.lt.s32.totalorder %s8308_s15, %s8308_s15 }
  0x81   :  { %p8315_p6 = por %p8314_p5, %p8313_p4 }
  0x83   :  { %p8316_p7 = pnand %p8315_p6, %p8309_p3 }
  0x85   :  { %8319 = shalt.err (!%p8316_p7)
}
  0x86   :  { %132 = dma.hbm_to_vmem [thread:$0]  %s11200_s13, 1024, %s8556_s0, [#allocation16], %s8362_s3, %s8362_s3, %s8363_s20  }
  0x87   :  { %8342 = dma.done.wait [#allocation4], 4096  }
  0x88   :  { %8343 = vsyncadd [#allocation4], 4294963200 }
  0x89   :  { %8344 = dma.done.wait [#allocation7], 9216  }
  0x8a   :  { %8345 = vsyncadd [#allocation7], 4294958080 }
  0x8b   :  { %8346 = dma.done.wait [#allocation10], 11264  }
  0x8c   :  { %8347 = vsyncadd [#allocation10], 4294956032 }
  0x8d   :  { %8348 = dma.done.wait [#allocation13], 11264  }
  0x8e   :  { %8349 = vsyncadd [#allocation13], 4294956032 }
  0x8f   :  { %8350 = dma.done.wait [#allocation16], 1024  }
  0x90   :  { %8351 = vsyncadd [#allocation16], 4294966272  ;;  %v11202_v0 = vmov 0.0|0.0   ;;  %vm8367_vm0 = vmmov 0   ;;  %v8368_v1 = vmov 0.0   ;;  %v268_v2 = vld [vmem:[#allocation9] sm:$0xff] }
  0x91   :  { %7164 = vmatprep.subr.bf16.mxu0 %v11202_v0  ;;  %6720 = vmatprep.mubr.msk.f32.mxu0 %vm8367_vm0, %v8368_v1  ;;  %158 = vst [vmem:[#allocation2] sm:$0xff] %v8368_v1  ;;  %159 = vst [vmem:[#allocation2 + $0x8] sm:$0xff] %v8368_v1  ;;  %v269_v3 = vld [vmem:[#allocation9 + $0x8] sm:$0xff]  ;;  %v270_v4 = vld [vmem:[#allocation9 + $0x10] sm:$0xff] }
  0x92   :  { %160 = vst [vmem:[#allocation2 + $0x10] sm:$0xff] %v8368_v1  ;;  %161 = vst [vmem:[#allocation2 + $0x118] sm:$0xff] %v8368_v1  ;;  %7188 = vmatprep.subr.bf16.mxu1 %v11202_v0  ;;  %6755 = vmatprep.mubr.msk.f32.mxu1 %vm8367_vm0, %v8368_v1  ;;  %v7165_v5 = vpack.c.bf16 %v269_v3, %v268_v2  ;;  %v271_v6 = vld [vmem:[#allocation9 + $0x18] sm:$0xff]  ;;  %v272_v8 = vld [vmem:[#allocation9 + $0x20] sm:$0xff] }
  0x93   :  { %162 = vst [vmem:[#allocation2 + $0x120] sm:$0xff] %v8368_v1  ;;  %163 = vst [vmem:[#allocation2 + $0x128] sm:$0xff] %v8368_v1  ;;  %v7168_v7 = vpack.c.bf16 %v271_v6, %v270_v4  ;;  %v273_v9 = vld [vmem:[#allocation9 + $0x28] sm:$0xff]  ;;  %v8599_v10 = vld [vmem:[#allocation3] sm:$0xff] }
  0x94   :  { %7166 = vmatpush3.bf16.msra.mxu0 %v7165_v5  ;;  %7190 = vmatpush3.bf16.msra.mxu1 %v7165_v5  ;;  %v8601_v11 = vld [vmem:[#allocation3 + $0x8] sm:$0xff]  ;;  %v8603_v12 = vld [vmem:[#allocation3 + $0x10] sm:$0xff]  ;;  %v7171_v14 = vpack.c.bf16 %v273_v9, %v272_v8  ;;  %v8607_v15 = vld [vmem:[#allocation3 + $0x18] sm:$0xff] }
  0x95   :  { %7167 = vmatprep.subr.bf16.mxu0 %v11202_v0  ;;  %7191 = vmatprep.subr.bf16.mxu1 %v11202_v0  ;;  %v284_v13 = vadd.f32 %v8601_v11, %v8599_v10  ;;  %v274_v16 = vld [vmem:[#allocation9 + $0x30] sm:$0xff]  ;;  %v275_v17 = vld [vmem:[#allocation9 + $0x38] sm:$0xff]  ;;  %v8612_v19 = vld [vmem:[#allocation3 + $0x20] sm:$0xff] }
  0x96   :  { %v7174_v21 = vpack.c.bf16 %v275_v17, %v274_v16  ;;  %v8615_v22 = vld [vmem:[#allocation3 + $0x28] sm:$0xff]  ;;  %v276_v23 = vld [vmem:[#allocation9 + $0x40] sm:$0xff]  ;;  %v8620_v26 = vld [vmem:[#allocation3 + $0x30] sm:$0xff] }
  0x97   :  { %v285_v18 = vadd.f32 %v284_v13, %v8603_v12  ;;  %v277_v24 = vld [vmem:[#allocation9 + $0x48] sm:$0xff]  ;;  %v278_v27 = vld [vmem:[#allocation9 + $0x50] sm:$0xff]  ;;  %v279_v30 = vld [vmem:[#allocation9 + $0x58] sm:$0xff] }
  0x98   :  { %7169 = vmatpush3.bf16.msra.mxu0 %v7168_v7  ;;  %7193 = vmatpush3.bf16.msra.mxu1 %v7168_v7  ;;  %v7177_v29 = vpack.c.bf16 %v277_v24, %v276_v23  ;;  %v8623_v31 = vld [vmem:[#allocation3 + $0x38] sm:$0xff]  ;;  %v8625_v32 = vld [vmem:[#allocation3 + $0x40] sm:$0xff]  ;;  %v8630_v34 = vld [vmem:[#allocation3 + $0x48] sm:$0xff]  ;;  %v7180_v38 = vpack.c.bf16 %v279_v30, %v278_v27 }
  0x99   :  { %7170 = vmatprep.subr.bf16.mxu0 %v11202_v0  ;;  %7194 = vmatprep.subr.bf16.mxu1 %v11202_v0  ;;  %v286_v20 = vadd.f32 %v285_v18, %v8607_v15  ;;  %v280_v35 = vld [vmem:[#allocation9 + $0x60] sm:$0xff]  ;;  %v281_v36 = vld [vmem:[#allocation9 + $0x68] sm:$0xff]  ;;  %v8633_v39 = vld [vmem:[#allocation3 + $0x50] sm:$0xff] }
  0x9a   :  { %v8638_v41 = vld [vmem:[#allocation3 + $0x58] sm:$0xff]  ;;  %v282_v42 = vld [vmem:[#allocation9 + $0x70] sm:$0xff]  ;;  %v7183_v45 = vpack.c.bf16 %v281_v36, %v280_v35  ;;  %v8641_v46 = vld [vmem:[#allocation3 + $0x60] sm:$0xff] }
  0x9b   :  { %v287_v25 = vadd.f32 %v286_v20, %v8612_v19  ;;  %v283_v43 = vld [vmem:[#allocation9 + $0x78] sm:$0xff]  ;;  %v8646_v48 = vld [vmem:[#allocation3 + $0x68] sm:$0xff]  ;;  %v8649_v51 = vld [vmem:[#allocation3 + $0x70] sm:$0xff] }
  0x9c   :  { %7172 = vmatpush3.bf16.msra.mxu0 %v7171_v14  ;;  %7196 = vmatpush3.bf16.msra.mxu1 %v7171_v14  ;;  %v7186_v50 = vpack.c.bf16 %v283_v43, %v282_v42  ;;  %v8654_v53 = vld [vmem:[#allocation3 + $0x78] sm:$0xff]  ;;  %v8657_v55 = vld [vmem:[#allocation3 + $0x80] sm:$0xff]  ;;  %v8660_v57 = vld [vmem:[#allocation3 + $0x88] sm:$0xff] }
  0x9d   :  { %7173 = vmatprep.subr.bf16.mxu0 %v11202_v0  ;;  %7197 = vmatprep.subr.bf16.mxu1 %v11202_v0  ;;  %v288_v28 = vadd.f32 %v287_v25, %v8615_v22  ;;  %v8663_v59 = vld [vmem:[#allocation3 + $0x90] sm:$0xff]  ;;  %v8666_v61 = vld [vmem:[#allocation3 + $0x98] sm:$0xff]  ;;  %v8669_v63 = vld [vmem:[#allocation3 + $0xa0] sm:$0xff] }
  0x9e   :  { %v8672_v2 = vld [vmem:[#allocation3 + $0xa8] sm:$0xff]  ;;  %v8675_v4 = vld [vmem:[#allocation3 + $0xb0] sm:$0xff]  ;;  %v8678_v6 = vld [vmem:[#allocation3 + $0xb8] sm:$0xff] }
  0x9f   :  { %v289_v33 = vadd.f32 %v288_v28, %v8620_v26  ;;  %v8681_v8 = vld [vmem:[#allocation3 + $0xc0] sm:$0xff]  ;;  %v8684_v13 = vld [vmem:[#allocation3 + $0xc8] sm:$0xff]  ;;  %v8687_v16 = vld [vmem:[#allocation3 + $0xd0] sm:$0xff] }
  0xa0   :  { %7175 = vmatpush3.bf16.msra.mxu0 %v7174_v21  ;;  %7199 = vmatpush3.bf16.msra.mxu1 %v7174_v21  ;;  %v8690_v18 = vld [vmem:[#allocation3 + $0xd8] sm:$0xff]  ;;  %v8693_v21 = vld [vmem:[#allocation3 + $0xe0] sm:$0xff]  ;;  %v8696_v24 = vld [vmem:[#allocation3 + $0xe8] sm:$0xff] }
  0xa1   :  { %7176 = vmatprep.subr.bf16.mxu0 %v11202_v0  ;;  %7200 = vmatprep.subr.bf16.mxu1 %v11202_v0  ;;  %v290_v37 = vadd.f32 %v289_v33, %v8623_v31  ;;  %v8699_v27 = vld [vmem:[#allocation3 + $0xf0] sm:$0xff] }
  0xa3   :  { %v291_v40 = vadd.f32 %v290_v37, %v8625_v32 }
  0xa4   :  { %7178 = vmatpush3.bf16.msra.mxu0 %v7177_v29  ;;  %7202 = vmatpush3.bf16.msra.mxu1 %v7177_v29  ;;  %v8702_v29 = vld [vmem:[#allocation3 + $0xf8] sm:$0xff] }
  0xa5   :  { %7179 = vmatprep.subr.bf16.mxu0 %v11202_v0  ;;  %7203 = vmatprep.subr.bf16.mxu1 %v11202_v0  ;;  %v292_v44 = vadd.f32 %v291_v40, %v8630_v34 }
  0xa7   :  { %v293_v47 = vadd.f32 %v292_v44, %v8633_v39  ;;  %v391_v44 = vlaneseq }
  0xa8   :  { %7181 = vmatpush3.bf16.msra.mxu0 %v7180_v38  ;;  %7205 = vmatpush3.bf16.msra.mxu1 %v7180_v38 }
  0xa9   :  { %7182 = vmatprep.subr.bf16.mxu0 %v11202_v0  ;;  %7206 = vmatprep.subr.bf16.mxu1 %v11202_v0  ;;  %v294_v49 = vadd.f32 %v293_v47, %v8638_v41 }
  0xab   :  { %v295_v52 = vadd.f32 %v294_v49, %v8641_v46 }
  0xac   :  { %7184 = vmatpush3.bf16.msra.mxu0 %v7183_v45  ;;  %7208 = vmatpush3.bf16.msra.mxu1 %v7183_v45  ;;  %v392_v45 = vshrl.u32 %v391_v44, 7 }
  0xad   :  { %7185 = vmatprep.subr.bf16.mxu0 %v11202_v0  ;;  %7209 = vmatprep.subr.bf16.mxu1 %v11202_v0  ;;  %v296_v54 = vadd.f32 %v295_v52, %v8646_v48  ;;  %v7696_v0 = vld [vmem:[#allocation11 + $0x230] sm:$0xff]  }
  0xaf   :  { %v297_v56 = vadd.f32 %v296_v54, %v8649_v51 }
  0xb0   :  { %7187 = vmatpush3.bf16.msra.mxu0 %v7186_v50  ;;  %7211 = vmatpush3.bf16.msra.mxu1 %v7186_v50  ;;  %v8707_v50 = vsub.s32 0, %v392_v45 }
  0xb1   :  { %v298_v58 = vadd.f32 %v297_v56, %v8654_v53 }
  0xb2   :  { %11224 = vst [vmem:[#allocation24_spill] sm:$0xff] %v8707_v50 }
  0xb3   :  { %v299_v60 = vadd.f32 %v298_v58, %v8657_v55 }
  0xb5   :  { %v300_v62 = vadd.f32 %v299_v60, %v8660_v57 }
  0xb7   :  { %v301_v1 = vadd.f32 %v300_v62, %v8663_v59 }
  0xb9   :  { %v302_v3 = vadd.f32 %v301_v1, %v8666_v61 }
  0xbb   :  { %v303_v5 = vadd.f32 %v302_v3, %v8669_v63 }
  0xbd   :  { %v304_v7 = vadd.f32 %v303_v5, %v8672_v2 }
  0xbf   :  { %v305_v9 = vadd.f32 %v304_v7, %v8675_v4 }
  0xc1   :  { %v306_v14 = vadd.f32 %v305_v9, %v8678_v6 }
  0xc3   :  { %v307_v17 = vadd.f32 %v306_v14, %v8681_v8 }
  0xc5   :  { %v308_v20 = vadd.f32 %v307_v17, %v8684_v13 }
  0xc7   :  { %v309_v23 = vadd.f32 %v308_v20, %v8687_v16 }
  0xc9   :  { %v310_v25 = vadd.f32 %v309_v23, %v8690_v18 }
  0xcb   :  { %v311_v28 = vadd.f32 %v310_v25, %v8693_v21 }
  0xcd   :  { %v312_v30 = vadd.f32 %v311_v28, %v8696_v24 }
  0xcf   :  { %v313_v33 = vadd.f32 %v312_v30, %v8699_v27 }
  0xd1   :  { %v314_v35 = vadd.f32 %v313_v33, %v8702_v29 }
  0xd3   :  { %v315_v36 = vrot.slane %v314_v35, 4 }
  0xd5   :  { %v316_v37 = vadd.f32 %v315_v36, %v314_v35 }
  0xd7   :  { %v317_v38 = vrot.slane %v316_v37, 2 }
  0xd9   :  { %v318_v40 = vadd.f32 %v317_v38, %v316_v37 }
  0xdb   :  { %v319_v42 = vrot.slane %v318_v40, 1 }
  0xdd   :  { %v320_v43 = vadd.f32 %v319_v42, %v318_v40 }
  0xdf   :  { %6721 = vmatmul.mubr.f32.vlgmr.msra.gmra.mrb[0].mxu0 %v320_v43 }
 0x1b2   :  { %v387_v47 = vpop.f32.mrb[0].mxu0 }
 0x1b3   :  { %v6722_v49 = vpop.f32.mrb[1].mxu0  ;;  %v8710_v52 = vrot.slane %v387_v47, %v8707_v50 }
 0x1b5   :  { %v8714_v54 = vsub.f32 %v8599_v10, %v8710_v52  ;;  %v8718_v56 = vsub.f32 %v8601_v11, %v8710_v52  ;;  %v8722_v58 = vsub.f32 %v8603_v12, %v8710_v52  ;;  %v8730_v1 = vsub.f32 %v8607_v15, %v8710_v52 }
 0x1b6   :  { %v8734_v10 = vsub.f32 %v8612_v19, %v8710_v52  ;;  %v8740_v12 = vsub.f32 %v8615_v22, %v8710_v52  ;;  %v8746_v15 = vsub.f32 %v8620_v26, %v8710_v52  ;;  %v8752_v14 = vsub.f32 %v8623_v31, %v8710_v52 }
 0x1b7   :  { %v427_v60 = vmul.f32 %v8714_v54, %v8714_v54  ;;  %v428_v62 = vmul.f32 %v8718_v56, %v8718_v56  ;;  %v429_v11 = vmul.f32 %v8722_v58, %v8722_v58  ;;  %v430_v5 = vmul.f32 %v8730_v1, %v8730_v1 }
 0x1b8   :  { %v431_v19 = vmul.f32 %v8734_v10, %v8734_v10  ;;  %v432_v22 = vmul.f32 %v8740_v12, %v8740_v12  ;;  %v8758_v20 = vsub.f32 %v8625_v32, %v8710_v52  ;;  %v433_v26 = vmul.f32 %v8746_v15, %v8746_v15 }
 0x1b9   :  { %v459_v3 = vadd.f32 %v428_v62, %v427_v60  ;;  %v8764_v25 = vsub.f32 %v8630_v34, %v8710_v52  ;;  %v434_v31 = vmul.f32 %v8752_v14, %v8752_v14  ;;  %v8770_v30 = vsub.f32 %v8633_v39, %v8710_v52 }
 0x1ba   :  { %v435_v32 = vmul.f32 %v8758_v20, %v8758_v20  ;;  %v8776_v35 = vsub.f32 %v8638_v41, %v8710_v52  ;;  %v8782_v37 = vsub.f32 %v8641_v46, %v8710_v52  ;;  %v8788_v40 = vsub.f32 %v8646_v48, %v8710_v52 }
 0x1bb   :  { %v460_v7 = vadd.f32 %v459_v3, %v429_v11  ;;  %v436_v34 = vmul.f32 %v8764_v25, %v8764_v25  ;;  %v437_v39 = vmul.f32 %v8770_v30, %v8770_v30  ;;  %v8794_v43 = vsub.f32 %v8649_v51, %v8710_v52 }
 0x1bc   :  { %v438_v41 = vmul.f32 %v8776_v35, %v8776_v35  ;;  %v439_v46 = vmul.f32 %v8782_v37, %v8782_v37  ;;  %v8800_v45 = vsub.f32 %v8654_v53, %v8710_v52  ;;  %v440_v48 = vmul.f32 %v8788_v40, %v8788_v40 }
 0x1bd   :  { %v461_v9 = vadd.f32 %v460_v7, %v430_v5  ;;  %v8806_v49 = vsub.f32 %v8657_v55, %v8710_v52  ;;  %v441_v51 = vmul.f32 %v8794_v43, %v8794_v43  ;;  %v8812_v62 = vsub.f32 %v8660_v57, %v8710_v52 }
 0x1be   :  { %v442_v53 = vmul.f32 %v8800_v45, %v8800_v45  ;;  %v8818_v3 = vsub.f32 %v8663_v59, %v8710_v52  ;;  %v8824_v7 = vsub.f32 %v8666_v61, %v8710_v52 }
 0x1bf   :  { %v462_v17 = vadd.f32 %v461_v9, %v431_v19  ;;  %v443_v55 = vmul.f32 %v8806_v49, %v8806_v49  ;;  %v444_v57 = vmul.f32 %v8812_v62, %v8812_v62  ;;  %v8830_v9 = vsub.f32 %v8669_v63, %v8710_v52 }
 0x1c0   :  { %v445_v59 = vmul.f32 %v8818_v3, %v8818_v3  ;;  %v446_v61 = vmul.f32 %v8824_v7, %v8824_v7 }
 0x1c1   :  { %v463_v23 = vadd.f32 %v462_v17, %v432_v22  ;;  %v8836_v17 = vsub.f32 %v8672_v2, %v8710_v52  ;;  %v447_v63 = vmul.f32 %v8830_v9, %v8830_v9 }
 0x1c3   :  { %v464_v28 = vadd.f32 %v463_v23, %v433_v26  ;;  %v8842_v23 = vsub.f32 %v8675_v4, %v8710_v52  ;;  %v448_v2 = vmul.f32 %v8836_v17, %v8836_v17 }
 0x1c5   :  { %v465_v33 = vadd.f32 %v464_v28, %v434_v31  ;;  %v8848_v28 = vsub.f32 %v8678_v6, %v8710_v52  ;;  %v449_v4 = vmul.f32 %v8842_v23, %v8842_v23 }
 0x1c7   :  { %v466_v36 = vadd.f32 %v465_v33, %v435_v32  ;;  %v8854_v33 = vsub.f32 %v8681_v8, %v8710_v52  ;;  %v450_v6 = vmul.f32 %v8848_v28, %v8848_v28 }
 0x1c9   :  { %v467_v38 = vadd.f32 %v466_v36, %v436_v34  ;;  %v8860_v36 = vsub.f32 %v8684_v13, %v8710_v52  ;;  %v451_v8 = vmul.f32 %v8854_v33, %v8854_v33 }
 0x1cb   :  { %v468_v42 = vadd.f32 %v467_v38, %v437_v39  ;;  %v8866_v38 = vsub.f32 %v8687_v16, %v8710_v52  ;;  %v452_v13 = vmul.f32 %v8860_v36, %v8860_v36 }
 0x1cd   :  { %v469_v44 = vadd.f32 %v468_v42, %v438_v41  ;;  %v8872_v42 = vsub.f32 %v8690_v18, %v8710_v52  ;;  %v453_v16 = vmul.f32 %v8866_v38, %v8866_v38 }
 0x1cf   :  { %v470_v47 = vadd.f32 %v469_v44, %v439_v46  ;;  %v8878_v44 = vsub.f32 %v8693_v21, %v8710_v52  ;;  %v454_v18 = vmul.f32 %v8872_v42, %v8872_v42 }
 0x1d1   :  { %v471_v60 = vadd.f32 %v470_v47, %v440_v48  ;;  %v8884_v47 = vsub.f32 %v8696_v24, %v8710_v52  ;;  %v455_v21 = vmul.f32 %v8878_v44, %v8878_v44 }
 0x1d3   :  { %v472_v11 = vadd.f32 %v471_v60, %v441_v51  ;;  %v8890_v60 = vsub.f32 %v8699_v27, %v8710_v52  ;;  %v456_v24 = vmul.f32 %v8884_v47, %v8884_v47 }
 0x1d5   :  { %v473_v5 = vadd.f32 %v472_v11, %v442_v53  ;;  %v8896_v11 = vsub.f32 %v8702_v29, %v8710_v52  ;;  %v7628_v52 = vld [vmem:[#allocation11 + $0x40] sm:$0xff]  }
 0x1d6   :  { %5950 = vmatprep.subr.bf16.mxu1 %v7628_v52  ;;  %v7652_v52 = vld [vmem:[#allocation11 + $0x128] sm:$0xff]  }
 0x1d7   :  { %v474_v19 = vadd.f32 %v473_v5, %v443_v55  ;;  %v457_v5 = vmul.f32 %v8890_v60, %v8890_v60  ;;  %v458_v27 = vmul.f32 %v8896_v11, %v8896_v11 }
 0x1d9   :  { %v475_v22 = vadd.f32 %v474_v19, %v444_v57 }
 0x1db   :  { %v476_v26 = vadd.f32 %v475_v22, %v445_v59 }
 0x1dd   :  { %v477_v31 = vadd.f32 %v476_v26, %v446_v61 }
 0x1df   :  { %v478_v32 = vadd.f32 %v477_v31, %v447_v63 }
 0x1e1   :  { %v479_v34 = vadd.f32 %v478_v32, %v448_v2  ;;  %v7629_v2 = vld [vmem:[#allocation11] sm:$0xff]   ;;  %v7630_v32 = vld [vmem:[#allocation11 + $0x48] sm:$0xff]  }
 0x1e3   :  { %v480_v39 = vadd.f32 %v479_v34, %v449_v4  ;;  %v7631_v4 = vld [vmem:[#allocation11 + $0x8] sm:$0xff]   ;;  %v7634_v34 = vld [vmem:[#allocation11 + $0x50] sm:$0xff]  }
 0x1e5   :  { %v481_v41 = vadd.f32 %v480_v39, %v450_v6  ;;  %v7635_v6 = vld [vmem:[#allocation11 + $0x10] sm:$0xff]   ;;  %v7632_v39 = vld [vmem:[#allocation11 + $0x100] sm:$0xff]  }
 0x1e6   :  { %5814 = vmatprep.subr.bf16.mxu0 %v7632_v39  ;;  %v7656_v39 = vld [vmem:[#allocation11 + $0x130] sm:$0xff]  }
 0x1e7   :  { %v482_v46 = vadd.f32 %v481_v41, %v451_v8  ;;  %v7633_v8 = vld [vmem:[#allocation11 + $0xc0] sm:$0xff]   ;;  %v7638_v41 = vld [vmem:[#allocation11 + $0x58] sm:$0xff]  }
 0x1e8   :  { %5815 = vmatpush3.bf16.msra.mxu0 %v7633_v8 }
 0x1e9   :  { %v483_v48 = vadd.f32 %v482_v46, %v452_v13  ;;  %v7639_v13 = vld [vmem:[#allocation11 + $0x18] sm:$0xff]   ;;  %v7636_v46 = vld [vmem:[#allocation11 + $0x108] sm:$0xff]  }
 0x1ea   :  { %5816 = vmatprep.subr.bf16.mxu0 %v7636_v46  ;;  %v7659_v46 = vld [vmem:[#allocation11 + $0xf8] sm:$0xff]  }
 0x1eb   :  { %v484_v51 = vadd.f32 %v483_v48, %v453_v16  ;;  %v7637_v16 = vld [vmem:[#allocation11 + $0xc8] sm:$0xff]   ;;  %v7642_v48 = vld [vmem:[#allocation11 + $0x60] sm:$0xff]  }
 0x1ec   :  { %5817 = vmatpush3.bf16.msra.mxu0 %v7637_v16  ;;  %v8907_v16 = vld [vmem:[#allocation11 + $0x140] sm:$0xff]  }
 0x1ed   :  { %v485_v53 = vadd.f32 %v484_v51, %v454_v18  ;;  %v7643_v18 = vld [vmem:[#allocation11 + $0x20] sm:$0xff]   ;;  %v7640_v51 = vld [vmem:[#allocation11 + $0x110] sm:$0xff]  }
 0x1ee   :  { %5818 = vmatprep.subr.bf16.mxu0 %v7640_v51 }
 0x1ef   :  { %v486_v55 = vadd.f32 %v485_v53, %v455_v21  ;;  %v7641_v21 = vld [vmem:[#allocation11 + $0xd0] sm:$0xff]   ;;  %v7646_v53 = vld [vmem:[#allocation11 + $0x68] sm:$0xff]  }
 0x1f0   :  { %5819 = vmatpush3.bf16.msra.mxu0 %v7641_v21  ;;  %v496_v21 = vld [vmem:[%s11192_s5] sm:$0x1] }
 0x1f1   :  { %v487_v57 = vadd.f32 %v486_v55, %v456_v24  ;;  %v7647_v24 = vld [vmem:[#allocation11 + $0x28] sm:$0xff]   ;;  %v7644_v55 = vld [vmem:[#allocation11 + $0x118] sm:$0xff]  }
 0x1f2   :  { %5820 = vmatprep.subr.bf16.mxu0 %v7644_v55 }
 0x1f3   :  { %v488_v19 = vadd.f32 %v487_v57, %v457_v5  ;;  %v7645_v5 = vld [vmem:[#allocation11 + $0xd8] sm:$0xff]   ;;  %v7650_v57 = vld [vmem:[#allocation11 + $0x70] sm:$0xff]  }
 0x1f4   :  { %5821 = vmatpush3.bf16.msra.mxu0 %v7645_v5  ;;  %v8919_v5 = vld [vmem:[%s11193_s6] ss:$0 sm:$0xff] }
 0x1f5   :  { %v489_v59 = vadd.f32 %v488_v19, %v458_v27  ;;  %v7651_v27 = vld [vmem:[#allocation11 + $0x30] sm:$0xff]   ;;  %v7648_v19 = vld [vmem:[#allocation11 + $0x120] sm:$0xff]  }
 0x1f6   :  { %5822 = vmatprep.subr.bf16.mxu0 %v7648_v19  ;;  %v7665_v19 = vld [vmem:[#allocation11 + $0x80] sm:$0xff]  }
 0x1f7   :  { %v490_v22 = vrot.slane %v489_v59, 4 }
 0x1f9   :  { %v491_v61 = vadd.f32 %v490_v22, %v489_v59  ;;  %v7649_v59 = vld [vmem:[#allocation11 + $0xe0] sm:$0xff]   ;;  %v7654_v22 = vld [vmem:[#allocation11 + $0x78] sm:$0xff]  }
 0x1fa   :  { %5823 = vmatpush3.bf16.msra.mxu0 %v7649_v59 }
 0x1fb   :  { %v492_v26 = vrot.slane %v491_v61, 2  ;;  %5824 = vmatprep.subr.bf16.mxu0 %v7652_v52 }
 0x1fd   :  { %v493_v63 = vadd.f32 %v492_v26, %v491_v61  ;;  %v7655_v61 = vld [vmem:[#allocation11 + $0x38] sm:$0xff]   ;;  %v196_v26 = vld [vmem:[#allocation6] sm:$0xff] }
 0x1ff   :  { %v494_v31 = vrot.slane %v493_v63, 1 }
 0x201   :  { %v495_v29 = vadd.f32 %v494_v31, %v493_v63  ;;  %v197_v63 = vld [vmem:[#allocation6 + $0x8] sm:$0xff]  ;;  %v938_v31 = vld [vmem:[#allocation2 + $0x7] sm:$0xff] }
 0x203   :  { %6756 = vmatmul.mubr.f32.vlgmr.msra.gmra.mrb[0].mxu1 %v495_v29  ;;  %v939_v29 = vld [vmem:[#allocation2 + $0xf] sm:$0xff] }
 0x204   :  { %5951 = vmatpush3.bf16.msra.mxu1 %v7629_v2  ;;  %v8040_v2 = vld [vmem:[#allocation2] sm:$0xff] }
 0x205   :  { %5952 = vmatprep.subr.bf16.mxu1 %v7630_v32  ;;  %v1083_v32 = vpack.c.bf16 %v8040_v2, %v8040_v2 }
 0x207   :  { %1875 = vmatprep.mubr.bf16.mxu1 %v1083_v32 }
 0x208   :  { %5953 = vmatpush3.bf16.msra.mxu1 %v7631_v4  ;;  %v974_v4 = vmul.f32 %v938_v31, %v196_v26 }
 0x209   :  { %5954 = vmatprep.subr.bf16.mxu1 %v7634_v34  ;;  %v975_v34 = vmul.f32 %v939_v29, %v197_v63 }
 0x20b   :  { %v8904_v8 = vpack.c.bf16 %v975_v34, %v974_v4 }
 0x20c   :  { %5955 = vmatpush3.bf16.msra.mxu1 %v7635_v6  ;;  %v7653_v6 = vld [vmem:[#allocation11 + $0xe8] sm:$0xff]  }
 0x20d   :  { %5956 = vmatprep.subr.bf16.mxu1 %v7638_v41  ;;  %11225 = vst [vmem:[#allocation25_spill] sm:$0xff] %v8904_v8  ;;  %5825 = vmatpush3.bf16.msra.mxu0 %v7653_v6  ;;  %v7657_v41 = vld [vmem:[#allocation11 + $0xf0] sm:$0xff]  }
 0x20e   :  { %5826 = vmatprep.subr.bf16.mxu0 %v7656_v39 }
 0x210   :  { %5957 = vmatpush3.bf16.msra.mxu1 %v7639_v13  ;;  %v7658_v13 = vld [vmem:[#allocation11 + $0x138] sm:$0xff]  }
 0x211   :  { %5958 = vmatprep.subr.bf16.mxu1 %v7642_v48  ;;  %5827 = vmatpush3.bf16.msra.mxu0 %v7657_v41 }
 0x212   :  { %5828 = vmatprep.subr.bf16.mxu0 %v7658_v13 }
 0x214   :  { %5959 = vmatpush3.bf16.msra.mxu1 %v7643_v18 }
 0x215   :  { %5960 = vmatprep.subr.bf16.mxu1 %v7646_v53  ;;  %5829 = vmatpush3.bf16.msra.mxu0 %v7659_v46 }
 0x216   :  { %6758 = vmatprep.subr.bf16.mxu0 %v8907_v16 }
 0x218   :  { %5961 = vmatpush3.bf16.msra.mxu1 %v7647_v24 }
 0x219   :  { %5962 = vmatprep.subr.bf16.mxu1 %v7650_v57 }
 0x21c   :  { %5963 = vmatpush3.bf16.msra.mxu1 %v7651_v27 }
 0x21d   :  { %5964 = vmatprep.subr.bf16.mxu1 %v7654_v22 }
 0x220   :  { %5965 = vmatpush3.bf16.msra.mxu1 %v7655_v61 }
 0x221   :  { %6806 = vmatprep.subr.bf16.mxu1 %v7665_v19 }
 0x223   :  { %1876 = vmatmul.mubr.bf16.vlgmr.msra.gmra.mrb[4].mxu1 %v8904_v8 }
 0x224   :  { %6807 = vmatpush3.bf16.msra.mxu1 %v7665_v19 }
 0x2d6   :  { %v563_v48 = vpop.f32.mrb[0].mxu1 }
 0x2d7   :  { %v564_v18 = vadd.f32 1e-05, %v563_v48  ;;  %v6757_v51 = vpop.f32.mrb[1].mxu1 }
 0x2d9   :  { %7780 = vrsqrt.f32 %v564_v18 }
 0x2e3   :  { %v7781_v53 = vpop.eup %7780 }
 0x2e4   :  { %v568_v24 = vmul.f32 %v7781_v53, %v496_v21 }
 0x2e6   :  { %v8914_v55 = vrot.slane %v568_v24, %v8707_v50  ;;  %v11226_v50 = vmov 0.0|0.0  }
 0x2e8   :  { %v595_v57 = vmul.f32 %v8914_v55, %v8830_v9  ;;  %v596_v27 = vmul.f32 %v8914_v55, %v8836_v17  ;;  %v597_v59 = vmul.f32 %v8914_v55, %v8842_v23  ;;  %v598_v22 = vmul.f32 %v8914_v55, %v8848_v28 }
 0x2e9   :  { %v599_v61 = vmul.f32 %v8914_v55, %v8854_v33  ;;  %v600_v26 = vmul.f32 %v8914_v55, %v8860_v36  ;;  %v601_v63 = vmul.f32 %v8914_v55, %v8866_v38  ;;  %v602_v9 = vmul.f32 %v8914_v55, %v8872_v42 }
 0x2ea   :  { %v8938_v17 = vadd.f32 %v8919_v5, %v595_v57  ;;  %v8941_v23 = vadd.f32 %v8919_v5, %v596_v27  ;;  %v603_v28 = vmul.f32 %v8914_v55, %v8878_v44  ;;  %v8946_v33 = vadd.f32 %v8919_v5, %v597_v59  ;;  %v7667_v27 = vld [vmem:[#allocation11 + $0x88] sm:$0xff]  }
 0x2eb   :  { %v8949_v36 = vadd.f32 %v8919_v5, %v598_v22  ;;  %v8952_v38 = vadd.f32 %v8919_v5, %v599_v61  ;;  %v604_v42 = vmul.f32 %v8914_v55, %v8884_v47  ;;  %v8957_v31 = vadd.f32 %v8919_v5, %v600_v26  ;;  %6808 = vmatprep.subr.bf16.mxu1 %v7667_v27 }
 0x2ec   :  { %v605_v29 = vmul.f32 %v8914_v55, %v8890_v60  ;;  %v8962_v44 = vadd.f32 %v8919_v5, %v601_v63  ;;  %v5581_v52 = vmul.f32 -1.442695, %v8938_v17  ;;  %v5582_v2 = vmul.f32 -1.442695, %v8941_v23  ;;  %6809 = vmatpush3.bf16.msra.mxu1 %v7667_v27 }
 0x2ed   :  { %v606_v32 = vmul.f32 %v8914_v55, %v8896_v11  ;;  %v8969_v4 = vadd.f32 %v8919_v5, %v602_v9  ;;  %v5583_v47 = vmul.f32 -1.442695, %v8946_v33  ;;  %v5584_v34 = vmul.f32 -1.442695, %v8949_v36 }
 0x2ee   :  { %v8974_v6 = vadd.f32 %v8919_v5, %v603_v28  ;;  %v5585_v60 = vmul.f32 -1.442695, %v8952_v38  ;;  %7782 = vpow2.f32 %v5581_v52  ;;  %v575_v39 = vmul.f32 %v8914_v55, %v8714_v54 }
 0x2ef   :  { %v8980_v41 = vadd.f32 %v8919_v5, %v604_v42  ;;  %v5586_v11 = vmul.f32 -1.442695, %v8957_v31  ;;  %7784 = vpow2.f32 %v5582_v2  ;;  %v8984_v13 = vadd.f32 %v8919_v5, %v605_v29 }
 0x2f0   :  { %v5587_v46 = vmul.f32 -1.442695, %v8962_v44  ;;  %7786 = vpow2.f32 %v5583_v47  ;;  %v8988_v48 = vadd.f32 %v8919_v5, %v606_v32  ;;  %v5588_v18 = vmul.f32 -1.442695, %v8969_v4 }
 0x2f1   :  { %7788 = vpow2.f32 %v5584_v34  ;;  %v5589_v54 = vmul.f32 -1.442695, %v8974_v6  ;;  %v8993_v51 = vadd.f32 %v8919_v5, %v575_v39  ;;  %v5590_v21 = vmul.f32 -1.442695, %v8980_v41 }
 0x2f2   :  { %7790 = vpow2.f32 %v5585_v60  ;;  %v5591_v53 = vmul.f32 -1.442695, %v8984_v13  ;;  %v5592_v24 = vmul.f32 -1.442695, %v8988_v48  ;;  %v576_v19 = vmul.f32 %v8914_v55, %v8718_v56 }
 0x2f3   :  { %7792 = vpow2.f32 %v5586_v11  ;;  %v5561_v57 = vmul.f32 -1.442695, %v8993_v51  ;;  %v577_v26 = vmul.f32 %v8914_v55, %v8722_v58  ;;  %v578_v28 = vmul.f32 %v8914_v55, %v8730_v1 }
 0x2f4   :  { %7794 = vpow2.f32 %v5587_v46  ;;  %v9006_v56 = vadd.f32 %v8919_v5, %v576_v19  ;;  %v579_v52 = vmul.f32 %v8914_v55, %v8734_v10  ;;  %v580_v58 = vmul.f32 %v8914_v55, %v8740_v12 }
 0x2f5   :  { %7796 = vpow2.f32 %v5588_v18  ;;  %v9013_v1 = vadd.f32 %v8919_v5, %v577_v26  ;;  %v581_v60 = vmul.f32 %v8914_v55, %v8746_v15  ;;  %v9018_v10 = vadd.f32 %v8919_v5, %v578_v28 }
 0x2f6   :  { %7798 = vpow2.f32 %v5589_v54  ;;  %v5562_v12 = vmul.f32 -1.442695, %v9006_v56  ;;  %v9022_v54 = vadd.f32 %v8919_v5, %v579_v52  ;;  %v582_v15 = vmul.f32 %v8914_v55, %v8752_v14 }
 0x2f7   :  { %7800 = vpow2.f32 %v5590_v21  ;;  %v5563_v19 = vmul.f32 -1.442695, %v9013_v1  ;;  %v5564_v26 = vmul.f32 -1.442695, %v9018_v10 }
 0x2f8   :  { %v7783_v59 = vpop.eup %7782  ;;  %7802 = vpow2.f32 %v5591_v53  ;;  %v5565_v14 = vmul.f32 -1.442695, %v9022_v54 }
 0x2f9   :  { %v7785_v22 = vpop.eup %7784  ;;  %7804 = vpow2.f32 %v5592_v24  ;;  %v762_v61 = vadd.f32 1.0, %v7783_v59  ;;  %v9025_v24 = vadd.f32 %v8919_v5, %v580_v58  ;;  %v9031_v59 = vadd.f32 %v8919_v5, %v581_v60 }
 0x2fa   :  { %v7787_v63 = vpop.eup %7786  ;;  %v763_v9 = vadd.f32 1.0, %v7785_v22  ;;  %7806 = vpow2.f32 %v5561_v57 }
 0x2fb   :  { %v7789_v42 = vpop.eup %7788  ;;  %v764_v29 = vadd.f32 1.0, %v7787_v63  ;;  %7808 = vrcp.f32 %v762_v61  ;;  %v583_v63 = vmul.f32 %v8914_v55, %v8758_v20 }
 0x2fc   :  { %v7791_v2 = vpop.eup %7790  ;;  %v765_v32 = vadd.f32 1.0, %v7789_v42  ;;  %7810 = vrcp.f32 %v763_v9  ;;  %v584_v42 = vmul.f32 %v8914_v55, %v8764_v25 }
 0x2fd   :  { %v7793_v47 = vpop.eup %7792  ;;  %v766_v34 = vadd.f32 1.0, %v7791_v2  ;;  %7812 = vrcp.f32 %v764_v29  ;;  %v9040_v2 = vadd.f32 %v8919_v5, %v582_v15  ;;  %v9047_v25 = vadd.f32 %v8919_v5, %v583_v63 }
 0x2fe   :  { %v7795_v39 = vpop.eup %7794  ;;  %v767_v11 = vadd.f32 1.0, %v7793_v47  ;;  %7814 = vrcp.f32 %v765_v32  ;;  %v585_v32 = vmul.f32 %v8914_v55, %v8770_v30  ;;  %v5566_v47 = vmul.f32 -1.442695, %v9025_v24 }
 0x2ff   :  { %v7797_v46 = vpop.eup %7796  ;;  %v768_v18 = vadd.f32 1.0, %v7795_v39  ;;  %7816 = vrcp.f32 %v766_v34  ;;  %v5567_v34 = vmul.f32 -1.442695, %v9031_v59  ;;  %v586_v39 = vmul.f32 %v8914_v55, %v8776_v35 }
 0x300   :  { %v7799_v21 = vpop.eup %7798  ;;  %v769_v53 = vadd.f32 1.0, %v7797_v46  ;;  %7818 = vrcp.f32 %v767_v11  ;;  %v7669_v46 = vld [vmem:[#allocation11 + $0x90] sm:$0xff]   ;;  %v9053_v30 = vadd.f32 %v8919_v5, %v584_v42  ;;  %v9061_v35 = vadd.f32 %v8919_v5, %v585_v32 }
 0x301   :  { %v7801_v57 = vpop.eup %7800  ;;  %v770_v27 = vadd.f32 1.0, %v7799_v21  ;;  %7820 = vrcp.f32 %v768_v18  ;;  %v587_v21 = vmul.f32 %v8914_v55, %v8782_v37  ;;  %6810 = vmatprep.subr.bf16.mxu1 %v7669_v46  ;;  %v588_v37 = vmul.f32 %v8914_v55, %v8788_v40 }
 0x302   :  { %v7803_v22 = vpop.eup %7802  ;;  %v771_v61 = vadd.f32 1.0, %v7801_v57  ;;  %7822 = vrcp.f32 %v769_v53  ;;  %6811 = vmatpush3.bf16.msra.mxu1 %v7669_v46  ;;  %v9071_v63 = vadd.f32 %v8919_v5, %v586_v39  ;;  %v5571_v42 = vmul.f32 -1.442695, %v9061_v35 }
 0x303   :  { %v7805_v9 = vpop.eup %7804  ;;  %v772_v28 = vadd.f32 1.0, %v7803_v22  ;;  %7824 = vrcp.f32 %v770_v27  ;;  %v5568_v27 = vmul.f32 -1.442695, %v9040_v2  ;;  %v9075_v40 = vadd.f32 %v8919_v5, %v587_v21 }
 0x304   :  { %v7807_v29 = vpop.eup %7806  ;;  %v773_v52 = vadd.f32 1.0, %v7805_v9  ;;  %7826 = vrcp.f32 %v771_v61  ;;  %v5569_v61 = vmul.f32 -1.442695, %v9047_v25 }
 0x305   :  { %v7809_v58 = vpop.eup %7808  ;;  %7828 = vrcp.f32 %v772_v28  ;;  %v742_v20 = vadd.f32 1.0, %v7807_v29 }
 0x306   :  { %v7811_v60 = vpop.eup %7810  ;;  %7830 = vrcp.f32 %v773_v52  ;;  %v858_v11 = vmul.f32 %v7809_v58, %v8938_v17 }
 0x307   :  { %v7813_v18 = vpop.eup %7812  ;;  %7832 = vpow2.f32 %v5562_v12  ;;  %v859_v53 = vmul.f32 %v7811_v60, %v8941_v23 }
 0x308   :  { %v7815_v15 = vpop.eup %7814  ;;  %v860_v57 = vmul.f32 %v7813_v18, %v8946_v33  ;;  %7834 = vrcp.f32 %v742_v20  ;;  %890 = vst [vmem:[#allocation2 + $0xb8] sm:$0xff] %v858_v11  ;;  %v7670_v20 = vld [vmem:[#allocation11 + $0x98] sm:$0xff]  }
 0x309   :  { %v7817_v17 = vpop.eup %7816  ;;  %v861_v12 = vmul.f32 %v7815_v15, %v8949_v36  ;;  %7836 = vpow2.f32 %v5563_v19  ;;  %891 = vst [vmem:[#allocation2 + $0xc0] sm:$0xff] %v859_v53  ;;  %v9066_v23 = vpack.c.bf16 %v859_v53, %v858_v11  ;;  %6812 = vmatprep.subr.bf16.mxu1 %v7670_v20 }
 0x30a   :  { %v7819_v33 = vpop.eup %7818  ;;  %v862_v22 = vmul.f32 %v7817_v17, %v8952_v38  ;;  %892 = vst [vmem:[#allocation2 + $0xc8] sm:$0xff] %v860_v57  ;;  %7838 = vpow2.f32 %v5564_v26  ;;  %v5570_v26 = vmul.f32 -1.442695, %v9053_v30  ;;  %6813 = vmatpush3.bf16.msra.mxu1 %v7670_v20  ;;  %v7671_v17 = vld [vmem:[#allocation11 + $0xa0] sm:$0xff]  }
 0x30b   :  { %v7821_v9 = vpop.eup %7820  ;;  %v863_v36 = vmul.f32 %v7819_v33, %v8957_v31  ;;  %893 = vst [vmem:[#allocation2 + $0xd0] sm:$0xff] %v861_v12  ;;  %7840 = vpow2.f32 %v5565_v14  ;;  %v9077_v19 = vpack.c.bf16 %v861_v12, %v860_v57  ;;  %v9084_v31 = vadd.f32 %v8919_v5, %v588_v37  ;;  %v7672_v33 = vld [vmem:[#allocation11 + $0xa8] sm:$0xff]   ;;  %6814 = vmatprep.subr.bf16.mxu1 %v7671_v17 }
 0x30c   :  { %v7823_v28 = vpop.eup %7822  ;;  %v864_v38 = vmul.f32 %v7821_v9, %v8962_v44  ;;  %894 = vst [vmem:[#allocation2 + $0xd8] sm:$0xff] %v862_v22  ;;  %7842 = vpow2.f32 %v5566_v47  ;;  %v5572_v44 = vmul.f32 -1.442695, %v9071_v63 }
 0x30d   :  { %v7825_v29 = vpop.eup %7824  ;;  %v865_v52 = vmul.f32 %v7823_v28, %v8969_v4  ;;  %895 = vst [vmem:[#allocation2 + $0xe0] sm:$0xff] %v863_v36  ;;  %7844 = vpow2.f32 %v5567_v34  ;;  %v9086_v14 = vpack.c.bf16 %v863_v36, %v862_v22  ;;  %v5573_v4 = vmul.f32 -1.442695, %v9075_v40 }
 0x30e   :  { %v7827_v32 = vpop.eup %7826  ;;  %v866_v58 = vmul.f32 %v7825_v29, %v8974_v6  ;;  %896 = vst [vmem:[#allocation2 + $0xe8] sm:$0xff] %v864_v38  ;;  %7846 = vpow2.f32 %v5568_v27  ;;  %v5574_v46 = vmul.f32 -1.442695, %v9084_v31  ;;  %v589_v27 = vmul.f32 %v8914_v55, %v8794_v43  ;;  %6815 = vmatpush3.bf16.msra.mxu1 %v7671_v17 }
 0x30f   :  { %v7829_v47 = vpop.eup %7828  ;;  %v867_v60 = vmul.f32 %v7827_v32, %v8980_v41  ;;  %897 = vst [vmem:[#allocation2 + $0xf0] sm:$0xff] %v865_v52  ;;  %7848 = vpow2.f32 %v5569_v61  ;;  %v590_v61 = vmul.f32 %v8914_v55, %v8800_v45  ;;  %v591_v28 = vmul.f32 %v8914_v55, %v8806_v49  ;;  %6816 = vmatprep.subr.bf16.mxu1 %v7672_v33 }
 0x310   :  { %v7831_v34 = vpop.eup %7830  ;;  %v868_v39 = vmul.f32 %v7829_v47, %v8984_v13  ;;  %898 = vst [vmem:[#allocation2 + $0xf8] sm:$0xff] %v866_v58  ;;  %7850 = vpow2.f32 %v5570_v26  ;;  %v9106_v26 = vadd.f32 %v8919_v5, %v589_v27  ;;  %v593_v45 = vmul.f32 %v8914_v55, %v8818_v3 }
 0x311   :  { %v7833_v11 = vpop.eup %7832  ;;  %v869_v6 = vmul.f32 %v7831_v34, %v8988_v48  ;;  %899 = vst [vmem:[#allocation2 + $0x100] sm:$0xff] %v867_v60  ;;  %7852 = vpow2.f32 %v5571_v42  ;;  %v592_v42 = vmul.f32 %v8914_v55, %v8812_v62  ;;  %v594_v49 = vmul.f32 %v8914_v55, %v8824_v7  ;;  %v7674_v7 = vld [vmem:[#allocation11 + $0xb0] sm:$0xff]  }
 0x312   :  { %v7835_v18 = vpop.eup %7834  ;;  %900 = vst [vmem:[#allocation2 + $0x108] sm:$0xff] %v868_v39  ;;  %v743_v41 = vadd.f32 1.0, %v7833_v11  ;;  %7854 = vpow2.f32 %v5572_v44  ;;  %v9115_v44 = vadd.f32 %v8919_v5, %v590_v61  ;;  %v9118_v62 = vadd.f32 %v8919_v5, %v591_v28  ;;  %6817 = vmatpush3.bf16.msra.mxu1 %v7672_v33  ;;  %v199_v28 = vld [vmem:[#allocation6 + $0x18] sm:$0xff] }
 0x313   :  { %v7837_v21 = vpop.eup %7836  ;;  %901 = vst [vmem:[#allocation2 + $0x110] sm:$0xff] %v869_v6  ;;  %v9096_v53 = vmul.f32 %v7835_v18, %v8993_v51  ;;  %7856 = vpow2.f32 %v5573_v4  ;;  %v5575_v4 = vmul.f32 -1.442695, %v9106_v26  ;;  %v9122_v34 = vadd.f32 %v8919_v5, %v592_v42  ;;  %v7675_v6 = vld [vmem:[#allocation11 + $0xb8] sm:$0xff]   ;;  %6818 = vmatprep.subr.bf16.mxu1 %v7674_v7 }
 0x314   :  { %v7839_v13 = vpop.eup %7838  ;;  %7858 = vrcp.f32 %v743_v41  ;;  %v744_v15 = vadd.f32 1.0, %v7837_v21  ;;  %v9125_v11 = vadd.f32 %v8919_v5, %v593_v45  ;;  %v5576_v41 = vmul.f32 -1.442695, %v9115_v44 }
 0x315   :  { %v7841_v57 = vpop.eup %7840  ;;  %870 = vst [vmem:[#allocation2 + $0x18] sm:$0xff] %v9096_v53  ;;  %v745_v48 = vadd.f32 1.0, %v7839_v13  ;;  %7860 = vpow2.f32 %v5574_v46  ;;  %v9130_v21 = vadd.f32 %v8919_v5, %v594_v49 }
 0x316   :  { %v7843_v12 = vpop.eup %7842  ;;  %7862 = vrcp.f32 %v744_v15  ;;  %v746_v37 = vadd.f32 1.0, %v7841_v57  ;;  %v5577_v57 = vmul.f32 -1.442695, %v9118_v62  ;;  %6819 = vmatpush3.bf16.msra.mxu1 %v7674_v7 }
 0x317   :  { %v7845_v22 = vpop.eup %7844  ;;  %7864 = vrcp.f32 %v745_v48  ;;  %v747_v51 = vadd.f32 1.0, %v7843_v12  ;;  %6820 = vmatprep.subr.bf16.mxu1 %v7675_v6 }
 0x318   :  { %v7847_v9 = vpop.eup %7846  ;;  %7866 = vrcp.f32 %v746_v37  ;;  %v748_v36 = vadd.f32 1.0, %v7845_v22  ;;  %v5579_v37 = vmul.f32 -1.442695, %v9125_v11 }
 0x319   :  { %v7849_v43 = vpop.eup %7848  ;;  %7868 = vrcp.f32 %v747_v51  ;;  %v749_v38 = vadd.f32 1.0, %v7847_v9  ;;  %v198_v51 = vld [vmem:[#allocation6 + $0x10] sm:$0xff] }
 0x31a   :  { %v7851_v29 = vpop.eup %7850  ;;  %7870 = vrcp.f32 %v748_v36  ;;  %v750_v52 = vadd.f32 1.0, %v7849_v43  ;;  %6821 = vmatpush3.bf16.msra.mxu1 %v7675_v6 }
 0x31b   :  { %v7853_v32 = vpop.eup %7852  ;;  %7872 = vrcp.f32 %v749_v38  ;;  %v751_v58 = vadd.f32 1.0, %v7851_v29 }
 0x31c   :  { %v7855_v20 = vpop.eup %7854  ;;  %7874 = vrcp.f32 %v750_v52  ;;  %v752_v47 = vadd.f32 1.0, %v7853_v32  ;;  %v940_v61 = vld [vmem:[#allocation2 + $0x17] sm:$0xff] }
 0x31d   :  { %v7857_v60 = vpop.eup %7856  ;;  %7876 = vrcp.f32 %v751_v58  ;;  %v753_v3 = vadd.f32 1.0, %v7855_v20 }
 0x31e   :  { %v7859_v55 = vpop.eup %7858  ;;  %7878 = vrcp.f32 %v752_v47  ;;  %v754_v39 = vadd.f32 1.0, %v7857_v60  ;;  %v200_v47 = vld [vmem:[#allocation6 + $0x20] sm:$0xff]  ;;  %v7661_v60 = vld [vmem:[#allocation11 + $0x148] sm:$0xff]  }
 0x31f   :  { %v7861_v46 = vpop.eup %7860  ;;  %v839_v18 = vmul.f32 %v7859_v55, %v9006_v56  ;;  %7880 = vrcp.f32 %v753_v3  ;;  %v5578_v56 = vmul.f32 -1.442695, %v9122_v34 }
 0x320   :  { %v7863_v13 = vpop.eup %7862  ;;  %v755_v15 = vadd.f32 1.0, %v7861_v46  ;;  %7882 = vrcp.f32 %v754_v39 }
 0x321   :  { %v7865_v48 = vpop.eup %7864  ;;  %871 = vst [vmem:[#allocation2 + $0x20] sm:$0xff] %v839_v18  ;;  %v1086_v27 = vpack.c.bf16 %v839_v18, %v9096_v53  ;;  %v840_v17 = vmul.f32 %v7863_v13, %v9013_v1  ;;  %7884 = vpow2.f32 %v5575_v4  ;;  %v5580_v1 = vmul.f32 -1.442695, %v9130_v21 }
 0x322   :  { %v7867_v12 = vpop.eup %7866  ;;  %v841_v5 = vmul.f32 %v7865_v48, %v9018_v10  ;;  %7886 = vrcp.f32 %v755_v15  ;;  %v7662_v15 = vld [vmem:[#allocation11 + $0x150] sm:$0xff]  }
 0x323   :  { %v7869_v33 = vpop.eup %7868  ;;  %1409 = vmatprep.mubr.bf16.mxu0 %v1086_v27  ;;  %1883 = vmatprep.mubr.bf16.mxu1 %v1086_v27  ;;  %872 = vst [vmem:[#allocation2 + $0x28] sm:$0xff] %v840_v17  ;;  %v9139_v22 = vmul.f32 %v7867_v12, %v9022_v54  ;;  %7888 = vpow2.f32 %v5576_v41  ;;  %v202_v12 = vld [vmem:[#allocation6 + $0x30] sm:$0xff] }
 0x324   :  { %v7871_v53 = vpop.eup %7870  ;;  %873 = vst [vmem:[#allocation2 + $0x30] sm:$0xff] %v841_v5  ;;  %v9143_v9 = vmul.f32 %v7869_v33, %v9025_v24  ;;  %7890 = vpow2.f32 %v5577_v57  ;;  %v976_v24 = vmul.f32 %v940_v61, %v198_v51  ;;  %v9173_v4 = vpack.c.bf16 %v841_v5, %v840_v17  ;;  %v203_v5 = vld [vmem:[#allocation6 + $0x38] sm:$0xff] }
 0x325   :  { %v7873_v10 = vpop.eup %7872  ;;  %874 = vst [vmem:[#allocation2 + $0x38] sm:$0xff] %v9139_v22  ;;  %v9147_v36 = vmul.f32 %v7871_v53, %v9031_v59  ;;  %7892 = vpow2.f32 %v5578_v56  ;;  %v7663_v53 = vld [vmem:[#allocation11 + $0x158] sm:$0xff]  }
 0x326   :  { %v7875_v54 = vpop.eup %7874  ;;  %875 = vst [vmem:[#allocation2 + $0x40] sm:$0xff] %v9143_v9  ;;  %v9151_v43 = vmul.f32 %v7873_v10, %v9040_v2  ;;  %7894 = vpow2.f32 %v5579_v37  ;;  %v9188_v37 = vpack.c.bf16 %v9143_v9, %v9139_v22 }
 0x327   :  { %v7877_v38 = vpop.eup %7876  ;;  %876 = vst [vmem:[#allocation2 + $0x48] sm:$0xff] %v9147_v36  ;;  %v9155_v42 = vmul.f32 %v7875_v54, %v9047_v25  ;;  %7896 = vpow2.f32 %v5580_v1  ;;  %v7664_v54 = vld [vmem:[#allocation11 + $0x160] sm:$0xff]  }
 0x328   :  { %v7879_v29 = vpop.eup %7878  ;;  %v941_v59 = vld [vmem:[#allocation2 + $0x1f] sm:$0xff]  ;;  %877 = vst [vmem:[#allocation2 + $0x50] sm:$0xff] %v9151_v43  ;;  %v9159_v45 = vmul.f32 %v7877_v38, %v9053_v30 }
 0x329   :  { %v7881_v52 = vpop.eup %7880  ;;  %v977_v32 = vmul.f32 %v941_v59, %v199_v28  ;;  %878 = vst [vmem:[#allocation2 + $0x58] sm:$0xff] %v9155_v42  ;;  %v9163_v2 = vmul.f32 %v7879_v29, %v9061_v35  ;;  %v201_v35 = vld [vmem:[#allocation6 + $0x28] sm:$0xff] }
 0x32a   :  { %v7883_v49 = vpop.eup %7882  ;;  %879 = vst [vmem:[#allocation2 + $0x60] sm:$0xff] %v9159_v45  ;;  %v9167_v25 = vmul.f32 %v7881_v52, %v9071_v63  ;;  %v942_v7 = vld [vmem:[#allocation2 + $0x27] sm:$0xff]  ;;  %v205_v29 = vld [vmem:[#allocation6 + $0x48] sm:$0xff] }
 0x32b   :  { %v7885_v58 = vpop.eup %7884  ;;  %v1085_v20 = vpack.c.bf16 %v977_v32, %v976_v24  ;;  %880 = vst [vmem:[#allocation2 + $0x68] sm:$0xff] %v9163_v2  ;;  %v9171_v30 = vmul.f32 %v7883_v49, %v9075_v40  ;;  %v943_v55 = vld [vmem:[#allocation2 + $0x2f] sm:$0xff]  ;;  %v978_v41 = vmul.f32 %v942_v7, %v200_v47  ;;  %v9205_v32 = vpack.c.bf16 %v9151_v43, %v9147_v36  ;;  %v206_v7 = vld [vmem:[#allocation6 + $0x50] sm:$0xff] }
 0x32c   :  { %v7887_v3 = vpop.eup %7886  ;;  %881 = vst [vmem:[#allocation2 + $0x70] sm:$0xff] %v9167_v25  ;;  %v756_v39 = vadd.f32 1.0, %v7885_v58  ;;  %v979_v13 = vmul.f32 %v943_v55, %v201_v35  ;;  %v944_v33 = vld [vmem:[#allocation2 + $0x37] sm:$0xff]  ;;  %v207_v55 = vld [vmem:[#allocation6 + $0x58] sm:$0xff] }
 0x32d   :  { %v7889_v63 = vpop.eup %7888  ;;  %1410 = vmatmul.mubr.bf16.vlgmr.msra.gmra.mrb[4].mxu0 %v1085_v20  ;;  %1884 = vmatmul.mubr.bf16.gmra.mrb[8].mxu1 %v1085_v20  ;;  %v9177_v6 = vmul.f32 %v7887_v3, %v9084_v31  ;;  %882 = vst [vmem:[#allocation2 + $0x78] sm:$0xff] %v9171_v30  ;;  %v945_v1 = vld [vmem:[#allocation2 + $0x3f] sm:$0xff]  ;;  %v980_v51 = vmul.f32 %v944_v33, %v202_v12  ;;  %v204_v24 = vld [vmem:[#allocation6 + $0x40] sm:$0xff] }
 0x32e   :  { %v7891_v46 = vpop.eup %7890  ;;  %6759 = vmatpush3.bf16.msra.mxu0 %v8907_v16  ;;  %1417 = vmatprep.mubr.bf16.mxu0 %v9173_v4  ;;  %v757_v40 = vadd.f32 1.0, %v7889_v63  ;;  %7898 = vrcp.f32 %v756_v39  ;;  %v9184_v56 = vpack.c.bf16 %v979_v13, %v978_v41  ;;  %v981_v61 = vmul.f32 %v945_v1, %v203_v5  ;;  %v946_v49 = vld [vmem:[#allocation2 + $0x47] sm:$0xff]  ;;  %v7666_v20 = vld [vmem:[#allocation11 + $0x168] sm:$0xff]   ;;  %v208_v41 = vld [vmem:[#allocation6 + $0x60] sm:$0xff] }
 0x32f   :  { %v7893_v18 = vpop.eup %7892  ;;  %1891 = vmatprep.mubr.bf16.mxu1 %v9173_v4  ;;  %6760 = vmatprep.subr.bf16.mxu0 %v7661_v60  ;;  %883 = vst [vmem:[#allocation2 + $0x80] sm:$0xff] %v9177_v6  ;;  %v758_v31 = vadd.f32 1.0, %v7891_v46  ;;  %v982_v36 = vmul.f32 %v946_v49, %v204_v24  ;;  %v9238_v46 = vld [vmem:[#allocation11 + $0x200] sm:$0xff]   ;;  %v9245_v13 = vpack.c.bf16 %v9167_v25, %v9163_v2  ;;  %v211_v25 = vld [vmem:[#allocation6 + $0x78] sm:$0xff]  ;;  %v214_v24 = vld [vmem:[#allocation6 + $0x90] sm:$0xff] }
 0x330   :  { %v7895_v57 = vpop.eup %7894  ;;  %7900 = vrcp.f32 %v757_v40  ;;  %v759_v48 = vadd.f32 1.0, %v7893_v18  ;;  %v9197_v38 = vpack.c.bf16 %v981_v61, %v980_v51  ;;  %v948_v39 = vld [vmem:[#allocation2 + $0x57] sm:$0xff]  ;;  %6854 = vmatprep.subr.bf16.mxu1 %v9238_v46  ;;  %v9255_v2 = vpack.c.bf16 %v9177_v6, %v9171_v30 }
 0x331   :  { %v7897_v27 = vpop.eup %7896  ;;  %7902 = vrcp.f32 %v758_v31  ;;  %v760_v16 = vadd.f32 1.0, %v7895_v57  ;;  %v949_v63 = vld [vmem:[#allocation2 + $0x5f] sm:$0xff]  ;;  %v984_v40 = vmul.f32 %v948_v39, %v206_v7  ;;  %v212_v51 = vld [vmem:[#allocation6 + $0x80] sm:$0xff]  ;;  %v219_v39 = vld [vmem:[#allocation6 + $0xb8] sm:$0xff] }
 0x332   :  { %6761 = vmatpush3.bf16.msra.mxu0 %v7661_v60  ;;  %7904 = vrcp.f32 %v759_v48  ;;  %v761_v17 = vadd.f32 1.0, %v7897_v27  ;;  %v985_v18 = vmul.f32 %v949_v63, %v207_v55  ;;  %v950_v31 = vld [vmem:[#allocation2 + $0x67] sm:$0xff]  ;;  %v213_v6 = vld [vmem:[#allocation6 + $0x88] sm:$0xff] }
 0x333   :  { %6762 = vmatprep.subr.bf16.mxu0 %v7662_v15  ;;  %7906 = vrcp.f32 %v760_v16  ;;  %v951_v57 = vld [vmem:[#allocation2 + $0x6f] sm:$0xff]  ;;  %v986_v48 = vmul.f32 %v950_v31, %v208_v41  ;;  %v218_v55 = vld [vmem:[#allocation6 + $0xb0] sm:$0xff]  ;;  %v221_v31 = vld [vmem:[#allocation6 + $0xc8] sm:$0xff] }
 0x334   :  { %7908 = vrcp.f32 %v761_v17  ;;  %v210_v17 = vld [vmem:[#allocation6 + $0x70] sm:$0xff]  ;;  %v952_v12 = vld [vmem:[#allocation2 + $0x77] sm:$0xff] }
 0x335   :  { %1418 = vmatmul.mubr.bf16.gmra.mrb[8].mxu0 %v9184_v56  ;;  %1892 = vmatmul.mubr.bf16.gmra.mrb[12].mxu1 %v9184_v56  ;;  %v988_v33 = vmul.f32 %v952_v12, %v210_v17 }
 0x336   :  { %1425 = vmatprep.mubr.bf16.mxu0 %v9188_v37  ;;  %1899 = vmatprep.mubr.bf16.mxu1 %v9188_v37  ;;  %v953_v5 = vld [vmem:[#allocation2 + $0x7f] sm:$0xff] }
 0x337   :  { %6763 = vmatpush3.bf16.msra.mxu0 %v7662_v15  ;;  %v209_v15 = vld [vmem:[#allocation6 + $0x68] sm:$0xff]  ;;  %v989_v1 = vmul.f32 %v953_v5, %v211_v25 }
 0x338   :  { %v7899_v10 = vpop.eup %7898  ;;  %6764 = vmatprep.subr.bf16.mxu0 %v7663_v53  ;;  %v987_v27 = vmul.f32 %v951_v57, %v209_v15  ;;  %v220_v15 = vld [vmem:[#allocation6 + $0xc0] sm:$0xff]  ;;  %v962_v57 = vld [vmem:[#allocation2 + $0xc7] sm:$0xff] }
 0x339   :  { %v9195_v22 = vmul.f32 %v7899_v10, %v9106_v26  ;;  %v947_v26 = vld [vmem:[#allocation2 + $0x4f] sm:$0xff]  ;;  %v998_v25 = vmul.f32 %v962_v57, %v220_v15 }
 0x33a   :  { %v7901_v9 = vpop.eup %7900  ;;  %v983_v43 = vmul.f32 %v947_v26, %v205_v29  ;;  %v9251_v16 = vpack.c.bf16 %v987_v27, %v986_v48  ;;  %v215_v29 = vld [vmem:[#allocation6 + $0x98] sm:$0xff]  ;;  %v1011_v15 = vld [vmem:[#allocation2 + $0x11] sm:$0xff] }
 0x33b   :  { %v7903_v28 = vpop.eup %7902  ;;  %6765 = vmatpush3.bf16.msra.mxu0 %v7663_v53  ;;  %v9200_v59 = vmul.f32 %v7901_v9, %v9115_v44  ;;  %884 = vst [vmem:[#allocation2 + $0x88] sm:$0xff] %v9195_v22  ;;  %v9261_v53 = vpack.c.bf16 %v989_v1, %v988_v33  ;;  %v963_v48 = vld [vmem:[#allocation2 + $0xcf] sm:$0xff]  ;;  %v222_v1 = vld [vmem:[#allocation6 + $0xd0] sm:$0xff] }
 0x33c   :  { %v7905_v52 = vpop.eup %7904  ;;  %v9208_v58 = vmul.f32 %v7903_v28, %v9118_v62  ;;  %6766 = vmatprep.subr.bf16.mxu0 %v7664_v54  ;;  %v9228_v35 = vpack.c.bf16 %v983_v43, %v982_v36  ;;  %v999_v12 = vmul.f32 %v963_v48, %v221_v31 }
 0x33d   :  { %v7907_v47 = vpop.eup %7906  ;;  %1426 = vmatmul.mubr.bf16.gmra.mrb[12].mxu0 %v9197_v38  ;;  %1900 = vmatmul.mubr.bf16.gmra.mrb[16].mxu1 %v9197_v38  ;;  %885 = vst [vmem:[#allocation2 + $0x90] sm:$0xff] %v9200_v59  ;;  %v9214_v44 = vmul.f32 %v7905_v52, %v9122_v34  ;;  %v7668_v34 = vld [vmem:[#allocation11 + $0x170] sm:$0xff]   ;;  %v9265_v30 = vpack.c.bf16 %v9200_v59, %v9195_v22 }
 0x33e   :  { %v7909_v60 = vpop.eup %7908  ;;  %1433 = vmatprep.mubr.bf16.mxu0 %v9205_v32  ;;  %1907 = vmatprep.mubr.bf16.mxu1 %v9205_v32  ;;  %886 = vst [vmem:[#allocation2 + $0x98] sm:$0xff] %v9208_v58  ;;  %v9220_v62 = vmul.f32 %v7907_v47, %v9125_v11  ;;  %v9232_v11 = vpack.c.bf16 %v9159_v45, %v9155_v42  ;;  %v7676_v42 = vld [vmem:[#allocation11 + $0x1c0] sm:$0xff]  }
 0x33f   :  { %887 = vst [vmem:[#allocation2 + $0xa0] sm:$0xff] %v9214_v44  ;;  %6767 = vmatpush3.bf16.msra.mxu0 %v7664_v54  ;;  %v9224_v3 = vmul.f32 %v7909_v60, %v9130_v21  ;;  %v7673_v21 = vld [vmem:[#allocation11 + $0x178] sm:$0xff]   ;;  %v9241_v45 = vpack.c.bf16 %v985_v18, %v984_v40  ;;  %v9275_v22 = vpack.c.bf16 %v9214_v44, %v9208_v58  ;;  %v216_v47 = vld [vmem:[#allocation6 + $0xa0] sm:$0xff]  ;;  %v217_v44 = vld [vmem:[#allocation6 + $0xa8] sm:$0xff] }
 0x340   :  { %888 = vst [vmem:[#allocation2 + $0xa8] sm:$0xff] %v9220_v62  ;;  %6768 = vmatprep.subr.bf16.mxu0 %v7666_v20  ;;  %v9307_v33 = vpack.c.bf16 %v999_v12, %v998_v25  ;;  %v935_v25 = vld [vmem:[#allocation2 + $0x110] sm:$0xff] }
 0x341   :  { %889 = vst [vmem:[#allocation2 + $0xb0] sm:$0xff] %v9224_v3  ;;  %v9285_v58 = vpack.c.bf16 %v9224_v3, %v9220_v62  ;;  %v961_v62 = vld [vmem:[#allocation2 + $0xbf] sm:$0xff]  ;;  %v5966_v3 = vpop.f32.mrb[4].mxu1  ;;  %v228_v12 = vld [vmem:[#allocation6 + $0x100] sm:$0xff] }
 0x342   :  { %v954_v61 = vld [vmem:[#allocation2 + $0x87] sm:$0xff]  ;;  %v997_v40 = vmul.f32 %v961_v62, %v219_v39  ;;  %v5967_v18 = vpop.f32.mrb[5].mxu1  ;;  %v968_v62 = vld [vmem:[#allocation2 + $0xf7] sm:$0xff] }
 0x343   :  { %6769 = vmatpush3.bf16.msra.mxu0 %v7666_v20  ;;  %v990_v54 = vmul.f32 %v954_v61, %v212_v51  ;;  %v5969_v27 = vpop.f32.mrb[6].mxu1  ;;  %v223_v51 = vld [vmem:[#allocation6 + $0xd8] sm:$0xff]  ;;  %v965_v61 = vld [vmem:[#allocation2 + $0xdf] sm:$0xff] }
 0x344   :  { %6770 = vmatprep.subr.bf16.mxu0 %v7668_v34  ;;  %v955_v10 = vld [vmem:[#allocation2 + $0x8f] sm:$0xff]  ;;  %v5970_v17 = vpop.f32.mrb[7].mxu1 }
 0x345   :  { %1434 = vmatmul.mubr.bf16.gmra.mrb[16].mxu0 %v9228_v35  ;;  %1908 = vmatmul.mubr.bf16.gmra.mrb[20].mxu1 %v9228_v35  ;;  %v991_v9 = vmul.f32 %v955_v10, %v213_v6  ;;  %v956_v59 = vld [vmem:[#allocation2 + $0x97] sm:$0xff]  ;;  %v9305_v5 = vadd.f32 %v5970_v17, %v5969_v27  ;;  %v227_v39 = vld [vmem:[#allocation6 + $0xf8] sm:$0xff] }
 0x346   :  { %1441 = vmatprep.mubr.bf16.mxu0 %v9232_v11  ;;  %1915 = vmatprep.mubr.bf16.mxu1 %v9232_v11  ;;  %v957_v52 = vld [vmem:[#allocation2 + $0x9f] sm:$0xff]  ;;  %v992_v49 = vmul.f32 %v956_v59, %v214_v24  ;;  %v964_v6 = vld [vmem:[#allocation2 + $0xd7] sm:$0xff]  ;;  %v934_v17 = vld [vmem:[#allocation2 + $0x108] sm:$0xff] }
 0x347   :  { %6771 = vmatpush3.bf16.msra.mxu0 %v7668_v34  ;;  %v9271_v28 = vpack.c.bf16 %v991_v9, %v990_v54  ;;  %v993_v26 = vmul.f32 %v957_v52, %v215_v29  ;;  %v958_v60 = vld [vmem:[#allocation2 + $0xa7] sm:$0xff]  ;;  %v1000_v10 = vmul.f32 %v964_v6, %v222_v1  ;;  %v1001_v54 = vmul.f32 %v965_v61, %v223_v51  ;;  %v931_v24 = vld [vmem:[#allocation2 + $0xf0] sm:$0xff]  ;;  %v229_v1 = vld [vmem:[#allocation6 + $0x108] sm:$0xff] }
 0x348   :  { %6772 = vmatprep.subr.bf16.mxu0 %v7673_v21  ;;  %v959_v36 = vld [vmem:[#allocation2 + $0xaf] sm:$0xff]  ;;  %v994_v43 = vmul.f32 %v958_v60, %v216_v47  ;;  %v960_v63 = vld [vmem:[#allocation2 + $0xb7] sm:$0xff]  ;;  %v234_v51 = vld [vmem:[#allocation8 + $0x10] sm:$0xff] }
 0x349   :  { %v9281_v20 = vpack.c.bf16 %v993_v26, %v992_v49  ;;  %v995_v34 = vmul.f32 %v959_v36, %v217_v44  ;;  %v930_v9 = vld [vmem:[#allocation2 + $0xe8] sm:$0xff]  ;;  %v9313_v29 = vpack.c.bf16 %v1001_v54, %v1000_v10  ;;  %v224_v59 = vld [vmem:[#allocation6 + $0xe0] sm:$0xff]  ;;  %v225_v49 = vld [vmem:[#allocation6 + $0xe8] sm:$0xff] }
 0x34a   :  { %v9315_v52 = vpack.c.bf16 %v931_v24, %v930_v9  ;;  %v966_v26 = vld [vmem:[#allocation2 + $0xe7] sm:$0xff]  ;;  %v967_v47 = vld [vmem:[#allocation2 + $0xef] sm:$0xff]  ;;  %v932_v36 = vld [vmem:[#allocation2 + $0xf8] sm:$0xff]  ;;  %v9331_v9 = vpack.c.bf16 %v935_v25, %v934_v17 }
 0x34b   :  { %6773 = vmatpush3.bf16.msra.mxu0 %v7673_v21  ;;  %v9291_v7 = vpack.c.bf16 %v995_v34, %v994_v43  ;;  %v996_v21 = vmul.f32 %v960_v63, %v218_v55  ;;  %v1002_v44 = vmul.f32 %v966_v26, %v224_v59  ;;  %v1003_v60 = vmul.f32 %v967_v47, %v225_v49  ;;  %v933_v43 = vld [vmem:[#allocation2 + $0x100] sm:$0xff]  ;;  %v235_v10 = vld [vmem:[#allocation8 + $0x18] sm:$0xff]  ;;  %v236_v54 = vld [vmem:[#allocation8 + $0x20] sm:$0xff] }
 0x34c   :  { %6086 = vmatprep.subr.bf16.mxu0 %v7676_v42  ;;  %v9297_v42 = vadd.f32 %v5967_v18, %v5966_v3  ;;  %v226_v55 = vld [vmem:[#allocation6 + $0xf0] sm:$0xff]  ;;  %v9323_v63 = vpack.c.bf16 %v933_v43, %v932_v36  ;;  %v1010_v18 = vld [vmem:[#allocation2 + $0x9] sm:$0xff]  ;;  %v237_v47 = vld [vmem:[#allocation8 + $0x28] sm:$0xff] }
 0x34d   :  { %1442 = vmatmul.mubr.bf16.gmra.mrb[20].mxu0 %v9241_v45  ;;  %1916 = vmatmul.mubr.bf16.gmra.mrb[24].mxu1 %v9241_v45  ;;  %v9299_v41 = vpack.c.bf16 %v997_v40, %v996_v21  ;;  %v9321_v34 = vpack.c.bf16 %v1003_v60, %v1002_v44  ;;  %v969_v3 = vld [vmem:[#allocation2 + $0xff] sm:$0xff]  ;;  %v232_v21 = vld [vmem:[#allocation8] sm:$0xff]  ;;  %v1004_v31 = vmul.f32 %v968_v62, %v226_v55  ;;  %v970_v61 = vld [vmem:[#allocation2 + $0x107] sm:$0xff] }
 0x34e   :  { %1449 = vmatprep.mubr.bf16.mxu0 %v9245_v13  ;;  %1923 = vmatprep.mubr.bf16.mxu1 %v9245_v13  ;;  %v233_v40 = vld [vmem:[#allocation8 + $0x8] sm:$0xff]  ;;  %v1005_v57 = vmul.f32 %v969_v3, %v227_v39  ;;  %v1046_v48 = vmul.f32 %v1010_v18, %v232_v21  ;;  %v971_v59 = vld [vmem:[#allocation2 + $0x10f] sm:$0xff]  ;;  %v1013_v26 = vld [vmem:[#allocation2 + $0x21] sm:$0xff]  ;;  %v1006_v36 = vmul.f32 %v970_v61, %v228_v12 }
 0x34f   :  { %v1047_v27 = vmul.f32 %v1011_v15, %v233_v40  ;;  %v1012_v49 = vld [vmem:[#allocation2 + $0x19] sm:$0xff]  ;;  %v1014_v44 = vld [vmem:[#allocation2 + $0x29] sm:$0xff]  ;;  %v1015_v60 = vld [vmem:[#allocation2 + $0x31] sm:$0xff]  ;;  %v1007_v43 = vmul.f32 %v971_v59, %v229_v1  ;;  %v1049_v39 = vmul.f32 %v1013_v26, %v235_v10 }
 0x350   :  { %v9329_v6 = vpack.c.bf16 %v1005_v57, %v1004_v31  ;;  %v1048_v55 = vmul.f32 %v1012_v49, %v234_v51  ;;  %v1050_v62 = vmul.f32 %v1014_v44, %v236_v54  ;;  %v1051_v3 = vmul.f32 %v1015_v60, %v237_v47  ;;  %v238_v18 = vld [vmem:[#allocation8 + $0x30] sm:$0xff]  ;;  %v239_v15 = vld [vmem:[#allocation8 + $0x38] sm:$0xff]  ;;  %v240_v17 = vld [vmem:[#allocation8 + $0x40] sm:$0xff] }
 0x351   :  { %v1084_v24 = vpack.c.bf16 %v1047_v27, %v1046_v48  ;;  %v9336_v21 = vpack.c.bf16 %v1007_v43, %v1006_v36  ;;  %v1016_v57 = vld [vmem:[#allocation2 + $0x39] sm:$0xff]  ;;  %v1017_v48 = vld [vmem:[#allocation2 + $0x41] sm:$0xff]  ;;  %v1018_v12 = vld [vmem:[#allocation2 + $0x49] sm:$0xff] }
 0x352   :  { %v1087_v40 = vpack.c.bf16 %v1049_v39, %v1048_v55  ;;  %v9338_v31 = vpack.c.bf16 %v1051_v3, %v1050_v62  ;;  %v7685_v27 = vld [vmem:[#allocation11 + $0x208] sm:$0xff]   ;;  %v1052_v51 = vmul.f32 %v1016_v57, %v238_v18  ;;  %v1053_v61 = vmul.f32 %v1017_v48, %v239_v15  ;;  %v7688_v10 = vld [vmem:[#allocation11 + $0x210] sm:$0xff]   ;;  %v7677_v59 = vld [vmem:[#allocation11 + $0x180] sm:$0xff]  }
 0x353   :  { %v241_v25 = vld [vmem:[#allocation8 + $0x48] sm:$0xff]  ;;  %v1054_v54 = vmul.f32 %v1018_v12, %v240_v17  ;;  %v242_v49 = vld [vmem:[#allocation8 + $0x50] sm:$0xff]  ;;  %v243_v44 = vld [vmem:[#allocation8 + $0x58] sm:$0xff] }
 0x354   :  { %v1019_v1 = vld [vmem:[#allocation2 + $0x51] sm:$0xff]  ;;  %v9343_v26 = vpack.c.bf16 %v1053_v61, %v1052_v51  ;;  %v1020_v36 = vld [vmem:[#allocation2 + $0x59] sm:$0xff]  ;;  %v1021_v43 = vld [vmem:[#allocation2 + $0x61] sm:$0xff] }
 0x355   :  { %1450 = vmatmul.mubr.bf16.gmra.mrb[24].mxu0 %v9251_v16  ;;  %1924 = vmatmul.mubr.bf16.gmra.mrb[28].mxu1 %v9251_v16  ;;  %v7678_v47 = vld [vmem:[#allocation11 + $0x1c8] sm:$0xff]   ;;  %v244_v60 = vld [vmem:[#allocation8 + $0x60] sm:$0xff]  ;;  %v7689_v3 = vld [vmem:[#allocation11 + $0x218] sm:$0xff]   ;;  %v1056_v18 = vmul.f32 %v1020_v36, %v242_v49  ;;  %v1057_v15 = vmul.f32 %v1021_v43, %v243_v44 }
 0x356   :  { %1457 = vmatprep.mubr.bf16.mxu0 %v9255_v2  ;;  %1931 = vmatprep.mubr.bf16.mxu1 %v9255_v2  ;;  %v245_v55 = vld [vmem:[#allocation8 + $0x68] sm:$0xff]  ;;  %v1022_v39 = vld [vmem:[#allocation2 + $0x69] sm:$0xff]  ;;  %v7680_v57 = vld [vmem:[#allocation11 + $0x1d0] sm:$0xff]  }
 0x357   :  { %v1023_v62 = vld [vmem:[#allocation2 + $0x71] sm:$0xff]  ;;  %v1058_v48 = vmul.f32 %v1022_v39, %v244_v60  ;;  %v246_v17 = vld [vmem:[#allocation8 + $0x70] sm:$0xff]  ;;  %v9351_v12 = vpack.c.bf16 %v1057_v15, %v1056_v18  ;;  %v251_v18 = vld [vmem:[#allocation8 + $0x98] sm:$0xff] }
 0x358   :  { %v248_v51 = vld [vmem:[#allocation8 + $0x80] sm:$0xff]  ;;  %v249_v61 = vld [vmem:[#allocation8 + $0x88] sm:$0xff]  ;;  %v1025_v49 = vld [vmem:[#allocation2 + $0x81] sm:$0xff] }
 0x359   :  { %v1027_v44 = vld [vmem:[#allocation2 + $0x91] sm:$0xff] }
 0x35a   :  { %v7693_v60 = vld [vmem:[#allocation11 + $0x228] sm:$0xff]  }
 0x35d   :  { %1458 = vmatmul.mubr.bf16.gmra.mrb[28].mxu0 %v9261_v53  ;;  %1932 = vmatmul.mubr.bf16.gmra.mrb[32].mxu1 %v9261_v53 }
 0x35e   :  { %1465 = vmatprep.mubr.bf16.mxu0 %v9265_v30  ;;  %1939 = vmatprep.mubr.bf16.mxu1 %v9265_v30 }
 0x365   :  { %1466 = vmatmul.mubr.bf16.gmra.mrb[32].mxu0 %v9271_v28  ;;  %1940 = vmatmul.mubr.bf16.gmra.mrb[36].mxu1 %v9271_v28 }
 0x366   :  { %1473 = vmatprep.mubr.bf16.mxu0 %v9275_v22  ;;  %1947 = vmatprep.mubr.bf16.mxu1 %v9275_v22 }
 0x36d   :  { %1474 = vmatmul.mubr.bf16.gmra.mrb[36].mxu0 %v9281_v20  ;;  %1948 = vmatmul.mubr.bf16.gmra.mrb[40].mxu1 %v9281_v20 }
 0x36e   :  { %1481 = vmatprep.mubr.bf16.mxu0 %v9285_v58  ;;  %1955 = vmatprep.mubr.bf16.mxu1 %v9285_v58 }
 0x375   :  { %1482 = vmatmul.mubr.bf16.gmra.mrb[40].mxu0 %v9291_v7  ;;  %1956 = vmatmul.mubr.bf16.gmra.mrb[44].mxu1 %v9291_v7 }
 0x376   :  { %1489 = vmatprep.mubr.bf16.mxu0 %v9066_v23  ;;  %1963 = vmatprep.mubr.bf16.mxu1 %v9066_v23 }
 0x37d   :  { %1490 = vmatmul.mubr.bf16.gmra.mrb[44].mxu0 %v9299_v41  ;;  %1964 = vmatmul.mubr.bf16.gmra.mrb[48].mxu1 %v9299_v41 }
 0x37e   :  { %1497 = vmatprep.mubr.bf16.mxu0 %v9077_v19  ;;  %1971 = vmatprep.mubr.bf16.mxu1 %v9077_v19 }
 0x385   :  { %1498 = vmatmul.mubr.bf16.gmra.mrb[48].mxu0 %v9307_v33  ;;  %1972 = vmatmul.mubr.bf16.gmra.mrb[52].mxu1 %v9307_v33 }
 0x386   :  { %1505 = vmatprep.mubr.bf16.mxu0 %v9086_v14  ;;  %1979 = vmatprep.mubr.bf16.mxu1 %v9086_v14 }
 0x38d   :  { %1506 = vmatmul.mubr.bf16.gmra.mrb[52].mxu0 %v9313_v29  ;;  %1980 = vmatmul.mubr.bf16.gmra.mrb[56].mxu1 %v9313_v29 }
 0x38e   :  { %1513 = vmatprep.mubr.bf16.mxu0 %v9315_v52  ;;  %1987 = vmatprep.mubr.bf16.mxu1 %v9315_v52 }
 0x395   :  { %1514 = vmatmul.mubr.bf16.gmra.mrb[56].mxu0 %v9321_v34  ;;  %1988 = vmatmul.mubr.bf16.gmra.mrb[60].mxu1 %v9321_v34 }
 0x396   :  { %1521 = vmatprep.mubr.bf16.mxu0 %v9323_v63  ;;  %1995 = vmatprep.mubr.bf16.mxu1 %v9323_v63 }
 0x39d   :  { %1522 = vmatmul.mubr.bf16.gmra.mrb[60].mxu0 %v9329_v6  ;;  %1996 = vmatmul.mubr.bf16.gmra.mrb[64].mxu1 %v9329_v6 }
 0x39e   :  { %1529 = vmatprep.mubr.bf16.mxu0 %v9331_v9  ;;  %6822 = vmatprep.mubr.bf16.mxu1 %v1084_v24  ;;  %v1055_v24 = vmul.f32 %v1019_v1, %v241_v25  ;;  %v247_v25 = vld [vmem:[#allocation8 + $0x78] sm:$0xff]  ;;  %v7681_v1 = vld [vmem:[#allocation11 + $0x190] sm:$0xff]  }
 0x39f   :  { %v1061_v43 = vmul.f32 %v1025_v49, %v247_v25  ;;  %v1028_v25 = vld [vmem:[#allocation2 + $0x99] sm:$0xff] }
 0x3a5   :  { %1530 = vmatmul.mubr.bf16.gmra.mrb[64].mxu0 %v9336_v21  ;;  %6823 = vmatmul.mubr.bf16.vlgmr.msra.gmra.mrb[68].mxu1 %v1087_v40 }
 0x3a6   :  { %6774 = vmatprep.mubr.bf16.mxu0 %v1087_v40  ;;  %6826 = vmatprep.mubr.bf16.mxu1 %v9338_v31  ;;  %v7679_v40 = vld [vmem:[#allocation11 + $0x188] sm:$0xff]  }
 0x3a7   :  { %6855 = vmatpush3.bf16.msra.mxu1 %v9238_v46  ;;  %v9347_v46 = vpack.c.bf16 %v1055_v24, %v1054_v54  ;;  %v7692_v54 = vld [vmem:[#allocation11 + $0x220] sm:$0xff]  }
 0x3a8   :  { %6856 = vmatprep.subr.bf16.mxu1 %v7685_v27 }
 0x3ab   :  { %6857 = vmatpush3.bf16.msra.mxu1 %v7685_v27  ;;  %v1059_v27 = vmul.f32 %v1023_v62, %v245_v55  ;;  %v7683_v55 = vld [vmem:[#allocation11 + $0x198] sm:$0xff]   ;;  %v1063_v62 = vmul.f32 %v1027_v44, %v249_v61 }
 0x3ac   :  { %6858 = vmatprep.subr.bf16.mxu1 %v7688_v10  ;;  %v1030_v61 = vld [vmem:[#allocation2 + $0xa9] sm:$0xff] }
 0x3ad   :  { %6775 = vmatmul.mubr.bf16.vlgmr.msra.gmra.mrb[68].mxu0 %v9338_v31  ;;  %6827 = vmatmul.mubr.bf16.gmra.mrb[72].mxu1 %v9343_v26  ;;  %v9353_v24 = vpack.c.bf16 %v1059_v27, %v1058_v48  ;;  %v253_v48 = vld [vmem:[#allocation8 + $0xa8] sm:$0xff]  ;;  %v7687_v27 = vld [vmem:[#allocation11 + $0x1a0] sm:$0xff]  }
 0x3ae   :  { %6087 = vmatpush3.bf16.msra.mxu0 %v7677_v59  ;;  %6778 = vmatprep.mubr.bf16.mxu0 %v9343_v26  ;;  %v1024_v59 = vld [vmem:[#allocation2 + $0x79] sm:$0xff] }
 0x3af   :  { %6830 = vmatprep.mubr.bf16.mxu1 %v9347_v46  ;;  %6088 = vmatprep.subr.bf16.mxu0 %v7678_v47  ;;  %v7682_v47 = vld [vmem:[#allocation11 + $0x1d8] sm:$0xff]   ;;  %v1060_v36 = vmul.f32 %v1024_v59, %v246_v17 }
 0x3b0   :  { %6859 = vmatpush3.bf16.msra.mxu1 %v7688_v10  ;;  %v1026_v10 = vld [vmem:[#allocation2 + $0x89] sm:$0xff] }
 0x3b1   :  { %6860 = vmatprep.subr.bf16.mxu1 %v7689_v3  ;;  %v1062_v39 = vmul.f32 %v1026_v10, %v248_v51  ;;  %v9359_v15 = vpack.c.bf16 %v1061_v43, %v1060_v36  ;;  %v7690_v51 = vld [vmem:[#allocation11 + $0x1e8] sm:$0xff]   ;;  %v7697_v59 = vld [vmem:[#allocation11 + $0x238] sm:$0xff]   ;;  %v254_v43 = vld [vmem:[#allocation8 + $0xb0] sm:$0xff] }
 0x3b2   :  { %6089 = vmatpush3.bf16.msra.mxu0 %v7679_v40  ;;  %v250_v40 = vld [vmem:[#allocation8 + $0x90] sm:$0xff]  ;;  %v7691_v10 = vld [vmem:[#allocation11 + $0x1a8] sm:$0xff]  }
 0x3b3   :  { %6090 = vmatprep.subr.bf16.mxu0 %v7680_v57  ;;  %v252_v57 = vld [vmem:[#allocation8 + $0xa0] sm:$0xff]  ;;  %v9361_v17 = vpack.c.bf16 %v1063_v62, %v1062_v39  ;;  %v1064_v49 = vmul.f32 %v1028_v25, %v250_v40  ;;  %v255_v39 = vld [vmem:[#allocation8 + $0xb8] sm:$0xff]  ;;  %v1032_v40 = vld [vmem:[#allocation2 + $0xb9] sm:$0xff] }
 0x3b4   :  { %6861 = vmatpush3.bf16.msra.mxu1 %v7689_v3  ;;  %v7686_v3 = vld [vmem:[#allocation11 + $0x1e0] sm:$0xff]   ;;  %v1066_v44 = vmul.f32 %v1030_v61, %v252_v57  ;;  %v1068_v25 = vmul.f32 %v1032_v40, %v254_v43  ;;  %v261_v43 = vld [vmem:[#allocation8 + $0xe8] sm:$0xff] }
 0x3b5   :  { %6779 = vmatmul.mubr.bf16.gmra.mrb[72].mxu0 %v9347_v46  ;;  %6831 = vmatmul.mubr.bf16.gmra.mrb[76].mxu1 %v9351_v12  ;;  %v256_v62 = vld [vmem:[#allocation8 + $0xc0] sm:$0xff] }
 0x3b6   :  { %6782 = vmatprep.mubr.bf16.mxu0 %v9351_v12  ;;  %6834 = vmatprep.mubr.bf16.mxu1 %v9353_v24  ;;  %v1034_v57 = vld [vmem:[#allocation2 + $0xc9] sm:$0xff] }
 0x3b7   :  { %6091 = vmatpush3.bf16.msra.mxu0 %v7681_v1  ;;  %6862 = vmatprep.subr.bf16.mxu1 %v7692_v54  ;;  %v1029_v1 = vld [vmem:[#allocation2 + $0xa1] sm:$0xff]  ;;  %v1070_v61 = vmul.f32 %v1034_v57, %v256_v62  ;;  %v1039_v62 = vld [vmem:[#allocation2 + $0xf1] sm:$0xff] }
 0x3b8   :  { %6092 = vmatprep.subr.bf16.mxu0 %v7682_v47  ;;  %6863 = vmatpush3.bf16.msra.mxu1 %v7692_v54  ;;  %v1031_v54 = vld [vmem:[#allocation2 + $0xb1] sm:$0xff]  ;;  %v1065_v47 = vmul.f32 %v1029_v1, %v251_v18  ;;  %v1033_v18 = vld [vmem:[#allocation2 + $0xc1] sm:$0xff] }
 0x3b9   :  { %6864 = vmatprep.subr.bf16.mxu1 %v7693_v60  ;;  %v1067_v36 = vmul.f32 %v1031_v54, %v253_v48  ;;  %v1035_v48 = vld [vmem:[#allocation2 + $0xd1] sm:$0xff]  ;;  %v1069_v1 = vmul.f32 %v1033_v18, %v255_v39  ;;  %v1038_v39 = vld [vmem:[#allocation2 + $0xe9] sm:$0xff]  ;;  %v262_v57 = vld [vmem:[#allocation8 + $0xf0] sm:$0xff] }
 0x3bb   :  { %6093 = vmatpush3.bf16.msra.mxu0 %v7683_v55  ;;  %v9367_v55 = vpack.c.bf16 %v1065_v47, %v1064_v49  ;;  %v9369_v8 = vpack.c.bf16 %v1067_v36, %v1066_v44  ;;  %v258_v49 = vld [vmem:[#allocation8 + $0xd0] sm:$0xff]  ;;  %v259_v47 = vld [vmem:[#allocation8 + $0xd8] sm:$0xff] }
 0x3bc   :  { %6094 = vmatprep.subr.bf16.mxu0 %v7686_v3  ;;  %6865 = vmatpush3.bf16.msra.mxu1 %v7693_v60  ;;  %v7694_v60 = vld [vmem:[#allocation11 + $0x1f0] sm:$0xff]  }
 0x3bd   :  { %6783 = vmatmul.mubr.bf16.gmra.mrb[76].mxu0 %v9353_v24  ;;  %6835 = vmatmul.mubr.bf16.gmra.mrb[80].mxu1 %v9359_v15  ;;  %v7695_v3 = vld [vmem:[#allocation11 + $0x1b0] sm:$0xff]  }
 0x3be   :  { %6786 = vmatprep.mubr.bf16.mxu0 %v9359_v15  ;;  %6838 = vmatprep.mubr.bf16.mxu1 %v9361_v17  ;;  %v1036_v44 = vld [vmem:[#allocation2 + $0xd9] sm:$0xff]  ;;  %v1037_v36 = vld [vmem:[#allocation2 + $0xe1] sm:$0xff] }
 0x3bf   :  { %6095 = vmatpush3.bf16.msra.mxu0 %v7687_v27  ;;  %6866 = vmatprep.subr.bf16.mxu1 %v7696_v0  ;;  %v7698_v27 = vld [vmem:[#allocation11 + $0x1f8] sm:$0xff]   ;;  %v1073_v40 = vmul.f32 %v1037_v36, %v259_v47  ;;  %v264_v47 = vld [vmem:[#allocation8 + $0x100] sm:$0xff] }
 0x3c0   :  { %6096 = vmatprep.subr.bf16.mxu0 %v7690_v51  ;;  %6867 = vmatpush3.bf16.msra.mxu1 %v7696_v0  ;;  %v257_v0 = vld [vmem:[#allocation8 + $0xc8] sm:$0xff]  ;;  %v7699_v51 = vld [vmem:[#allocation11 + $0x1b8] sm:$0xff]  }
 0x3c1   :  { %6868 = vmatprep.subr.bf16.mxu1 %v7697_v59  ;;  %v1071_v54 = vmul.f32 %v1035_v48, %v257_v0  ;;  %v1042_v36 = vld [vmem:[#allocation2 + $0x109] sm:$0xff] }
 0x3c3   :  { %6097 = vmatpush3.bf16.msra.mxu0 %v7691_v10  ;;  %v9377_v10 = vpack.c.bf16 %v1071_v54, %v1070_v61 }
 0x3c4   :  { %6098 = vmatprep.subr.bf16.mxu0 %v7694_v60  ;;  %6869 = vmatpush3.bf16.msra.mxu1 %v7697_v59  ;;  %v9375_v59 = vpack.c.bf16 %v1069_v1, %v1068_v25  ;;  %v260_v60 = vld [vmem:[#allocation8 + $0xe0] sm:$0xff]  ;;  %v263_v25 = vld [vmem:[#allocation8 + $0xf8] sm:$0xff]  ;;  %v1040_v1 = vld [vmem:[#allocation2 + $0xf9] sm:$0xff] }
 0x3c5   :  { %6787 = vmatmul.mubr.bf16.gmra.mrb[80].mxu0 %v9361_v17  ;;  %6839 = vmatmul.mubr.bf16.gmra.mrb[84].mxu1 %v9367_v55  ;;  %v1074_v18 = vmul.f32 %v1038_v39, %v260_v60  ;;  %v1076_v61 = vmul.f32 %v1040_v1, %v262_v57  ;;  %v1043_v60 = vld [vmem:[#allocation2 + $0x111] sm:$0xff] }
 0x3c6   :  { %6790 = vmatprep.mubr.bf16.mxu0 %v9367_v55  ;;  %6842 = vmatprep.mubr.bf16.mxu1 %v9369_v8 }
 0x3c7   :  { %6099 = vmatpush3.bf16.msra.mxu0 %v7695_v3  ;;  %v1072_v3 = vmul.f32 %v1036_v44, %v258_v49  ;;  %v265_v44 = vld [vmem:[#allocation8 + $0x108] sm:$0xff] }
 0x3c8   :  { %6100 = vmatprep.subr.bf16.mxu0 %v7698_v27  ;;  %v1075_v27 = vmul.f32 %v1039_v62, %v261_v43  ;;  %v1078_v43 = vmul.f32 %v1042_v36, %v264_v47  ;;  %v1079_v39 = vmul.f32 %v1043_v60, %v265_v44  ;;  %v267_v36 = vld [vmem:[#allocation8 + $0x118] sm:$0xff]  ;;  %v1044_v60 = vld [vmem:[#allocation2 + $0x119] sm:$0xff] }
 0x3c9   :  { %v9384_v0 = vpack.c.bf16 %v1073_v40, %v1072_v3 }
 0x3ca   :  { %v9386_v48 = vpack.c.bf16 %v1075_v27, %v1074_v18  ;;  %v9398_v62 = vpack.c.bf16 %v1079_v39, %v1078_v43  ;;  %v1045_v43 = vld [vmem:[#allocation2 + $0x121] sm:$0xff] }
 0x3cb   :  { %6101 = vmatpush3.bf16.msra.mxu0 %v7699_v51  ;;  %v1041_v51 = vld [vmem:[#allocation2 + $0x101] sm:$0xff] }
 0x3cc   :  { %7212 = vmatprep.subr.bf16.mxu0 %v11226_v50  ;;  %v1077_v54 = vmul.f32 %v1041_v51, %v263_v25 }
 0x3cd   :  { %6791 = vmatmul.mubr.bf16.gmra.mrb[84].mxu0 %v9369_v8  ;;  %6843 = vmatmul.mubr.bf16.gmra.mrb[88].mxu1 %v9375_v59 }
 0x3ce   :  { %6794 = vmatprep.mubr.bf16.mxu0 %v9375_v59  ;;  %6846 = vmatprep.mubr.bf16.mxu1 %v9377_v10  ;;  %v9392_v49 = vpack.c.bf16 %v1077_v54, %v1076_v61  ;;  %v266_v61 = vld [vmem:[#allocation8 + $0x110] sm:$0xff] }
 0x3d5   :  { %6795 = vmatmul.mubr.bf16.gmra.mrb[88].mxu0 %v9377_v10  ;;  %6847 = vmatmul.mubr.bf16.gmra.mrb[92].mxu1 %v9384_v0 }
 0x3d6   :  { %6798 = vmatprep.mubr.bf16.mxu0 %v9384_v0  ;;  %6850 = vmatprep.mubr.bf16.mxu1 %v9386_v48 }
 0x3dd   :  { %6799 = vmatmul.mubr.bf16.gmra.mrb[92].mxu0 %v9386_v48  ;;  %6851 = vmatmul.mubr.bf16.gmra.mrb[96].mxu1 %v9392_v49 }
 0x3de   :  { %6802 = vmatprep.mubr.bf16.mxu0 %v9392_v49  ;;  %6870 = vmatprep.mubr.bf16.mxu1 %v9338_v31 }
 0x3e5   :  { %6803 = vmatmul.mubr.bf16.gmra.mrb[96].mxu0 %v9398_v62  ;;  %6871 = vmatmul.mubr.bf16.vlgmr.msra.gmra.mrb[68].mxu1 %v9343_v26 }
 0x3e6   :  { %2390 = vmatprep.mubr.bf16.mxu0 %v9173_v4  ;;  %6874 = vmatprep.mubr.bf16.mxu1 %v9347_v46 }
 0x3ed   :  { %2391 = vmatmul.mubr.bf16.vlgmr.msra.gmra.mrb[100].mxu0 %v9184_v56  ;;  %6875 = vmatmul.mubr.bf16.gmra.mrb[72].mxu1 %v9351_v12 }
 0x3ee   :  { %2398 = vmatprep.mubr.bf16.mxu0 %v9188_v37  ;;  %6878 = vmatprep.mubr.bf16.mxu1 %v9353_v24 }
 0x3f5   :  { %2399 = vmatmul.mubr.bf16.gmra.mrb[104].mxu0 %v9197_v38  ;;  %6879 = vmatmul.mubr.bf16.gmra.mrb[76].mxu1 %v9359_v15 }
 0x3f6   :  { %2406 = vmatprep.mubr.bf16.mxu0 %v9205_v32  ;;  %6882 = vmatprep.mubr.bf16.mxu1 %v9361_v17 }
 0x3fd   :  { %2407 = vmatmul.mubr.bf16.gmra.mrb[108].mxu0 %v9228_v35  ;;  %6883 = vmatmul.mubr.bf16.gmra.mrb[80].mxu1 %v9367_v55 }
 0x3fe   :  { %2414 = vmatprep.mubr.bf16.mxu0 %v9232_v11  ;;  %6886 = vmatprep.mubr.bf16.mxu1 %v9369_v8 }
 0x400   :  { %v5830_v4 = vpop.f32.mrb[4].mxu0  ;;  %v5972_v56 = vpop.f32.mrb[8].mxu1 }
 0x401   :  { %v5831_v37 = vpop.f32.mrb[5].mxu0  ;;  %v5973_v31 = vpop.f32.mrb[9].mxu1 }
 0x402   :  { %v9416_v26 = vadd.f32 %v5973_v31, %v5972_v56  ;;  %v5833_v38 = vpop.f32.mrb[6].mxu0  ;;  %v5975_v46 = vpop.f32.mrb[10].mxu1  ;;  %v9418_v12 = vadd.f32 %v5831_v37, %v5830_v4  ;;  %v1081_v56 = vmul.f32 %v1045_v43, %v267_v36 }
 0x403   :  { %v5834_v32 = vpop.f32.mrb[7].mxu0  ;;  %v5976_v24 = vpop.f32.mrb[11].mxu1 }
 0x404   :  { %v9420_v15 = vadd.f32 %v5976_v24, %v5975_v46  ;;  %v9422_v35 = vadd.f32 %v5834_v32, %v5833_v38 }
 0x405   :  { %2415 = vmatmul.mubr.bf16.gmra.mrb[112].mxu0 %v9241_v45  ;;  %6887 = vmatmul.mubr.bf16.gmra.mrb[84].mxu1 %v9375_v59 }
 0x406   :  { %2422 = vmatprep.mubr.bf16.mxu0 %v9245_v13  ;;  %6890 = vmatprep.mubr.bf16.mxu1 %v9377_v10 }
 0x408   :  { %v5836_v8 = vpop.f32.mrb[8].mxu0  ;;  %v5978_v11 = vpop.f32.mrb[12].mxu1 }
 0x409   :  { %v5837_v17 = vpop.f32.mrb[9].mxu0  ;;  %v5979_v55 = vpop.f32.mrb[13].mxu1 }
 0x40a   :  { %v9428_v3 = vadd.f32 %v5979_v55, %v5978_v11  ;;  %v5839_v40 = vpop.f32.mrb[10].mxu0  ;;  %v5981_v18 = vpop.f32.mrb[14].mxu1  ;;  %v9430_v27 = vadd.f32 %v5837_v17, %v5836_v8 }
 0x40b   :  { %v5840_v57 = vpop.f32.mrb[11].mxu0  ;;  %v5982_v25 = vpop.f32.mrb[15].mxu1 }
 0x40c   :  { %v9432_v1 = vadd.f32 %v5982_v25, %v5981_v18  ;;  %v9434_v45 = vadd.f32 %v5840_v57, %v5839_v40 }
 0x40d   :  { %2423 = vmatmul.mubr.bf16.gmra.mrb[116].mxu0 %v9251_v16  ;;  %6891 = vmatmul.mubr.bf16.gmra.mrb[88].mxu1 %v9384_v0 }
 0x40e   :  { %2430 = vmatprep.mubr.bf16.mxu0 %v9255_v2  ;;  %6894 = vmatprep.mubr.bf16.mxu1 %v9386_v48  ;;  %v1080_v48 = vmul.f32 %v1044_v60, %v266_v61 }
 0x410   :  { %v5842_v13 = vpop.f32.mrb[12].mxu0  ;;  %v5984_v59 = vpop.f32.mrb[16].mxu1  ;;  %v1135_v32 = vpack.c.bf16 %v1081_v56, %v1080_v48 }
 0x411   :  { %v5843_v10 = vpop.f32.mrb[13].mxu0  ;;  %v5985_v51 = vpop.f32.mrb[17].mxu1 }
 0x412   :  { %v9440_v54 = vadd.f32 %v5985_v51, %v5984_v59  ;;  %v5845_v47 = vpop.f32.mrb[14].mxu0  ;;  %v5987_v44 = vpop.f32.mrb[18].mxu1  ;;  %v9442_v39 = vadd.f32 %v5843_v10, %v5842_v13 }
 0x413   :  { %v5846_v16 = vpop.f32.mrb[15].mxu0  ;;  %v5988_v0 = vpop.f32.mrb[19].mxu1 }
 0x414   :  { %v9444_v4 = vadd.f32 %v5988_v0, %v5987_v44  ;;  %v9446_v2 = vadd.f32 %v5846_v16, %v5845_v47 }
 0x415   :  { %2431 = vmatmul.mubr.bf16.gmra.mrb[120].mxu0 %v9261_v53  ;;  %6895 = vmatmul.mubr.bf16.gmra.mrb[92].mxu1 %v9392_v49 }
 0x416   :  { %2438 = vmatprep.mubr.bf16.mxu0 %v9265_v30  ;;  %6898 = vmatprep.mubr.bf16.mxu1 %v9398_v62 }
 0x418   :  { %v5848_v37 = vpop.f32.mrb[16].mxu0  ;;  %v5990_v31 = vpop.f32.mrb[20].mxu1 }
 0x419   :  { %v5849_v38 = vpop.f32.mrb[17].mxu0  ;;  %v5991_v46 = vpop.f32.mrb[21].mxu1 }
 0x41a   :  { %v9452_v24 = vadd.f32 %v5991_v46, %v5990_v31  ;;  %v5851_v8 = vpop.f32.mrb[18].mxu0  ;;  %v5993_v11 = vpop.f32.mrb[22].mxu1  ;;  %v9454_v17 = vadd.f32 %v5849_v38, %v5848_v37 }
 0x41b   :  { %v5852_v53 = vpop.f32.mrb[19].mxu0  ;;  %v5994_v55 = vpop.f32.mrb[23].mxu1 }
 0x41c   :  { %v9456_v49 = vadd.f32 %v5994_v55, %v5993_v11  ;;  %v9458_v40 = vadd.f32 %v5852_v53, %v5851_v8 }
 0x41d   :  { %2439 = vmatmul.mubr.bf16.gmra.mrb[124].mxu0 %v9271_v28  ;;  %6899 = vmatmul.mubr.bf16.gmra.mrb[96].mxu1 %v1135_v32 }
 0x41e   :  { %2446 = vmatprep.mubr.bf16.mxu0 %v9275_v22 }
 0x420   :  { %v5854_v30 = vpop.f32.mrb[20].mxu0  ;;  %v5996_v62 = vpop.f32.mrb[24].mxu1 }
 0x421   :  { %v5855_v18 = vpop.f32.mrb[21].mxu0  ;;  %v5997_v57 = vpop.f32.mrb[25].mxu1 }
 0x422   :  { %v9462_v25 = vadd.f32 %v5997_v57, %v5996_v62  ;;  %v5857_v13 = vpop.f32.mrb[22].mxu0  ;;  %v5999_v59 = vpop.f32.mrb[26].mxu1  ;;  %v9464_v10 = vadd.f32 %v5855_v18, %v5854_v30 }
 0x423   :  { %v5858_v51 = vpop.f32.mrb[23].mxu0  ;;  %v6000_v61 = vpop.f32.mrb[27].mxu1 }
 0x424   :  { %v9466_v47 = vadd.f32 %v6000_v61, %v5999_v59  ;;  %v9468_v44 = vadd.f32 %v5858_v51, %v5857_v13 }
 0x425   :  { %2447 = vmatmul.mubr.bf16.gmra.mrb[128].mxu0 %v9281_v20 }
 0x426   :  { %2454 = vmatprep.mubr.bf16.mxu0 %v9285_v58 }
 0x428   :  { %v5860_v28 = vpop.f32.mrb[24].mxu0  ;;  %v6002_v22 = vpop.f32.mrb[28].mxu1 }
 0x429   :  { %v5861_v36 = vpop.f32.mrb[25].mxu0  ;;  %v6003_v60 = vpop.f32.mrb[29].mxu1 }
 0x42a   :  { %v9472_v43 = vadd.f32 %v6003_v60, %v6002_v22  ;;  %v5863_v16 = vpop.f32.mrb[26].mxu0  ;;  %v6005_v0 = vpop.f32.mrb[30].mxu1  ;;  %v9474_v48 = vadd.f32 %v5861_v36, %v5860_v28 }
 0x42b   :  { %v5864_v56 = vpop.f32.mrb[27].mxu0  ;;  %v6006_v37 = vpop.f32.mrb[31].mxu1 }
 0x42c   :  { %v9476_v31 = vadd.f32 %v6006_v37, %v6005_v0  ;;  %v9478_v38 = vadd.f32 %v5864_v56, %v5863_v16 }
 0x42d   :  { %2455 = vmatmul.mubr.bf16.gmra.mrb[132].mxu0 %v9291_v7 }
 0x42e   :  { %2462 = vmatprep.mubr.bf16.mxu0 %v9066_v23 }
 0x430   :  { %v5866_v20 = vpop.f32.mrb[28].mxu0  ;;  %v6008_v58 = vpop.f32.mrb[32].mxu1 }
 0x431   :  { %v5867_v46 = vpop.f32.mrb[29].mxu0  ;;  %v6009_v32 = vpop.f32.mrb[33].mxu1 }
 0x432   :  { %v9482_v8 = vadd.f32 %v6009_v32, %v6008_v58  ;;  %v5869_v11 = vpop.f32.mrb[30].mxu0  ;;  %v6011_v53 = vpop.f32.mrb[34].mxu1  ;;  %v9484_v55 = vadd.f32 %v5867_v46, %v5866_v20 }
 0x433   :  { %v5870_v30 = vpop.f32.mrb[31].mxu0  ;;  %v6012_v62 = vpop.f32.mrb[35].mxu1 }
 0x434   :  { %v9486_v18 = vadd.f32 %v6012_v62, %v6011_v53  ;;  %v9488_v57 = vadd.f32 %v5870_v30, %v5869_v11 }
 0x435   :  { %2463 = vmatmul.mubr.bf16.gmra.mrb[136].mxu0 %v9299_v41 }
 0x436   :  { %2470 = vmatprep.mubr.bf16.mxu0 %v9077_v19 }
 0x438   :  { %v5872_v23 = vpop.f32.mrb[32].mxu0  ;;  %v6014_v7 = vpop.f32.mrb[36].mxu1 }
 0x439   :  { %v5873_v13 = vpop.f32.mrb[33].mxu0  ;;  %v6015_v59 = vpop.f32.mrb[37].mxu1 }
 0x43a   :  { %v9492_v51 = vadd.f32 %v6015_v59, %v6014_v7  ;;  %v5875_v61 = vpop.f32.mrb[34].mxu0  ;;  %v6017_v28 = vpop.f32.mrb[38].mxu1  ;;  %v9494_v22 = vadd.f32 %v5873_v13, %v5872_v23 }
 0x43b   :  { %v5876_v36 = vpop.f32.mrb[35].mxu0  ;;  %v6018_v60 = vpop.f32.mrb[39].mxu1 }
 0x43c   :  { %v9496_v16 = vadd.f32 %v6018_v60, %v6017_v28  ;;  %v9498_v0 = vadd.f32 %v5876_v36, %v5875_v61 }
 0x43d   :  { %2471 = vmatmul.mubr.bf16.gmra.mrb[140].mxu0 %v9307_v33 }
 0x43e   :  { %2478 = vmatprep.mubr.bf16.mxu0 %v9086_v14 }
 0x440   :  { %v5878_v19 = vpop.f32.mrb[36].mxu0  ;;  %v6020_v41 = vpop.f32.mrb[40].mxu1 }
 0x441   :  { %v5879_v56 = vpop.f32.mrb[37].mxu0  ;;  %v6021_v37 = vpop.f32.mrb[41].mxu1 }
 0x442   :  { %v9502_v20 = vadd.f32 %v6021_v37, %v6020_v41  ;;  %v5881_v58 = vpop.f32.mrb[38].mxu0  ;;  %v6023_v46 = vpop.f32.mrb[42].mxu1  ;;  %v9504_v32 = vadd.f32 %v5879_v56, %v5878_v19 }
 0x443   :  { %v5882_v11 = vpop.f32.mrb[39].mxu0  ;;  %v6024_v53 = vpop.f32.mrb[43].mxu1 }
 0x444   :  { %v9506_v30 = vadd.f32 %v6024_v53, %v6023_v46  ;;  %v9508_v62 = vadd.f32 %v5882_v11, %v5881_v58 }
 0x445   :  { %2479 = vmatmul.mubr.bf16.gmra.mrb[144].mxu0 %v9313_v29 }
 0x446   :  { %2486 = vmatprep.mubr.bf16.mxu0 %v9315_v52 }
 0x448   :  { %v5884_v14 = vpop.f32.mrb[40].mxu0  ;;  %v6026_v33 = vpop.f32.mrb[44].mxu1 }
 0x449   :  { %v5885_v23 = vpop.f32.mrb[41].mxu0  ;;  %v6027_v7 = vpop.f32.mrb[45].mxu1 }
 0x44a   :  { %v9512_v13 = vadd.f32 %v6027_v7, %v6026_v33  ;;  %v5887_v59 = vpop.f32.mrb[42].mxu0  ;;  %v6029_v61 = vpop.f32.mrb[46].mxu1  ;;  %v9514_v28 = vadd.f32 %v5885_v23, %v5884_v14 }
 0x44b   :  { %v5888_v36 = vpop.f32.mrb[43].mxu0  ;;  %v6030_v60 = vpop.f32.mrb[47].mxu1 }
 0x44c   :  { %11227 = vst [vmem:[#allocation26_spill] sm:$0xff] %v9512_v13  ;;  %v9516_v19 = vadd.f32 %v6030_v60, %v6029_v61  ;;  %v9518_v41 = vadd.f32 %v5888_v36, %v5887_v59 }
 0x44d   :  { %2487 = vmatmul.mubr.bf16.gmra.mrb[148].mxu0 %v9321_v34 }
 0x44e   :  { %11228 = vst [vmem:[#allocation27_spill] sm:$0xff] %v9516_v19  ;;  %2494 = vmatprep.mubr.bf16.mxu0 %v9323_v63 }
 0x450   :  { %v5890_v29 = vpop.f32.mrb[44].mxu0  ;;  %v6032_v52 = vpop.f32.mrb[48].mxu1 }
 0x451   :  { %v5891_v56 = vpop.f32.mrb[45].mxu0  ;;  %v6033_v37 = vpop.f32.mrb[49].mxu1 }
 0x452   :  { %v9522_v58 = vadd.f32 %v5891_v56, %v5890_v29  ;;  %v9524_v46 = vadd.f32 %v6033_v37, %v6032_v52  ;;  %v5893_v11 = vpop.f32.mrb[46].mxu0  ;;  %v6035_v53 = vpop.f32.mrb[50].mxu1  ;;  %v9536_v56 = vld [vmem:[#allocation2] sm:$0xff] }
 0x453   :  { %v5894_v14 = vpop.f32.mrb[47].mxu0  ;;  %v6036_v33 = vpop.f32.mrb[51].mxu1  ;;  %11232 = vst [vmem:[#allocation31_spill] sm:$0xff] %v9536_v56  ;;  %v1134_v37 = vpack.c.bf16 %v9536_v56, %v9536_v56 }
 0x454   :  { %v9526_v23 = vadd.f32 %v5894_v14, %v5893_v11  ;;  %v9528_v7 = vadd.f32 %v6036_v33, %v6035_v53  ;;  %v2751_v11 = vld [vmem:[#allocation12] sm:$0xff]  ;;  %v2752_v53 = vld [vmem:[#allocation12 + $0x8] sm:$0xff] }
 0x455   :  { %2495 = vmatmul.mubr.bf16.gmra.mrb[152].mxu0 %v9329_v6  ;;  %v9540_v33 = vpack.c.bf16 %v2752_v53, %v2751_v11 }
 0x456   :  { %11229 = vst [vmem:[#allocation28_spill] sm:$0xff] %v9526_v23  ;;  %11230 = vst [vmem:[#allocation29_spill] sm:$0xff] %v9528_v7  ;;  %2502 = vmatprep.mubr.bf16.mxu0 %v9331_v9  ;;  %v230_v9 = vld [vmem:[#allocation6 + $0x110] sm:$0xff] }
 0x457   :  { %11233 = vst [vmem:[#allocation32_spill] sm:$0xff] %v9540_v33  ;;  %7214 = vmatpush3.bf16.msra.mxu0 %v9540_v33 }
 0x458   :  { %v5896_v34 = vpop.f32.mrb[48].mxu0  ;;  %v6038_v63 = vpop.f32.mrb[52].mxu1  ;;  %7215 = vmatprep.subr.bf16.mxu0 %v11226_v50 }
 0x459   :  { %v5897_v59 = vpop.f32.mrb[49].mxu0  ;;  %v6039_v61 = vpop.f32.mrb[53].mxu1 }
 0x45a   :  { %v9532_v36 = vadd.f32 %v5897_v59, %v5896_v34  ;;  %v9534_v60 = vadd.f32 %v6039_v61, %v6038_v63  ;;  %v5899_v29 = vpop.f32.mrb[50].mxu0  ;;  %v6041_v52 = vpop.f32.mrb[54].mxu1  ;;  %v231_v63 = vld [vmem:[#allocation6 + $0x118] sm:$0xff]  ;;  %v972_v59 = vld [vmem:[#allocation2 + $0x117] sm:$0xff]  ;;  %v973_v61 = vld [vmem:[#allocation2 + $0x11f] sm:$0xff] }
 0x45b   :  { %v5900_v6 = vpop.f32.mrb[51].mxu0  ;;  %v6042_v14 = vpop.f32.mrb[55].mxu1  ;;  %v9548_v7 = vmul.f32 %v973_v61, %v231_v63 }
 0x45c   :  { %11231 = vst [vmem:[#allocation30_spill] sm:$0xff] %v9534_v60  ;;  %v9542_v19 = vadd.f32 %v5900_v6, %v5899_v29  ;;  %v9544_v34 = vadd.f32 %v6042_v14, %v6041_v52  ;;  %v1008_v60 = vmul.f32 %v972_v59, %v230_v9 }
 0x45d   :  { %2503 = vmatmul.mubr.bf16.gmra.mrb[156].mxu0 %v9336_v21  ;;  %11235 = vst [vmem:[#allocation34_spill] sm:$0xff] %v9548_v7 }
 0x45e   :  { %11234 = vst [vmem:[#allocation33_spill] sm:$0xff] %v9544_v34  ;;  %2510 = vmatprep.mubr.bf16.mxu0 %v1134_v37  ;;  %v1133_v37 = vpack.c.bf16 %v9548_v7, %v1008_v60  ;;  %v2754_v60 = vld [vmem:[#allocation12 + $0x18] sm:$0xff] }
 0x460   :  { %v5902_v23 = vpop.f32.mrb[52].mxu0  ;;  %v6044_v11 = vpop.f32.mrb[56].mxu1 }
 0x461   :  { %v5903_v53 = vpop.f32.mrb[53].mxu0  ;;  %v6045_v29 = vpop.f32.mrb[57].mxu1 }
 0x462   :  { %v9551_v6 = vadd.f32 %v5903_v53, %v5902_v23  ;;  %v9553_v52 = vadd.f32 %v6045_v29, %v6044_v11  ;;  %v5905_v14 = vpop.f32.mrb[54].mxu0  ;;  %v6047_v34 = vpop.f32.mrb[58].mxu1 }
 0x463   :  { %v5906_v13 = vpop.f32.mrb[55].mxu0  ;;  %v6048_v21 = vpop.f32.mrb[59].mxu1 }
 0x464   :  { %11236 = vst [vmem:[#allocation35_spill] sm:$0xff] %v9551_v6  ;;  %11237 = vst [vmem:[#allocation36_spill] sm:$0xff] %v9553_v52  ;;  %v9556_v33 = vadd.f32 %v5906_v13, %v5905_v14  ;;  %v9558_v9 = vadd.f32 %v6048_v21, %v6047_v34  ;;  %v2753_v6 = vld [vmem:[#allocation12 + $0x10] sm:$0xff] }
 0x465   :  { %2511 = vmatmul.mubr.bf16.gmra.mrb[160].mxu0 %v1133_v37  ;;  %v9566_v34 = vpack.c.bf16 %v2754_v60, %v2753_v6 }
 0x466   :  { %11238 = vst [vmem:[#allocation37_spill] sm:$0xff] %v9556_v33  ;;  %11239 = vst [vmem:[#allocation38_spill] sm:$0xff] %v9558_v9  ;;  %6934 = vmatprep.mubr.msk.f32.mxu0 %vm8367_vm0, %v9536_v56  ;;  %v2755_v33 = vld [vmem:[#allocation12 + $0x20] sm:$0xff] }
 0x467   :  { %11242 = vst [vmem:[#allocation41_spill] sm:$0xff] %v9566_v34  ;;  %7217 = vmatpush3.bf16.msra.mxu0 %v9566_v34 }
 0x468   :  { %v5908_v63 = vpop.f32.mrb[56].mxu0  ;;  %v6050_v59 = vpop.f32.mrb[60].mxu1  ;;  %7218 = vmatprep.subr.bf16.mxu0 %v11226_v50 }
 0x469   :  { %v5909_v23 = vpop.f32.mrb[57].mxu0  ;;  %v6051_v61 = vpop.f32.mrb[61].mxu1 }
 0x46a   :  { %v9562_v11 = vadd.f32 %v5909_v23, %v5908_v63  ;;  %v9564_v53 = vadd.f32 %v6051_v61, %v6050_v59  ;;  %v5911_v29 = vpop.f32.mrb[58].mxu0  ;;  %v6053_v52 = vpop.f32.mrb[62].mxu1 }
 0x46b   :  { %v5912_v13 = vpop.f32.mrb[59].mxu0  ;;  %v6054_v14 = vpop.f32.mrb[63].mxu1 }
 0x46c   :  { %11240 = vst [vmem:[#allocation39_spill] sm:$0xff] %v9562_v11  ;;  %11241 = vst [vmem:[#allocation40_spill] sm:$0xff] %v9564_v53  ;;  %v9568_v21 = vadd.f32 %v5912_v13, %v5911_v29  ;;  %v9570_v37 = vadd.f32 %v6054_v14, %v6053_v52 }
 0x46e   :  { %11243 = vst [vmem:[#allocation42_spill] sm:$0xff] %v9568_v21  ;;  %11244 = vst [vmem:[#allocation43_spill] sm:$0xff] %v9570_v37  ;;  %v2756_v21 = vld [vmem:[#allocation12 + $0x28] sm:$0xff] }
 0x470   :  { %v5914_v63 = vpop.f32.mrb[60].mxu0  ;;  %v6056_v23 = vpop.f32.mrb[64].mxu1 }
 0x471   :  { %v5915_v59 = vpop.f32.mrb[61].mxu0  ;;  %v6057_v61 = vpop.f32.mrb[65].mxu1 }
 0x472   :  { %v9574_v7 = vadd.f32 %v5915_v59, %v5914_v63  ;;  %v9576_v56 = vadd.f32 %v6057_v61, %v6056_v23  ;;  %v5917_v53 = vpop.f32.mrb[62].mxu0  ;;  %v6059_v9 = vpop.f32.mrb[66].mxu1  ;;  %v9584_v63 = vpack.c.bf16 %v2756_v21, %v2755_v33 }
 0x473   :  { %v5918_v6 = vpop.f32.mrb[63].mxu0  ;;  %v6060_v60 = vpop.f32.mrb[67].mxu1 }
 0x474   :  { %v9578_v29 = vadd.f32 %v5918_v6, %v5917_v53  ;;  %v9580_v52 = vadd.f32 %v6060_v60, %v6059_v9  ;;  %11245 = vst [vmem:[#allocation44_spill] sm:$0xff] %v9584_v63  ;;  %7220 = vmatpush3.bf16.msra.mxu0 %v9584_v63 }
 0x475   :  { %7221 = vmatprep.subr.bf16.mxu0 %v11226_v50 }
 0x478   :  { %v5920_v13 = vpop.f32.mrb[64].mxu0 }
 0x479   :  { %v5921_v14 = vpop.f32.mrb[65].mxu0 }
 0x47a   :  { %v9582_v34 = vadd.f32 %v5921_v14, %v5920_v13  ;;  %v5923_v37 = vpop.f32.mrb[66].mxu0 }
 0x47b   :  { %v5924_v11 = vpop.f32.mrb[67].mxu0 }
 0x47c   :  { %v9586_v23 = vadd.f32 %v5924_v11, %v5923_v37 }
 0x480   :  { %v6776_v53 = vpop.f32.mrb[68].mxu0 }
 0x481   :  { %v1581_v9 = vadd.f32 %v6776_v53, %v9430_v27  ;;  %v1572_v59 = vpop.f32.mrb[69].mxu0 }
 0x482   :  { %v1573_v61 = vadd.f32 %v9418_v12, %v1572_v59  ;;  %v6777_v6 = vpop.f32.mrb[70].mxu0  ;;  %v2758_v59 = vld [vmem:[#allocation12 + $0x38] sm:$0xff] }
 0x483   :  { %v9593_v60 = vadd.f32 %v9416_v26, %v1581_v9  ;;  %v1584_v13 = vadd.f32 %v6777_v6, %v9434_v45  ;;  %v1575_v33 = vpop.f32.mrb[71].mxu0  ;;  %v2757_v45 = vld [vmem:[#allocation12 + $0x30] sm:$0xff] }
 0x484   :  { %v9597_v11 = vadd.f32 %v9297_v42, %v1573_v61  ;;  %v1576_v21 = vadd.f32 %v9422_v35, %v1575_v33 }
 0x485   :  { %v9601_v37 = vadd.f32 %v9420_v15, %v1584_v13  ;;  %v9612_v15 = vpack.c.bf16 %v2758_v59, %v2757_v45  ;;  %v2760_v45 = vld [vmem:[#allocation12 + $0x48] sm:$0xff] }
 0x486   :  { %v9604_v27 = vadd.f32 %v9305_v5, %v1576_v21 }
 0x487   :  { %11246 = vst [vmem:[#allocation45_spill] sm:$0xff] %v9612_v15  ;;  %7223 = vmatpush3.bf16.msra.mxu0 %v9612_v15 }
 0x488   :  { %v6780_v14 = vpop.f32.mrb[72].mxu0  ;;  %7224 = vmatprep.subr.bf16.mxu0 %v11226_v50 }
 0x489   :  { %v1597_v12 = vadd.f32 %v6780_v14, %v9454_v17  ;;  %v1588_v53 = vpop.f32.mrb[73].mxu0 }
 0x48a   :  { %v1589_v26 = vadd.f32 %v9442_v39, %v1588_v53  ;;  %v6781_v9 = vpop.f32.mrb[74].mxu0 }
 0x48b   :  { %v9609_v42 = vadd.f32 %v9440_v54, %v1597_v12  ;;  %v1600_v35 = vadd.f32 %v6781_v9, %v9458_v40  ;;  %v1591_v61 = vpop.f32.mrb[75].mxu0 }
 0x48c   :  { %v9615_v5 = vadd.f32 %v9428_v3, %v1589_v26  ;;  %v1592_v6 = vadd.f32 %v9446_v2, %v1591_v61 }
 0x48d   :  { %v9619_v17 = vadd.f32 %v9444_v4, %v1600_v35 }
 0x48e   :  { %v9623_v39 = vadd.f32 %v9432_v1, %v1592_v6 }
 0x490   :  { %v6784_v54 = vpop.f32.mrb[76].mxu0 }
 0x491   :  { %v1613_v40 = vadd.f32 %v6784_v54, %v9474_v48  ;;  %v1604_v13 = vpop.f32.mrb[77].mxu0 }
 0x492   :  { %v1605_v33 = vadd.f32 %v9464_v10, %v1604_v13  ;;  %v6785_v3 = vpop.f32.mrb[78].mxu0 }
 0x493   :  { %v9629_v21 = vadd.f32 %v9462_v25, %v1613_v40  ;;  %v1616_v4 = vadd.f32 %v6785_v3, %v9478_v38  ;;  %v1607_v2 = vpop.f32.mrb[79].mxu0  ;;  %v2759_v38 = vld [vmem:[#allocation12 + $0x40] sm:$0xff] }
 0x494   :  { %v9633_v14 = vadd.f32 %v9452_v24, %v1605_v33  ;;  %v1608_v1 = vadd.f32 %v9468_v44, %v1607_v2  ;;  %v2762_v2 = vld [vmem:[#allocation12 + $0x58] sm:$0xff] }
 0x495   :  { %v9637_v12 = vadd.f32 %v9466_v47, %v1616_v4  ;;  %v9648_v47 = vpack.c.bf16 %v2760_v45, %v2759_v38 }
 0x496   :  { %v9640_v48 = vadd.f32 %v9456_v49, %v1608_v1 }
 0x497   :  { %11247 = vst [vmem:[#allocation46_spill] sm:$0xff] %v9648_v47  ;;  %7226 = vmatpush3.bf16.msra.mxu0 %v9648_v47 }
 0x498   :  { %v6788_v53 = vpop.f32.mrb[80].mxu0  ;;  %7227 = vmatprep.subr.bf16.mxu0 %v11226_v50 }
 0x499   :  { %v1629_v10 = vadd.f32 %v6788_v53, %v9494_v22  ;;  %v1620_v26 = vpop.f32.mrb[81].mxu0  ;;  %v11249_v53 = vld [vmem:[#allocation26_spill] sm:$0xff] }
 0x49a   :  { %v1621_v25 = vadd.f32 %v9484_v55, %v1620_v26  ;;  %v6789_v9 = vpop.f32.mrb[82].mxu0 }
 0x49b   :  { %v9645_v24 = vadd.f32 %v9482_v8, %v1629_v10  ;;  %v1632_v44 = vadd.f32 %v6789_v9, %v9498_v0  ;;  %v1623_v59 = vpop.f32.mrb[83].mxu0  ;;  %v11250_v10 = vld [vmem:[#allocation28_spill] sm:$0xff] }
 0x49c   :  { %v9651_v49 = vadd.f32 %v9472_v43, %v1621_v25  ;;  %v1624_v35 = vadd.f32 %v9488_v57, %v1623_v59 }
 0x49d   :  { %v9655_v22 = vadd.f32 %v9486_v18, %v1632_v44  ;;  %v11254_v44 = vld [vmem:[#allocation35_spill] sm:$0xff] }
 0x49e   :  { %v9659_v55 = vadd.f32 %v9476_v31, %v1624_v35 }
 0x4a0   :  { %v6792_v8 = vpop.f32.mrb[84].mxu0 }
 0x4a1   :  { %v1645_v0 = vadd.f32 %v6792_v8, %v9514_v28  ;;  %v1636_v61 = vpop.f32.mrb[85].mxu0  ;;  %v11255_v8 = vld [vmem:[#allocation36_spill] sm:$0xff] }
 0x4a2   :  { %v1637_v6 = vadd.f32 %v9504_v32, %v1636_v61  ;;  %v6793_v43 = vpop.f32.mrb[86].mxu0  ;;  %v11256_v61 = vld [vmem:[#allocation42_spill] sm:$0xff] }
 0x4a3   :  { %v9665_v54 = vadd.f32 %v9502_v20, %v1645_v0  ;;  %v1648_v18 = vadd.f32 %v6793_v43, %v9518_v41  ;;  %v1639_v57 = vpop.f32.mrb[87].mxu0  ;;  %v2761_v41 = vld [vmem:[#allocation12 + $0x50] sm:$0xff] }
 0x4a4   :  { %v9669_v40 = vadd.f32 %v9492_v51, %v1637_v6  ;;  %v1640_v31 = vadd.f32 %v9508_v62, %v1639_v57 }
 0x4a5   :  { %v9673_v13 = vadd.f32 %v9506_v30, %v1648_v18  ;;  %v9684_v30 = vpack.c.bf16 %v2762_v2, %v2761_v41  ;;  %v11257_v18 = vld [vmem:[#allocation30_spill] sm:$0xff] }
 0x4a6   :  { %v9676_v28 = vadd.f32 %v9496_v16, %v1640_v31  ;;  %v11258_v31 = vld [vmem:[#allocation37_spill] sm:$0xff] }
 0x4a7   :  { %11248 = vst [vmem:[#allocation47_spill] sm:$0xff] %v9684_v30  ;;  %7229 = vmatpush3.bf16.msra.mxu0 %v9684_v30 }
 0x4a8   :  { %v6796_v33 = vpop.f32.mrb[88].mxu0  ;;  %7230 = vmatprep.subr.bf16.mxu0 %v11226_v50 }
 0x4a9   :  { %v1661_v32 = vadd.f32 %v6796_v33, %v9532_v36  ;;  %v1652_v3 = vpop.f32.mrb[89].mxu0  ;;  %v11251_v36 = vld [vmem:[#allocation29_spill] sm:$0xff] }
 0x4aa   :  { %v1653_v20 = vadd.f32 %v9522_v58, %v1652_v3  ;;  %v6797_v4 = vpop.f32.mrb[90].mxu0  ;;  %v11252_v58 = vld [vmem:[#allocation27_spill] sm:$0xff] }
 0x4ab   :  { %v9681_v51 = vadd.f32 %v9524_v46, %v1661_v32  ;;  %v1664_v62 = vadd.f32 %v6797_v4, %v9542_v19  ;;  %v1655_v1 = vpop.f32.mrb[91].mxu0  ;;  %v11253_v19 = vld [vmem:[#allocation39_spill] sm:$0xff]  ;;  %v11259_v32 = vld [vmem:[#allocation38_spill] sm:$0xff] }
 0x4ac   :  { %v9687_v16 = vadd.f32 %v11249_v53, %v1653_v20  ;;  %v1656_v26 = vadd.f32 %v11250_v10, %v1655_v1  ;;  %v11260_v20 = vld [vmem:[#allocation33_spill] sm:$0xff] }
 0x4ad   :  { %v9691_v25 = vadd.f32 %v11251_v36, %v1664_v62 }
 0x4ae   :  { %v9695_v9 = vadd.f32 %v11252_v58, %v1656_v26  ;;  %v2763_v58 = vld [vmem:[#allocation12 + $0x60] sm:$0xff] }
 0x4b0   :  { %v6800_v46 = vpop.f32.mrb[92].mxu0 }
 0x4b1   :  { %v1677_v38 = vadd.f32 %v6800_v46, %v11253_v19  ;;  %v1668_v45 = vpop.f32.mrb[93].mxu0  ;;  %v2764_v46 = vld [vmem:[#allocation12 + $0x68] sm:$0xff] }
 0x4b2   :  { %v1669_v59 = vadd.f32 %v11254_v44, %v1668_v45  ;;  %v6801_v35 = vpop.f32.mrb[94].mxu0 }
 0x4b3   :  { %v9701_v0 = vadd.f32 %v11255_v8, %v1677_v38  ;;  %v1680_v6 = vadd.f32 %v6801_v35, %v11256_v61  ;;  %v1671_v43 = vpop.f32.mrb[95].mxu0  ;;  %v11262_v35 = vld [vmem:[#allocation40_spill] sm:$0xff]  ;;  %v11264_v61 = vld [vmem:[#allocation43_spill] sm:$0xff] }
 0x4b4   :  { %v9705_v57 = vadd.f32 %v11257_v18, %v1669_v59  ;;  %v1672_v33 = vadd.f32 %v11258_v31, %v1671_v43  ;;  %v9720_v59 = vpack.c.bf16 %v2764_v46, %v2763_v58 }
 0x4b5   :  { %v9709_v3 = vadd.f32 %v11259_v32, %v1680_v6 }
 0x4b6   :  { %v9712_v4 = vadd.f32 %v11260_v20, %v1672_v33  ;;  %11261 = vst [vmem:[#allocation26_spill] sm:$0xff] %v9720_v59  ;;  %7232 = vmatpush3.bf16.msra.mxu0 %v9720_v59 }
 0x4b7   :  { %7233 = vmatprep.subr.bf16.mxu0 %v11226_v50 }
 0x4b8   :  { %v6804_v41 = vpop.f32.mrb[96].mxu0  ;;  %v6872_v2 = vpop.f32.mrb[68].mxu1 }
 0x4b9   :  { %v1693_v62 = vadd.f32 %v6804_v41, %v9582_v34  ;;  %v1684_v1 = vpop.f32.mrb[97].mxu0  ;;  %v2553_v53 = vpop.f32.mrb[69].mxu1 }
 0x4ba   :  { %v1685_v10 = vadd.f32 %v9574_v7, %v1684_v1  ;;  %v6805_v26 = vpop.f32.mrb[98].mxu0  ;;  %v6873_v36 = vpop.f32.mrb[70].mxu1 }
 0x4bb   :  { %v9717_v19 = vadd.f32 %v9576_v56, %v1693_v62  ;;  %v1696_v38 = vadd.f32 %v6805_v26, %v9586_v23  ;;  %v1687_v45 = vpop.f32.mrb[99].mxu0  ;;  %v2556_v44 = vpop.f32.mrb[71].mxu1 }
 0x4bc   :  { %v9723_v8 = vadd.f32 %v11262_v35, %v1685_v10  ;;  %v1688_v34 = vadd.f32 %v9578_v29, %v1687_v45 }
 0x4bd   :  { %v9727_v7 = vadd.f32 %v9580_v52, %v1696_v38 }
 0x4be   :  { %v9731_v6 = vadd.f32 %v11264_v61, %v1688_v34 }
 0x4bf   :  { %11263 = vst [vmem:[#allocation28_spill] sm:$0xff] %v9727_v7 }
 0x4c0   :  { %v6102_v56 = vpop.f32.mrb[100].mxu0  ;;  %v6876_v23 = vpop.f32.mrb[72].mxu1 }
 0x4c1   :  { %v6103_v43 = vpop.f32.mrb[101].mxu0  ;;  %v2569_v18 = vpop.f32.mrb[73].mxu1 }
 0x4c2   :  { %v6104_v31 = vadd.f32 %v6103_v43, %v6102_v56  ;;  %v6105_v33 = vpop.f32.mrb[102].mxu0  ;;  %v6877_v32 = vpop.f32.mrb[74].mxu1 }
 0x4c3   :  { %v6106_v20 = vpop.f32.mrb[103].mxu0  ;;  %v2572_v41 = vpop.f32.mrb[75].mxu1 }
 0x4c4   :  { %v7266_v29 = vadd.f32 %v6104_v31, %v9597_v11  ;;  %v6107_v52 = vadd.f32 %v6106_v20, %v6105_v33  ;;  %v2765_v31 = vld [vmem:[#allocation12 + $0x70] sm:$0xff] }
 0x4c6   :  { %v9735_v62 = vadd.f32 %v7266_v29, %v2553_v53  ;;  %v7274_v1 = vadd.f32 %v6107_v52, %v9604_v27  ;;  %v2766_v53 = vld [vmem:[#allocation12 + $0x78] sm:$0xff] }
 0x4c7   :  { %v9743_v33 = vpack.c.bf16 %v2766_v53, %v2765_v31 }
 0x4c8   :  { %v7275_v10 = vadd.f32 %v7274_v1, %v2556_v44  ;;  %v6108_v26 = vpop.f32.mrb[104].mxu0  ;;  %v9738_v58 = vpop.f32.mrb[76].mxu1 }
 0x4c9   :  { %v6109_v46 = vpop.f32.mrb[105].mxu0  ;;  %v2585_v38 = vpop.f32.mrb[77].mxu1  ;;  %11265 = vst [vmem:[#allocation29_spill] sm:$0xff] %v9743_v33  ;;  %7235 = vmatpush3.bf16.msra.mxu0 %v9743_v33 }
 0x4ca   :  { %v6110_v45 = vadd.f32 %v6109_v46, %v6108_v26  ;;  %v6111_v35 = vpop.f32.mrb[106].mxu0  ;;  %v9740_v34 = vpop.f32.mrb[78].mxu1  ;;  %7236 = vmatprep.subr.bf16.mxu0 %v11226_v50 }
 0x4cb   :  { %v6112_v61 = vpop.f32.mrb[107].mxu0  ;;  %v2588_v56 = vpop.f32.mrb[79].mxu1 }
 0x4cc   :  { %v7262_v43 = vadd.f32 %v6110_v45, %v9593_v60  ;;  %v6113_v11 = vadd.f32 %v6112_v61, %v6111_v35 }
 0x4ce   :  { %v7263_v27 = vadd.f32 %v7262_v43, %v6872_v2  ;;  %v7270_v44 = vadd.f32 %v6113_v11, %v9601_v37 }
 0x4d0   :  { %v7271_v20 = vadd.f32 %v7270_v44, %v6873_v36  ;;  %v6114_v29 = vpop.f32.mrb[108].mxu0  ;;  %v9747_v52 = vpop.f32.mrb[80].mxu1 }
 0x4d1   :  { %v6115_v1 = vpop.f32.mrb[109].mxu0  ;;  %v9750_v26 = vpop.f32.mrb[81].mxu1 }
 0x4d2   :  { %v6116_v60 = vadd.f32 %v6115_v1, %v6114_v29  ;;  %v6117_v46 = vpop.f32.mrb[110].mxu0  ;;  %v9752_v45 = vpop.f32.mrb[82].mxu1 }
 0x4d3   :  { %v6118_v35 = vpop.f32.mrb[111].mxu0  ;;  %v9754_v61 = vpop.f32.mrb[83].mxu1 }
 0x4d4   :  { %v7282_v37 = vadd.f32 %v6116_v60, %v9615_v5  ;;  %v6119_v2 = vadd.f32 %v6118_v35, %v6117_v46 }
 0x4d6   :  { %v7283_v43 = vadd.f32 %v7282_v37, %v2569_v18  ;;  %v7290_v36 = vadd.f32 %v6119_v2, %v9623_v39 }
 0x4d8   :  { %v7291_v11 = vadd.f32 %v7290_v36, %v2572_v41  ;;  %v6120_v31 = vpop.f32.mrb[112].mxu0  ;;  %v9758_v53 = vpop.f32.mrb[84].mxu1 }
 0x4d9   :  { %v6121_v44 = vpop.f32.mrb[113].mxu0  ;;  %v9760_v33 = vpop.f32.mrb[85].mxu1 }
 0x4da   :  { %v6122_v29 = vadd.f32 %v6121_v44, %v6120_v31  ;;  %v6123_v1 = vpop.f32.mrb[114].mxu0  ;;  %v9762_v59 = vpop.f32.mrb[86].mxu1 }
 0x4db   :  { %v6124_v30 = vpop.f32.mrb[115].mxu0  ;;  %v9764_v47 = vpop.f32.mrb[87].mxu1 }
 0x4dc   :  { %v7278_v5 = vadd.f32 %v6122_v29, %v9609_v42  ;;  %v6125_v60 = vadd.f32 %v6124_v30, %v6123_v1 }
 0x4de   :  { %v7279_v18 = vadd.f32 %v7278_v5, %v6876_v23  ;;  %v7286_v39 = vadd.f32 %v6125_v60, %v9619_v17 }
 0x4e0   :  { %v7287_v41 = vadd.f32 %v7286_v39, %v6877_v32  ;;  %v6126_v46 = vpop.f32.mrb[116].mxu0  ;;  %v9768_v35 = vpop.f32.mrb[88].mxu1  ;;  %v9781_v32 = vld [vmem:[%s11188_s1] ss:$0 sm:$0xff] }
 0x4e1   :  { %v6127_v37 = vpop.f32.mrb[117].mxu0  ;;  %v9770_v2 = vpop.f32.mrb[89].mxu1  ;;  %v9784_v29 = vadd.f32 %v7275_v10, %v9781_v32 }
 0x4e2   :  { %v6128_v36 = vadd.f32 %v6127_v37, %v6126_v46  ;;  %v6129_v31 = vpop.f32.mrb[118].mxu0  ;;  %v9772_v44 = vpop.f32.mrb[90].mxu1 }
 0x4e3   :  { %v6130_v15 = vpop.f32.mrb[119].mxu0  ;;  %v9774_v63 = vpop.f32.mrb[91].mxu1  ;;  %11266 = vst [vmem:[#allocation27_spill] sm:$0xff] %v9784_v29 }
 0x4e4   :  { %v7298_v42 = vadd.f32 %v6128_v36, %v9633_v14  ;;  %v6131_v30 = vadd.f32 %v6130_v15, %v6129_v31  ;;  %v9792_v15 = vadd.f32 %v9735_v62, %v9781_v32  ;;  %v9795_v14 = vadd.f32 %v7263_v27, %v9781_v32 }
 0x4e5   :  { %v9806_v62 = vadd.f32 %v7271_v20, %v9781_v32 }
 0x4e6   :  { %v7299_v23 = vadd.f32 %v7298_v42, %v2585_v38  ;;  %v7306_v17 = vadd.f32 %v6131_v30, %v9640_v48  ;;  %11267 = vst [vmem:[#allocation39_spill] sm:$0xff] %v9795_v14 }
 0x4e7   :  { %11268 = vst [vmem:[#allocation35_spill] sm:$0xff] %v9806_v62 }
 0x4e8   :  { %v7307_v1 = vadd.f32 %v7306_v17, %v2588_v56  ;;  %v6132_v5 = vpop.f32.mrb[120].mxu0  ;;  %v9786_v60 = vpop.f32.mrb[92].mxu1  ;;  %v2767_v56 = vadd.f32 %v9784_v29, %v9792_v15 }
 0x4e9   :  { %v6133_v39 = vpop.f32.mrb[121].mxu0  ;;  %v9788_v46 = vpop.f32.mrb[93].mxu1 }
 0x4ea   :  { %v6134_v48 = vadd.f32 %v6133_v39, %v6132_v5  ;;  %v6135_v38 = vpop.f32.mrb[122].mxu0  ;;  %v9797_v37 = vpop.f32.mrb[94].mxu1  ;;  %v2768_v30 = vadd.f32 %v2767_v56, %v9795_v14  ;;  %v9811_v5 = vadd.f32 %v7283_v43, %v9781_v32  ;;  %v9825_v43 = vadd.f32 %v7291_v11, %v9781_v32 }
 0x4eb   :  { %v6136_v10 = vpop.f32.mrb[123].mxu0  ;;  %v9799_v36 = vpop.f32.mrb[95].mxu1  ;;  %v9837_v11 = vadd.f32 %v7287_v41, %v9781_v32  ;;  %v9848_v41 = vadd.f32 %v7307_v1, %v9781_v32 }
 0x4ec   :  { %v7294_v31 = vadd.f32 %v6134_v48, %v9629_v21  ;;  %v6137_v42 = vadd.f32 %v6136_v10, %v6135_v38  ;;  %v2769_v48 = vadd.f32 %v2768_v30, %v9806_v62 }
 0x4ee   :  { %v7295_v27 = vadd.f32 %v7294_v31, %v9738_v58  ;;  %v7302_v17 = vadd.f32 %v6137_v42, %v9637_v12  ;;  %v2770_v12 = vadd.f32 %v2769_v48, %v9811_v5  ;;  %v9829_v42 = vadd.f32 %v7279_v18, %v9781_v32 }
 0x4ef   :  { %v9840_v18 = vadd.f32 %v7299_v23, %v9781_v32 }
 0x4f0   :  { %v7303_v39 = vadd.f32 %v7302_v17, %v9740_v34  ;;  %v6138_v50 = vpop.f32.mrb[124].mxu0  ;;  %v9814_v7 = vpop.f32.mrb[96].mxu1  ;;  %v9852_v23 = vadd.f32 %v7295_v27, %v9781_v32 }
 0x4f1   :  { %v6139_v29 = vpop.f32.mrb[125].mxu0  ;;  %v9816_v21 = vpop.f32.mrb[97].mxu1 }
 0x4f2   :  { %v6140_v38 = vadd.f32 %v6139_v29, %v6138_v50  ;;  %v6141_v20 = vpop.f32.mrb[126].mxu0  ;;  %v9819_v10 = vpop.f32.mrb[98].mxu1  ;;  %v2771_v29 = vadd.f32 %v2770_v12, %v9825_v43  ;;  %v9858_v1 = vadd.f32 %v7303_v39, %v9781_v32 }
 0x4f3   :  { %v6142_v58 = vpop.f32.mrb[127].mxu0  ;;  %v9821_v56 = vpop.f32.mrb[99].mxu1 }
 0x4f4   :  { %v7314_v34 = vadd.f32 %v6140_v38, %v9651_v49  ;;  %v6143_v31 = vadd.f32 %v6142_v58, %v6141_v20  ;;  %v2772_v48 = vadd.f32 %v2771_v29, %v9829_v42 }
 0x4f6   :  { %v7315_v30 = vadd.f32 %v7314_v34, %v9750_v26  ;;  %v7322_v50 = vadd.f32 %v6143_v31, %v9659_v55  ;;  %v2773_v58 = vadd.f32 %v2772_v48, %v9837_v11 }
 0x4f8   :  { %v7323_v17 = vadd.f32 %v7322_v50, %v9754_v61  ;;  %v6144_v62 = vpop.f32.mrb[128].mxu0  ;;  %v2774_v34 = vadd.f32 %v2773_v58, %v9840_v18  ;;  %v9863_v27 = vadd.f32 %v7315_v30, %v9781_v32 }
 0x4f9   :  { %v6145_v14 = vpop.f32.mrb[129].mxu0 }
 0x4fa   :  { %v6146_v49 = vadd.f32 %v6145_v14, %v6144_v62  ;;  %v6147_v38 = vpop.f32.mrb[130].mxu0  ;;  %v2775_v48 = vadd.f32 %v2774_v34, %v9848_v41  ;;  %v9869_v39 = vadd.f32 %v7323_v17, %v9781_v32 }
 0x4fb   :  { %v6148_v20 = vpop.f32.mrb[131].mxu0 }
 0x4fc   :  { %v7310_v26 = vadd.f32 %v6146_v49, %v9645_v24  ;;  %v6149_v55 = vadd.f32 %v6148_v20, %v6147_v38  ;;  %v2776_v49 = vadd.f32 %v2775_v48, %v9852_v23 }
 0x4fe   :  { %v7311_v61 = vadd.f32 %v7310_v26, %v9747_v52  ;;  %v7318_v12 = vadd.f32 %v6149_v55, %v9655_v22  ;;  %v2777_v58 = vadd.f32 %v2776_v49, %v9858_v1 }
 0x500   :  { %v7319_v14 = vadd.f32 %v7318_v12, %v9752_v45  ;;  %v6150_v62 = vpop.f32.mrb[132].mxu0  ;;  %v9873_v30 = vadd.f32 %v7311_v61, %v9781_v32 }
 0x501   :  { %v6151_v31 = vpop.f32.mrb[133].mxu0 }
 0x502   :  { %v6152_v24 = vadd.f32 %v6151_v31, %v6150_v62  ;;  %v6153_v50 = vpop.f32.mrb[134].mxu0  ;;  %v2778_v62 = vadd.f32 %v2777_v58, %v9863_v27  ;;  %v9881_v17 = vadd.f32 %v7319_v14, %v9781_v32 }
 0x503   :  { %v6154_v29 = vpop.f32.mrb[135].mxu0 }
 0x504   :  { %v7330_v52 = vadd.f32 %v6152_v24, %v9669_v40  ;;  %v6155_v22 = vadd.f32 %v6154_v29, %v6153_v50  ;;  %v2779_v24 = vadd.f32 %v2778_v62, %v9869_v39 }
 0x506   :  { %v7331_v45 = vadd.f32 %v7330_v52, %v9760_v33  ;;  %v7338_v38 = vadd.f32 %v6155_v22, %v9676_v28  ;;  %v2780_v52 = vadd.f32 %v2779_v24, %v9873_v30 }
 0x508   :  { %v7339_v20 = vadd.f32 %v7338_v38, %v9764_v47  ;;  %v6156_v26 = vpop.f32.mrb[136].mxu0  ;;  %v9884_v61 = vadd.f32 %v7331_v45, %v9781_v32  ;;  %v2781_v38 = vadd.f32 %v2780_v52, %v9881_v17 }
 0x509   :  { %v6157_v55 = vpop.f32.mrb[137].mxu0 }
 0x50a   :  { %v6158_v40 = vadd.f32 %v6157_v55, %v6156_v26  ;;  %v6159_v12 = vpop.f32.mrb[138].mxu0  ;;  %v2782_v55 = vadd.f32 %v2781_v38, %v9884_v61  ;;  %v9892_v14 = vadd.f32 %v7339_v20, %v9781_v32 }
 0x50b   :  { %v6160_v34 = vpop.f32.mrb[139].mxu0 }
 0x50c   :  { %v7326_v33 = vadd.f32 %v6158_v40, %v9665_v54  ;;  %v6161_v28 = vadd.f32 %v6160_v34, %v6159_v12 }
 0x50e   :  { %v7327_v47 = vadd.f32 %v7326_v33, %v9758_v53  ;;  %v7334_v31 = vadd.f32 %v6161_v28, %v9673_v13  ;;  %v2783_v33 = vadd.f32 %v2782_v55, %v9892_v14 }
 0x510   :  { %v7335_v50 = vadd.f32 %v7334_v31, %v9762_v59  ;;  %v6162_v29 = vpop.f32.mrb[140].mxu0  ;;  %v9896_v45 = vadd.f32 %v7327_v47, %v9781_v32 }
 0x511   :  { %v6163_v48 = vpop.f32.mrb[141].mxu0 }
 0x512   :  { %v6164_v54 = vadd.f32 %v6163_v48, %v6162_v29  ;;  %v6165_v22 = vpop.f32.mrb[142].mxu0  ;;  %v2784_v28 = vadd.f32 %v2783_v33, %v9896_v45  ;;  %v9902_v20 = vadd.f32 %v7335_v50, %v9781_v32 }
 0x513   :  { %v6166_v49 = vpop.f32.mrb[143].mxu0 }
 0x514   :  { %v7346_v53 = vadd.f32 %v6164_v54, %v9687_v16  ;;  %v6167_v13 = vadd.f32 %v6166_v49, %v6165_v22  ;;  %v2785_v52 = vadd.f32 %v2784_v28, %v9902_v20 }
 0x516   :  { %v7347_v59 = vadd.f32 %v7346_v53, %v9770_v2  ;;  %v7354_v26 = vadd.f32 %v6167_v13, %v9695_v9 }
 0x518   :  { %v7355_v58 = vadd.f32 %v7354_v26, %v9774_v63  ;;  %v6168_v40 = vpop.f32.mrb[144].mxu0  ;;  %v9907_v47 = vadd.f32 %v7347_v59, %v9781_v32 }
 0x519   :  { %v6169_v12 = vpop.f32.mrb[145].mxu0 }
 0x51a   :  { %v6170_v16 = vadd.f32 %v6169_v12, %v6168_v40  ;;  %v6171_v34 = vpop.f32.mrb[146].mxu0  ;;  %v2786_v49 = vadd.f32 %v2785_v52, %v9907_v47  ;;  %v9913_v50 = vadd.f32 %v7355_v58, %v9781_v32 }
 0x51b   :  { %v6172_v62 = vpop.f32.mrb[147].mxu0 }
 0x51c   :  { %v7342_v2 = vadd.f32 %v6170_v16, %v9681_v51  ;;  %v6173_v9 = vadd.f32 %v6172_v62, %v6171_v34  ;;  %v2787_v38 = vadd.f32 %v2786_v49, %v9913_v50 }
 0x51e   :  { %v7343_v63 = vadd.f32 %v7342_v2, %v9768_v35  ;;  %v7350_v31 = vadd.f32 %v6173_v9, %v9691_v25 }
 0x520   :  { %v7351_v24 = vadd.f32 %v7350_v31, %v9772_v44  ;;  %v6174_v29 = vpop.f32.mrb[148].mxu0  ;;  %v9917_v53 = vadd.f32 %v7343_v63, %v9781_v32 }
 0x521   :  { %v6175_v48 = vpop.f32.mrb[149].mxu0 }
 0x522   :  { %v6176_v51 = vadd.f32 %v6175_v48, %v6174_v29  ;;  %v6177_v54 = vpop.f32.mrb[150].mxu0  ;;  %v2788_v40 = vadd.f32 %v2787_v38, %v9917_v53  ;;  %v9925_v58 = vadd.f32 %v7351_v24, %v9781_v32 }
 0x523   :  { %v6178_v22 = vpop.f32.mrb[151].mxu0 }
 0x524   :  { %v7362_v35 = vadd.f32 %v6176_v51, %v9705_v57  ;;  %v6179_v25 = vadd.f32 %v6178_v22, %v6177_v54  ;;  %v2789_v62 = vadd.f32 %v2788_v40, %v9925_v58 }
 0x526   :  { %v7363_v44 = vadd.f32 %v7362_v35, %v9788_v46  ;;  %v7370_v13 = vadd.f32 %v6179_v25, %v9712_v4 }
 0x528   :  { %v7371_v59 = vadd.f32 %v7370_v13, %v9799_v36  ;;  %v6180_v26 = vpop.f32.mrb[152].mxu0  ;;  %v9928_v34 = vadd.f32 %v7363_v44, %v9781_v32 }
 0x529   :  { %v6181_v55 = vpop.f32.mrb[153].mxu0 }
 0x52a   :  { %v6182_v57 = vadd.f32 %v6181_v55, %v6180_v26  ;;  %v6183_v12 = vpop.f32.mrb[154].mxu0  ;;  %v2790_v2 = vadd.f32 %v2789_v62, %v9928_v34  ;;  %v9936_v9 = vadd.f32 %v7371_v59, %v9781_v32 }
 0x52b   :  { %v6184_v16 = vpop.f32.mrb[155].mxu0 }
 0x52c   :  { %v7358_v46 = vadd.f32 %v6182_v57, %v9701_v0  ;;  %v6185_v4 = vadd.f32 %v6184_v16, %v6183_v12  ;;  %v2791_v52 = vadd.f32 %v2790_v2, %v9936_v9  ;;  %v11269_v57 = vld [vmem:[#allocation28_spill] sm:$0xff] }
 0x52e   :  { %v7359_v36 = vadd.f32 %v7358_v46, %v9786_v60  ;;  %v7366_v33 = vadd.f32 %v6185_v4, %v9709_v3 }
 0x530   :  { %v7367_v28 = vadd.f32 %v7366_v33, %v9797_v37  ;;  %v6186_v63 = vpop.f32.mrb[156].mxu0  ;;  %v9940_v24 = vadd.f32 %v7359_v36, %v9781_v32 }
 0x531   :  { %v6187_v31 = vpop.f32.mrb[157].mxu0 }
 0x532   :  { %v6188_v0 = vadd.f32 %v6187_v31, %v6186_v63  ;;  %v6189_v29 = vpop.f32.mrb[158].mxu0  ;;  %v2792_v51 = vadd.f32 %v2791_v52, %v9940_v24  ;;  %v9946_v54 = vadd.f32 %v7367_v28, %v9781_v32  ;;  %v11270_v31 = vld [vmem:[#allocation32_spill] sm:$0xff]  ;;  %v11276_v52 = vld [vmem:[#allocation46_spill] sm:$0xff] }
 0x533   :  { %v6190_v48 = vpop.f32.mrb[159].mxu0 }
 0x534   :  { %v7378_v60 = vadd.f32 %v6188_v0, %v9723_v8  ;;  %v6191_v3 = vadd.f32 %v6190_v48, %v6189_v29  ;;  %v2793_v13 = vadd.f32 %v2792_v51, %v9946_v54  ;;  %v11271_v0 = vld [vmem:[#allocation31_spill] sm:$0xff]  ;;  %v11273_v29 = vld [vmem:[#allocation41_spill] sm:$0xff] }
 0x535   :  { %v11275_v48 = vld [vmem:[#allocation45_spill] sm:$0xff] }
 0x536   :  { %v7379_v37 = vadd.f32 %v7378_v60, %v9816_v21  ;;  %v7386_v22 = vadd.f32 %v6191_v3, %v9731_v6  ;;  %v11277_v60 = vld [vmem:[#allocation47_spill] sm:$0xff]  ;;  %v11278_v3 = vld [vmem:[#allocation26_spill] sm:$0xff]  ;;  %v11279_v51 = vld [vmem:[#allocation29_spill] sm:$0xff] }
 0x538   :  { %v9951_v49 = vadd.f32 %v7379_v37, %v9781_v32  ;;  %v7387_v35 = vadd.f32 %v7386_v22, %v9821_v56  ;;  %v6192_v25 = vpop.f32.mrb[160].mxu0  ;;  %v7700_v37 = vld [vmem:[#allocation14 + $0x140] sm:$0xff]  }
 0x539   :  { %v6193_v44 = vpop.f32.mrb[161].mxu0  ;;  %6972 = vmatprep.subr.bf16.mxu1 %v7700_v37 }
 0x53a   :  { %v6194_v8 = vadd.f32 %v6193_v44, %v6192_v25  ;;  %v6195_v38 = vpop.f32.mrb[162].mxu0  ;;  %v2794_v26 = vadd.f32 %v2793_v13, %v9951_v49  ;;  %v9957_v55 = vadd.f32 %v7387_v35, %v9781_v32  ;;  %6973 = vmatpush3.bf16.msra.mxu1 %v7700_v37  ;;  %v11280_v25 = vld [vmem:[#allocation24_spill] sm:$0xff] }
 0x53b   :  { %v6196_v59 = vpop.f32.mrb[163].mxu0 }
 0x53c   :  { %v7374_v21 = vadd.f32 %v6194_v8, %v9717_v19  ;;  %v6197_v6 = vadd.f32 %v6196_v59, %v6195_v38  ;;  %v2795_v56 = vadd.f32 %v2794_v26, %v9957_v55  ;;  %v11281_v8 = vld [vmem:[#allocation27_spill] sm:$0xff] }
 0x53d   :  { %v11282_v59 = vld [vmem:[#allocation39_spill] sm:$0xff] }
 0x53e   :  { %v7375_v40 = vadd.f32 %v7374_v21, %v9814_v7  ;;  %v7382_v12 = vadd.f32 %v6197_v6, %v11269_v57 }
 0x540   :  { %v9964_v16 = vadd.f32 %v7375_v40, %v9781_v32  ;;  %v7383_v46 = vadd.f32 %v7382_v12, %v9819_v10  ;;  %v11272_v10 = vmov 0.0|0.0   ;;  %v11283_v40 = vld [vmem:[#allocation35_spill] sm:$0xff] }
 0x542   :  { %v2796_v4 = vadd.f32 %v2795_v56, %v9964_v16  ;;  %v9969_v62 = vadd.f32 %v7383_v46, %v9781_v32  ;;  %v11274_v32 = vld [vmem:[#allocation44_spill] sm:$0xff] }
 0x544   :  { %v2797_v36 = vadd.f32 %v2796_v4, %v9969_v62 }
 0x546   :  { %v2798_v19 = vrot.slane %v2797_v36, 4 }
 0x548   :  { %v2799_v33 = vadd.f32 %v2798_v19, %v2797_v36 }
 0x54a   :  { %v2800_v2 = vrot.slane %v2799_v33, 2 }
 0x54c   :  { %v2801_v7 = vadd.f32 %v2800_v2, %v2799_v33 }
 0x54e   :  { %v2802_v28 = vrot.slane %v2801_v7, 1 }
 0x550   :  { %v2803_v63 = vadd.f32 %v2802_v28, %v2801_v7 }
 0x552   :  { %6935 = vmatmul.mubr.f32.vlgmr.msra.gmra.mrb[2].mxu0 %v2803_v63 }
 0x553   :  { %7238 = vmatpush3.bf16.msra.mxu0 %v11270_v31  ;;  %6969 = vmatprep.mubr.msk.f32.mxu0 %vm8367_vm0, %v11271_v0 }
 0x554   :  { %7239 = vmatprep.subr.bf16.mxu0 %v11272_v10 }
 0x557   :  { %7241 = vmatpush3.bf16.msra.mxu0 %v11273_v29 }
 0x558   :  { %7242 = vmatprep.subr.bf16.mxu0 %v11272_v10 }
 0x55b   :  { %7244 = vmatpush3.bf16.msra.mxu0 %v11274_v32 }
 0x55c   :  { %7245 = vmatprep.subr.bf16.mxu0 %v11272_v10 }
 0x55f   :  { %7247 = vmatpush3.bf16.msra.mxu0 %v11275_v48 }
 0x560   :  { %7248 = vmatprep.subr.bf16.mxu0 %v11272_v10 }
 0x563   :  { %7250 = vmatpush3.bf16.msra.mxu0 %v11276_v52 }
 0x564   :  { %7251 = vmatprep.subr.bf16.mxu0 %v11272_v10 }
 0x567   :  { %7253 = vmatpush3.bf16.msra.mxu0 %v11277_v60 }
 0x568   :  { %7254 = vmatprep.subr.bf16.mxu0 %v11272_v10 }
 0x56b   :  { %7256 = vmatpush3.bf16.msra.mxu0 %v11278_v3 }
 0x56c   :  { %7257 = vmatprep.subr.bf16.mxu0 %v11272_v10 }
 0x56f   :  { %7259 = vmatpush3.bf16.msra.mxu0 %v11279_v51 }
 0x625   :  { %v2870_v22 = vpop.f32.mrb[2].mxu0 }
 0x626   :  { %v6936_v35 = vpop.f32.mrb[3].mxu0  ;;  %v9990_v44 = vrot.slane %v2870_v22, %v11280_v25 }
 0x628   :  { %v9994_v13 = vsub.f32 %v9792_v15, %v9990_v44  ;;  %v9998_v38 = vsub.f32 %v11281_v8, %v9990_v44  ;;  %v10002_v26 = vsub.f32 %v11282_v59, %v9990_v44  ;;  %v10010_v57 = vsub.f32 %v11283_v40, %v9990_v44 }
 0x629   :  { %v10014_v15 = vsub.f32 %v9811_v5, %v9990_v44  ;;  %v10020_v46 = vsub.f32 %v9825_v43, %v9990_v44  ;;  %v10026_v19 = vsub.f32 %v9829_v42, %v9990_v44  ;;  %v10032_v2 = vsub.f32 %v9837_v11, %v9990_v44 }
 0x62a   :  { %v2910_v21 = vmul.f32 %v9994_v13, %v9994_v13  ;;  %v2911_v6 = vmul.f32 %v9998_v38, %v9998_v38  ;;  %v2912_v12 = vmul.f32 %v10002_v26, %v10002_v26  ;;  %v2913_v4 = vmul.f32 %v10010_v57, %v10010_v57 }
 0x62b   :  { %v2914_v5 = vmul.f32 %v10014_v15, %v10014_v15  ;;  %v2915_v43 = vmul.f32 %v10020_v46, %v10020_v46  ;;  %v10038_v28 = vsub.f32 %v9840_v18, %v9990_v44  ;;  %v2916_v42 = vmul.f32 %v10026_v19, %v10026_v19 }
 0x62c   :  { %v2942_v56 = vadd.f32 %v2911_v6, %v2910_v21  ;;  %v10044_v31 = vsub.f32 %v9848_v41, %v9990_v44  ;;  %v2917_v11 = vmul.f32 %v10032_v2, %v10032_v2  ;;  %v10050_v10 = vsub.f32 %v9852_v23, %v9990_v44 }
 0x62d   :  { %v2918_v18 = vmul.f32 %v10038_v28, %v10038_v28  ;;  %v10056_v32 = vsub.f32 %v9858_v1, %v9990_v44  ;;  %v10062_v52 = vsub.f32 %v9863_v27, %v9990_v44  ;;  %v10068_v3 = vsub.f32 %v9869_v39, %v9990_v44 }
 0x62e   :  { %v2943_v36 = vadd.f32 %v2942_v56, %v2912_v12  ;;  %v2919_v41 = vmul.f32 %v10044_v31, %v10044_v31  ;;  %v2920_v23 = vmul.f32 %v10050_v10, %v10050_v10  ;;  %v10074_v37 = vsub.f32 %v9873_v30, %v9990_v44 }
 0x62f   :  { %v2921_v1 = vmul.f32 %v10056_v32, %v10056_v32  ;;  %v2922_v27 = vmul.f32 %v10062_v52, %v10062_v52  ;;  %v10080_v35 = vsub.f32 %v9881_v17, %v9990_v44  ;;  %v2923_v39 = vmul.f32 %v10068_v3, %v10068_v3 }
 0x630   :  { %v2944_v33 = vadd.f32 %v2943_v36, %v2913_v4  ;;  %v10086_v59 = vsub.f32 %v9884_v61, %v9990_v44  ;;  %v2924_v30 = vmul.f32 %v10074_v37, %v10074_v37  ;;  %v10092_v6 = vsub.f32 %v9892_v14, %v9990_v44 }
 0x631   :  { %v2925_v17 = vmul.f32 %v10080_v35, %v10080_v35  ;;  %v10098_v12 = vsub.f32 %v9896_v45, %v9990_v44  ;;  %v10104_v4 = vsub.f32 %v9902_v20, %v9990_v44 }
 0x632   :  { %v2945_v7 = vadd.f32 %v2944_v33, %v2914_v5  ;;  %v2926_v61 = vmul.f32 %v10086_v59, %v10086_v59  ;;  %v2927_v14 = vmul.f32 %v10092_v6, %v10092_v6  ;;  %v10110_v5 = vsub.f32 %v9907_v47, %v9990_v44 }
 0x633   :  { %v2928_v45 = vmul.f32 %v10098_v12, %v10098_v12  ;;  %v2929_v20 = vmul.f32 %v10104_v4, %v10104_v4 }
 0x634   :  { %v2946_v63 = vadd.f32 %v2945_v7, %v2915_v43  ;;  %v10116_v43 = vsub.f32 %v9913_v50, %v9990_v44  ;;  %v2930_v47 = vmul.f32 %v10110_v5, %v10110_v5 }
 0x636   :  { %v2947_v0 = vadd.f32 %v2946_v63, %v2916_v42  ;;  %v10122_v42 = vsub.f32 %v9917_v53, %v9990_v44  ;;  %v2931_v50 = vmul.f32 %v10116_v43, %v10116_v43 }
 0x638   :  { %v2948_v29 = vadd.f32 %v2947_v0, %v2917_v11  ;;  %v10128_v11 = vsub.f32 %v9925_v58, %v9990_v44  ;;  %v2932_v53 = vmul.f32 %v10122_v42, %v10122_v42 }
 0x63a   :  { %v2949_v48 = vadd.f32 %v2948_v29, %v2918_v18  ;;  %v10134_v18 = vsub.f32 %v9928_v34, %v9990_v44  ;;  %v2933_v58 = vmul.f32 %v10128_v11, %v10128_v11 }
 0x63c   :  { %v2950_v60 = vadd.f32 %v2949_v48, %v2919_v41  ;;  %v10140_v41 = vsub.f32 %v9936_v9, %v9990_v44  ;;  %v2934_v34 = vmul.f32 %v10134_v18, %v10134_v18 }
 0x63e   :  { %v2951_v51 = vadd.f32 %v2950_v60, %v2920_v23  ;;  %v10146_v23 = vsub.f32 %v9940_v24, %v9990_v44  ;;  %v2935_v9 = vmul.f32 %v10140_v41, %v10140_v41 }
 0x640   :  { %v2952_v22 = vadd.f32 %v2951_v51, %v2921_v1  ;;  %v10152_v1 = vsub.f32 %v9946_v54, %v9990_v44  ;;  %v2936_v24 = vmul.f32 %v10146_v23, %v10146_v23 }
 0x642   :  { %v2953_v8 = vadd.f32 %v2952_v22, %v2922_v27  ;;  %v10158_v27 = vsub.f32 %v9951_v49, %v9990_v44  ;;  %v2937_v54 = vmul.f32 %v10152_v1, %v10152_v1 }
 0x644   :  { %v2954_v21 = vadd.f32 %v2953_v8, %v2923_v39  ;;  %v10164_v39 = vsub.f32 %v9957_v55, %v9990_v44  ;;  %v2938_v49 = vmul.f32 %v10158_v27, %v10158_v27 }
 0x646   :  { %v2955_v40 = vadd.f32 %v2954_v21, %v2924_v30  ;;  %v10170_v30 = vsub.f32 %v9964_v16, %v9990_v44  ;;  %v2939_v55 = vmul.f32 %v10164_v39, %v10164_v39 }
 0x648   :  { %v2956_v56 = vadd.f32 %v2955_v40, %v2925_v17  ;;  %v10176_v17 = vsub.f32 %v9969_v62, %v9990_v44  ;;  %v7701_v44 = vld [vmem:[#allocation14 + $0x148] sm:$0xff]  }
 0x649   :  { %6974 = vmatprep.subr.bf16.mxu1 %v7701_v44 }
 0x64a   :  { %v2957_v36 = vadd.f32 %v2956_v56, %v2926_v61  ;;  %v2940_v61 = vmul.f32 %v10170_v30, %v10170_v30  ;;  %v2941_v16 = vmul.f32 %v10176_v17, %v10176_v17  ;;  %6975 = vmatpush3.bf16.msra.mxu1 %v7701_v44 }
 0x64c   :  { %v2958_v33 = vadd.f32 %v2957_v36, %v2927_v14 }
 0x64e   :  { %v2959_v7 = vadd.f32 %v2958_v33, %v2928_v45 }
 0x650   :  { %v2960_v63 = vadd.f32 %v2959_v7, %v2929_v20 }
 0x652   :  { %v2961_v0 = vadd.f32 %v2960_v63, %v2930_v47  ;;  %v7702_v63 = vld [vmem:[#allocation14 + $0x150] sm:$0xff]  }
 0x653   :  { %6976 = vmatprep.subr.bf16.mxu1 %v7702_v63 }
 0x654   :  { %v2962_v29 = vadd.f32 %v2961_v0, %v2931_v50  ;;  %6977 = vmatpush3.bf16.msra.mxu1 %v7702_v63  ;;  %v7704_v50 = vld [vmem:[#allocation14 + $0x100] sm:$0xff]  }
 0x655   :  { %v7706_v0 = vld [vmem:[#allocation14 + $0xc0] sm:$0xff]   ;;  %6256 = vmatprep.subr.bf16.mxu0 %v7704_v50 }
 0x656   :  { %v2963_v48 = vadd.f32 %v2962_v29, %v2932_v53  ;;  %v7707_v53 = vld [vmem:[#allocation14 + $0x108] sm:$0xff]  }
 0x657   :  { %v7708_v29 = vld [vmem:[#allocation14 + $0xc8] sm:$0xff]  }
 0x658   :  { %v2964_v60 = vadd.f32 %v2963_v48, %v2933_v58  ;;  %v7709_v58 = vld [vmem:[#allocation14 + $0x110] sm:$0xff]   ;;  %v7703_v48 = vld [vmem:[#allocation14 + $0x158] sm:$0xff]  }
 0x659   :  { %6978 = vmatprep.subr.bf16.mxu1 %v7703_v48 }
 0x65a   :  { %v2965_v51 = vadd.f32 %v2964_v60, %v2934_v34  ;;  %v7711_v34 = vld [vmem:[#allocation14 + $0xd0] sm:$0xff]   ;;  %6979 = vmatpush3.bf16.msra.mxu1 %v7703_v48  ;;  %v7712_v60 = vld [vmem:[#allocation14 + $0x118] sm:$0xff]  }
 0x65c   :  { %v2966_v22 = vadd.f32 %v2965_v51, %v2935_v9  ;;  %v7713_v9 = vld [vmem:[#allocation14 + $0xd8] sm:$0xff]   ;;  %v7714_v51 = vld [vmem:[#allocation14 + $0x120] sm:$0xff]  }
 0x65e   :  { %v2967_v8 = vadd.f32 %v2966_v22, %v2936_v24  ;;  %v7705_v24 = vld [vmem:[#allocation14 + $0x160] sm:$0xff]  }
 0x65f   :  { %v7716_v22 = vld [vmem:[#allocation14 + $0xe0] sm:$0xff]   ;;  %6980 = vmatprep.subr.bf16.mxu1 %v7705_v24 }
 0x660   :  { %v2968_v21 = vadd.f32 %v2967_v8, %v2937_v54  ;;  %6981 = vmatpush3.bf16.msra.mxu1 %v7705_v24  ;;  %v7717_v54 = vld [vmem:[#allocation14 + $0x128] sm:$0xff]  }
 0x661   :  { %v7710_v8 = vld [vmem:[#allocation14 + $0x168] sm:$0xff]  }
 0x662   :  { %v2969_v40 = vadd.f32 %v2968_v21, %v2938_v49  ;;  %v7718_v49 = vld [vmem:[#allocation14 + $0xe8] sm:$0xff]   ;;  %v7715_v21 = vld [vmem:[#allocation14 + $0x170] sm:$0xff]   ;;  %6982 = vmatprep.subr.bf16.mxu1 %v7710_v8 }
 0x664   :  { %v2970_v56 = vadd.f32 %v2969_v40, %v2939_v55  ;;  %v7719_v55 = vld [vmem:[#allocation14 + $0x130] sm:$0xff]   ;;  %6983 = vmatpush3.bf16.msra.mxu1 %v7710_v8 }
 0x665   :  { %v7721_v40 = vld [vmem:[#allocation14 + $0xf0] sm:$0xff]   ;;  %6984 = vmatprep.subr.bf16.mxu1 %v7715_v21 }
 0x666   :  { %v2971_v14 = vadd.f32 %v2970_v56, %v2940_v61  ;;  %v7722_v61 = vld [vmem:[#allocation14 + $0x138] sm:$0xff]  }
 0x667   :  { %v7720_v56 = vld [vmem:[#allocation14 + $0x178] sm:$0xff]  }
 0x668   :  { %v2972_v36 = vadd.f32 %v2971_v14, %v2941_v16  ;;  %v7723_v16 = vld [vmem:[#allocation14 + $0xf8] sm:$0xff]   ;;  %6985 = vmatpush3.bf16.msra.mxu1 %v7715_v21  ;;  %v7724_v14 = vld [vmem:[#allocation14 + $0x40] sm:$0xff]  }
 0x669   :  { %6986 = vmatprep.subr.bf16.mxu1 %v7720_v56 }
 0x66a   :  { %v2973_v45 = vrot.slane %v2972_v36, 4 }
 0x66c   :  { %v2974_v33 = vadd.f32 %v2973_v45, %v2972_v36  ;;  %6987 = vmatpush3.bf16.msra.mxu1 %v7720_v56 }
 0x66d   :  { %6392 = vmatprep.subr.bf16.mxu1 %v7724_v14 }
 0x66e   :  { %v2975_v20 = vrot.slane %v2974_v33, 2 }
 0x670   :  { %v2976_v7 = vadd.f32 %v2975_v20, %v2974_v33 }
 0x672   :  { %v2977_v47 = vrot.slane %v2976_v7, 1 }
 0x674   :  { %v2978_v62 = vadd.f32 %v2977_v47, %v2976_v7  ;;  %v2979_v7 = vld [vmem:[%s11196_s9] sm:$0x1] }
 0x676   :  { %6970 = vmatmul.mubr.f32.vlgmr.msra.gmra.mrb[164].mxu0 %v2978_v62 }
 0x677   :  { %6257 = vmatpush3.bf16.msra.mxu0 %v7706_v0  ;;  %v10199_v0 = vld [vmem:[%s11197_s10] ss:$0 sm:$0xff] }
 0x678   :  { %6258 = vmatprep.subr.bf16.mxu0 %v7707_v53 }
 0x67b   :  { %6259 = vmatpush3.bf16.msra.mxu0 %v7708_v29 }
 0x67c   :  { %6260 = vmatprep.subr.bf16.mxu0 %v7709_v58 }
 0x67f   :  { %6261 = vmatpush3.bf16.msra.mxu0 %v7711_v34 }
 0x680   :  { %6262 = vmatprep.subr.bf16.mxu0 %v7712_v60 }
 0x683   :  { %6263 = vmatpush3.bf16.msra.mxu0 %v7713_v9 }
 0x684   :  { %6264 = vmatprep.subr.bf16.mxu0 %v7714_v51 }
 0x687   :  { %6265 = vmatpush3.bf16.msra.mxu0 %v7716_v22 }
 0x688   :  { %6266 = vmatprep.subr.bf16.mxu0 %v7717_v54 }
 0x68b   :  { %6267 = vmatpush3.bf16.msra.mxu0 %v7718_v49 }
 0x68c   :  { %6268 = vmatprep.subr.bf16.mxu0 %v7719_v55 }
 0x68f   :  { %6269 = vmatpush3.bf16.msra.mxu0 %v7721_v40 }
 0x690   :  { %6270 = vmatprep.subr.bf16.mxu0 %v7722_v61 }
 0x693   :  { %6271 = vmatpush3.bf16.msra.mxu0 %v7723_v16 }
 0x749   :  { %v3046_v36 = vpop.f32.mrb[164].mxu0 }
 0x74a   :  { %v3047_v45 = vadd.f32 1e-05, %v3046_v36  ;;  %v6971_v33 = vpop.f32.mrb[165].mxu0 }
 0x74c   :  { %7910 = vrsqrt.f32 %v3047_v45 }
 0x756   :  { %v7911_v20 = vpop.eup %7910 }
 0x757   :  { %v3051_v47 = vmul.f32 %v7911_v20, %v2979_v7 }
 0x759   :  { %v10188_v62 = vrot.slane %v3051_v47, %v11280_v25 }
 0x75b   :  { %v3058_v44 = vmul.f32 %v10188_v62, %v9994_v13  ;;  %v3059_v63 = vmul.f32 %v10188_v62, %v9998_v38  ;;  %v3060_v50 = vmul.f32 %v10188_v62, %v10002_v26  ;;  %v3061_v53 = vmul.f32 %v10188_v62, %v10010_v57 }
 0x75c   :  { %v3062_v25 = vmul.f32 %v10188_v62, %v10014_v15  ;;  %v3063_v13 = vmul.f32 %v10188_v62, %v10020_v46  ;;  %v3064_v38 = vmul.f32 %v10188_v62, %v10026_v19  ;;  %v3065_v57 = vmul.f32 %v10188_v62, %v10032_v2 }
 0x75d   :  { %v10210_v29 = vadd.f32 %v10199_v0, %v3058_v44  ;;  %v10213_v26 = vadd.f32 %v10199_v0, %v3059_v63  ;;  %v10216_v58 = vadd.f32 %v10199_v0, %v3060_v50  ;;  %v10221_v15 = vadd.f32 %v10199_v0, %v3061_v53 }
 0x75e   :  { %v3066_v46 = vmul.f32 %v10188_v62, %v10038_v28  ;;  %v10226_v19 = vadd.f32 %v10199_v0, %v3062_v25  ;;  %v3067_v48 = vmul.f32 %v10188_v62, %v10044_v31  ;;  %v3068_v34 = vmul.f32 %v10188_v62, %v10050_v10 }
 0x75f   :  { %v10233_v60 = vadd.f32 %v10199_v0, %v3063_v13  ;;  %v10236_v2 = vadd.f32 %v10199_v0, %v3064_v38  ;;  %v5667_v9 = vmul.f32 -1.442695, %v10210_v29  ;;  %v5668_v51 = vmul.f32 -1.442695, %v10213_v26 }
 0x760   :  { %v5669_v28 = vmul.f32 -1.442695, %v10216_v58  ;;  %v3069_v24 = vmul.f32 %v10188_v62, %v10056_v32  ;;  %v10244_v31 = vadd.f32 %v10199_v0, %v3065_v57  ;;  %v5670_v10 = vmul.f32 -1.442695, %v10221_v15 }
 0x761   :  { %v3070_v22 = vmul.f32 %v10188_v62, %v10062_v52  ;;  %v10250_v54 = vadd.f32 %v10199_v0, %v3066_v46  ;;  %v5671_v8 = vmul.f32 -1.442695, %v10226_v19  ;;  %7912 = vpow2.f32 %v5667_v9 }
 0x762   :  { %v3071_v49 = vmul.f32 %v10188_v62, %v10068_v3  ;;  %v10256_v21 = vadd.f32 %v10199_v0, %v3067_v48  ;;  %v5672_v32 = vmul.f32 -1.442695, %v10233_v60  ;;  %7914 = vpow2.f32 %v5668_v51 }
 0x763   :  { %v3072_v55 = vmul.f32 %v10188_v62, %v10074_v37  ;;  %v10262_v52 = vadd.f32 %v10199_v0, %v3068_v34  ;;  %v5673_v40 = vmul.f32 -1.442695, %v10236_v2  ;;  %7916 = vpow2.f32 %v5669_v28 }
 0x764   :  { %v3073_v61 = vmul.f32 %v10188_v62, %v10080_v35  ;;  %v10268_v3 = vadd.f32 %v10199_v0, %v3069_v24  ;;  %v5674_v56 = vmul.f32 -1.442695, %v10244_v31  ;;  %7918 = vpow2.f32 %v5670_v10 }
 0x765   :  { %v3074_v16 = vmul.f32 %v10188_v62, %v10086_v59  ;;  %v10274_v37 = vadd.f32 %v10199_v0, %v3070_v22  ;;  %v5675_v14 = vmul.f32 -1.442695, %v10250_v54  ;;  %7920 = vpow2.f32 %v5671_v8 }
 0x766   :  { %v3075_v36 = vmul.f32 %v10188_v62, %v10092_v6  ;;  %v10280_v35 = vadd.f32 %v10199_v0, %v3071_v49  ;;  %v5676_v45 = vmul.f32 -1.442695, %v10256_v21  ;;  %7922 = vpow2.f32 %v5672_v32 }
 0x767   :  { %v3076_v33 = vmul.f32 %v10188_v62, %v10098_v12  ;;  %v10286_v59 = vadd.f32 %v10199_v0, %v3072_v55  ;;  %v5677_v20 = vmul.f32 -1.442695, %v10262_v52  ;;  %7924 = vpow2.f32 %v5673_v40 }
 0x768   :  { %v3077_v7 = vmul.f32 %v10188_v62, %v10104_v4  ;;  %v10292_v6 = vadd.f32 %v10199_v0, %v3073_v61  ;;  %v5678_v47 = vmul.f32 -1.442695, %v10268_v3  ;;  %7926 = vpow2.f32 %v5674_v56 }
 0x769   :  { %v3078_v44 = vmul.f32 %v10188_v62, %v10110_v5  ;;  %v10298_v12 = vadd.f32 %v10199_v0, %v3074_v16  ;;  %v5679_v63 = vmul.f32 -1.442695, %v10274_v37  ;;  %7928 = vpow2.f32 %v5675_v14 }
 0x76a   :  { %v3079_v50 = vmul.f32 %v10188_v62, %v10116_v43  ;;  %v10304_v4 = vadd.f32 %v10199_v0, %v3075_v36  ;;  %v5680_v53 = vmul.f32 -1.442695, %v10280_v35  ;;  %7930 = vpow2.f32 %v5676_v45 }
 0x76b   :  { %v10307_v25 = vpop.eup %7912  ;;  %v3080_v5 = vmul.f32 %v10188_v62, %v10122_v42  ;;  %v10312_v13 = vadd.f32 %v10199_v0, %v3076_v33  ;;  %v5681_v38 = vmul.f32 -1.442695, %v10286_v59  ;;  %7932 = vpow2.f32 %v5677_v20 }
 0x76c   :  { %v10315_v57 = vpop.eup %7914  ;;  %v3081_v43 = vmul.f32 %v10188_v62, %v10128_v11  ;;  %v10320_v46 = vadd.f32 %v10199_v0, %v3077_v7  ;;  %v5682_v48 = vmul.f32 -1.442695, %v10292_v6  ;;  %7934 = vpow2.f32 %v5678_v47 }
 0x76d   :  { %v10323_v34 = vpop.eup %7916  ;;  %v3082_v42 = vmul.f32 %v10188_v62, %v10134_v18  ;;  %v10328_v9 = vadd.f32 %v10199_v0, %v3078_v44  ;;  %v5683_v51 = vmul.f32 -1.442695, %v10298_v12  ;;  %7936 = vpow2.f32 %v5679_v63 }
 0x76e   :  { %v10331_v28 = vpop.eup %7918  ;;  %v3083_v11 = vmul.f32 %v10188_v62, %v10140_v41  ;;  %v10336_v24 = vadd.f32 %v10199_v0, %v3079_v50  ;;  %v5684_v10 = vmul.f32 -1.442695, %v10304_v4  ;;  %7938 = vpow2.f32 %v5680_v53 }
 0x76f   :  { %v10339_v22 = vpop.eup %7920  ;;  %v3084_v18 = vmul.f32 %v10188_v62, %v10146_v23  ;;  %v10344_v8 = vadd.f32 %v10199_v0, %v3080_v5  ;;  %v5685_v49 = vmul.f32 -1.442695, %v10312_v13  ;;  %7940 = vpow2.f32 %v5681_v38 }
 0x770   :  { %v10347_v32 = vpop.eup %7922  ;;  %v3085_v41 = vmul.f32 %v10188_v62, %v10152_v1  ;;  %v10352_v55 = vadd.f32 %v10199_v0, %v3081_v43  ;;  %v5686_v40 = vmul.f32 -1.442695, %v10320_v46  ;;  %7942 = vpow2.f32 %v5682_v48 }
 0x771   :  { %v10355_v61 = vpop.eup %7924  ;;  %v3086_v23 = vmul.f32 %v10188_v62, %v10158_v27  ;;  %v10360_v56 = vadd.f32 %v10199_v0, %v3082_v42  ;;  %v5687_v16 = vmul.f32 -1.442695, %v10328_v9  ;;  %7944 = vpow2.f32 %v5683_v51 }
 0x772   :  { %v10363_v14 = vpop.eup %7926  ;;  %v3087_v1 = vmul.f32 %v10188_v62, %v10164_v39  ;;  %v10368_v36 = vadd.f32 %v10199_v0, %v3083_v11  ;;  %v5688_v45 = vmul.f32 -1.442695, %v10336_v24  ;;  %7946 = vpow2.f32 %v5684_v10 }
 0x773   :  { %v10371_v33 = vpop.eup %7928  ;;  %v3088_v27 = vmul.f32 %v10188_v62, %v10170_v30  ;;  %v10376_v20 = vadd.f32 %v10199_v0, %v3084_v18  ;;  %v5689_v7 = vmul.f32 -1.442695, %v10344_v8  ;;  %7948 = vpow2.f32 %v5685_v49 }
 0x774   :  { %v7931_v47 = vpop.eup %7930  ;;  %v3089_v39 = vmul.f32 %v10188_v62, %v10176_v17  ;;  %v10382_v44 = vadd.f32 %v10199_v0, %v3085_v41  ;;  %v5690_v63 = vmul.f32 -1.442695, %v10352_v55  ;;  %7950 = vpow2.f32 %v5686_v40 }
 0x775   :  { %v7933_v50 = vpop.eup %7932  ;;  %v10386_v53 = vadd.f32 %v10199_v0, %v3086_v23  ;;  %v5691_v30 = vmul.f32 -1.442695, %v10360_v56  ;;  %7952 = vpow2.f32 %v5687_v16  ;;  %v10390_v38 = vadd.f32 %v10199_v0, %v3087_v1  ;;  %v7743_v16 = vld [vmem:[#allocation14 + $0x1c0] sm:$0xff]  }
 0x776   :  { %v7935_v5 = vpop.eup %7934  ;;  %v5692_v43 = vmul.f32 -1.442695, %v10368_v36  ;;  %7954 = vpow2.f32 %v5688_v45  ;;  %v10394_v62 = vadd.f32 %v10199_v0, %v3088_v27  ;;  %v5693_v48 = vmul.f32 -1.442695, %v10376_v20  ;;  %6528 = vmatprep.subr.bf16.mxu0 %v7743_v16 }
 0x777   :  { %11284 = vst [vmem:[#allocation36_spill] sm:$0xff] %v10390_v38  ;;  %v7937_v17 = vpop.eup %7936  ;;  %7956 = vpow2.f32 %v5689_v7  ;;  %v10398_v51 = vadd.f32 %v10199_v0, %v3089_v39  ;;  %v5694_v11 = vmul.f32 -1.442695, %v10382_v44  ;;  %v5695_v18 = vmul.f32 -1.442695, %v10386_v53 }
 0x778   :  { %11285 = vst [vmem:[#allocation42_spill] sm:$0xff] %v10394_v62  ;;  %v7939_v42 = vpop.eup %7938  ;;  %7958 = vpow2.f32 %v5690_v63  ;;  %v5696_v41 = vmul.f32 -1.442695, %v10390_v38  ;;  %v5697_v23 = vmul.f32 -1.442695, %v10394_v62  ;;  %v3225_v27 = vadd.f32 1.0, %v10307_v25 }
 0x779   :  { %11286 = vst [vmem:[#allocation30_spill] sm:$0xff] %v10398_v51  ;;  %v7941_v10 = vpop.eup %7940  ;;  %7960 = vpow2.f32 %v5691_v30  ;;  %v5698_v0 = vmul.f32 -1.442695, %v10398_v51  ;;  %v3226_v39 = vadd.f32 1.0, %v10315_v57  ;;  %v3227_v30 = vadd.f32 1.0, %v10323_v34 }
 0x77a   :  { %v7943_v49 = vpop.eup %7942  ;;  %7962 = vpow2.f32 %v5692_v43  ;;  %v3231_v57 = vadd.f32 1.0, %v10355_v61  ;;  %v3232_v34 = vadd.f32 1.0, %v10363_v14  ;;  %v3236_v62 = vadd.f32 1.0, %v7935_v5 }
 0x77b   :  { %v7945_v40 = vpop.eup %7944  ;;  %7964 = vpow2.f32 %v5693_v48  ;;  %v3228_v48 = vadd.f32 1.0, %v10331_v28  ;;  %v3233_v28 = vadd.f32 1.0, %v10371_v33 }
 0x77c   :  { %v7947_v1 = vpop.eup %7946  ;;  %7966 = vpow2.f32 %v5694_v11  ;;  %v3229_v11 = vadd.f32 1.0, %v10339_v22  ;;  %v3241_v38 = vadd.f32 1.0, %v7945_v40 }
 0x77d   :  { %v7949_v45 = vpop.eup %7948  ;;  %7968 = vpow2.f32 %v5695_v18  ;;  %v3230_v18 = vadd.f32 1.0, %v10347_v32  ;;  %v3235_v32 = vadd.f32 1.0, %v7933_v50 }
 0x77e   :  { %v7951_v7 = vpop.eup %7950  ;;  %7970 = vpow2.f32 %v5696_v41 }
 0x77f   :  { %v10407_v63 = vpop.eup %7952  ;;  %7972 = vpow2.f32 %v5697_v23  ;;  %v3244_v40 = vadd.f32 1.0, %v7951_v7 }
 0x780   :  { %v7955_v43 = vpop.eup %7954  ;;  %7974 = vpow2.f32 %v5698_v0  ;;  %v3234_v0 = vadd.f32 1.0, %v7931_v47 }
 0x781   :  { %v10411_v51 = vpop.eup %7956  ;;  %7976 = vrcp.f32 %v3225_v27 }
 0x782   :  { %v7959_v25 = vpop.eup %7958  ;;  %7978 = vrcp.f32 %v3226_v39  ;;  %v3247_v7 = vadd.f32 1.0, %v10411_v51 }
 0x783   :  { %v10415_v41 = vpop.eup %7960  ;;  %7980 = vrcp.f32 %v3227_v30  ;;  %v3237_v30 = vadd.f32 1.0, %v7937_v17  ;;  %v3242_v17 = vadd.f32 1.0, %v7947_v1  ;;  %v3245_v1 = vadd.f32 1.0, %v10407_v63 }
 0x784   :  { %v7963_v23 = vpop.eup %7962  ;;  %7982 = vrcp.f32 %v3228_v48  ;;  %v3238_v48 = vadd.f32 1.0, %v7939_v42 }
 0x785   :  { %v10419_v16 = vpop.eup %7964  ;;  %7984 = vrcp.f32 %v3229_v11  ;;  %v3239_v11 = vadd.f32 1.0, %v7941_v10  ;;  %v3243_v10 = vadd.f32 1.0, %v7949_v45 }
 0x786   :  { %v7967_v22 = vpop.eup %7966  ;;  %7986 = vrcp.f32 %v3230_v18  ;;  %v3240_v18 = vadd.f32 1.0, %v7943_v49  ;;  %v3251_v51 = vadd.f32 1.0, %v10419_v16 }
 0x787   :  { %v10422_v27 = vpop.eup %7968  ;;  %7988 = vrcp.f32 %v3231_v57 }
 0x788   :  { %v7971_v39 = vpop.eup %7970  ;;  %7990 = vrcp.f32 %v3232_v34 }
 0x789   :  { %v10424_v61 = vpop.eup %7972  ;;  %7992 = vrcp.f32 %v3233_v28 }
 0x78a   :  { %v10426_v14 = vpop.eup %7974  ;;  %7994 = vrcp.f32 %v3234_v0  ;;  %v3246_v0 = vadd.f32 1.0, %v7955_v43  ;;  %v3250_v43 = vadd.f32 1.0, %v7963_v23  ;;  %v10468_v23 = vadd.f32 1.0, %v7971_v39  ;;  %v8042_v39 = vld [vmem:[#allocation6 + $0x10] sm:$0xff] }
 0x78b   :  { %v7977_v33 = vpop.eup %7976  ;;  %7996 = vrcp.f32 %v3235_v32  ;;  %v3248_v32 = vadd.f32 1.0, %v7959_v25  ;;  %v10459_v25 = vadd.f32 1.0, %v7967_v22 }
 0x78c   :  { %v7979_v47 = vpop.eup %7978  ;;  %7998 = vrcp.f32 %v3236_v62  ;;  %v3321_v50 = vmul.f32 %v7977_v33, %v10210_v29  ;;  %v10475_v33 = vadd.f32 1.0, %v10424_v61 }
 0x78d   :  { %v7981_v57 = vpop.eup %7980  ;;  %8000 = vrcp.f32 %v3237_v30  ;;  %v3322_v5 = vmul.f32 %v7979_v47, %v10213_v26 }
 0x78e   :  { %v7983_v34 = vpop.eup %7982  ;;  %8002 = vrcp.f32 %v3238_v48  ;;  %v10431_v28 = vmul.f32 %v7981_v57, %v10216_v58  ;;  %3353 = vst [vmem:[#allocation2 + $0x18] sm:$0xff] %v3321_v50 }
 0x78f   :  { %v7985_v42 = vpop.eup %7984  ;;  %8004 = vrcp.f32 %v3239_v11  ;;  %v10434_v49 = vmul.f32 %v7983_v34, %v10221_v15  ;;  %3354 = vst [vmem:[#allocation2 + $0x20] sm:$0xff] %v3322_v5  ;;  %v10436_v29 = vpack.c.bf16 %v3322_v5, %v3321_v50  ;;  %v8043_v50 = vld [vmem:[#allocation6 + $0x18] sm:$0xff]  ;;  %v8044_v5 = vld [vmem:[#allocation8 + $0x10] sm:$0xff] }
 0x790   :  { %v7987_v62 = vpop.eup %7986  ;;  %8006 = vrcp.f32 %v3240_v18  ;;  %v10439_v26 = vmul.f32 %v7985_v42, %v10226_v19  ;;  %3355 = vst [vmem:[#allocation2 + $0x28] sm:$0xff] %v10431_v28  ;;  %v8045_v42 = vld [vmem:[#allocation8 + $0x18] sm:$0xff] }
 0x791   :  { %v7989_v58 = vpop.eup %7988  ;;  %8008 = vrcp.f32 %v3241_v38  ;;  %v10444_v45 = vmul.f32 %v7987_v62, %v10233_v60  ;;  %3356 = vst [vmem:[#allocation2 + $0x30] sm:$0xff] %v10434_v49  ;;  %3892 = vmatprep.mubr.bf16.mxu0 %v10436_v29  ;;  %v3249_v38 = vadd.f32 1.0, %v10415_v41  ;;  %v10466_v41 = vadd.f32 1.0, %v10422_v27 }
 0x792   :  { %v7991_v15 = vpop.eup %7990  ;;  %8010 = vrcp.f32 %v3242_v17  ;;  %v10450_v19 = vmul.f32 %v7989_v58, %v10236_v2  ;;  %3357 = vst [vmem:[#allocation2 + $0x38] sm:$0xff] %v10439_v26 }
 0x793   :  { %v7993_v63 = vpop.eup %7992  ;;  %8012 = vrcp.f32 %v3243_v10  ;;  %v10455_v60 = vmul.f32 %v7991_v15, %v10244_v31  ;;  %3358 = vst [vmem:[#allocation2 + $0x40] sm:$0xff] %v10444_v45 }
 0x794   :  { %v7995_v30 = vpop.eup %7994  ;;  %8014 = vrcp.f32 %v3244_v40  ;;  %v10462_v2 = vmul.f32 %v7993_v63, %v10250_v54  ;;  %3359 = vst [vmem:[#allocation2 + $0x48] sm:$0xff] %v10450_v19 }
 0x795   :  { %v7997_v48 = vpop.eup %7996  ;;  %8016 = vrcp.f32 %v3245_v1  ;;  %v10471_v31 = vmul.f32 %v7995_v30, %v10256_v21  ;;  %3360 = vst [vmem:[#allocation2 + $0x50] sm:$0xff] %v10455_v60  ;;  %v3423_v16 = vld [vmem:[#allocation2 + $0x17] sm:$0xff] }
 0x796   :  { %v7999_v22 = vpop.eup %7998  ;;  %8018 = vrcp.f32 %v3246_v0  ;;  %v10478_v54 = vmul.f32 %v7997_v48, %v10262_v52  ;;  %3361 = vst [vmem:[#allocation2 + $0x58] sm:$0xff] %v10462_v2  ;;  %v3424_v27 = vld [vmem:[#allocation2 + $0x1f] sm:$0xff]  ;;  %v3459_v11 = vmul.f32 %v8042_v39, %v3423_v16  ;;  %v8046_v0 = vld [vmem:[#allocation8 + $0x20] sm:$0xff] }
 0x797   :  { %v3495_v47 = vld [vmem:[#allocation2 + $0x19] sm:$0xff]  ;;  %v8001_v18 = vpop.eup %8000  ;;  %8020 = vrcp.f32 %v3247_v7  ;;  %v10482_v21 = vmul.f32 %v7999_v22, %v10268_v3  ;;  %3362 = vst [vmem:[#allocation2 + $0x60] sm:$0xff] %v10471_v31  ;;  %v3460_v61 = vmul.f32 %v8043_v50, %v3424_v27  ;;  %v3496_v57 = vld [vmem:[#allocation2 + $0x21] sm:$0xff]  ;;  %v10491_v3 = vpack.c.bf16 %v10434_v49, %v10431_v28  ;;  %v7744_v7 = vld [vmem:[#allocation14 + $0x180] sm:$0xff]  }
 0x798   :  { %v3531_v34 = vmul.f32 %v8044_v5, %v3495_v47  ;;  %v8003_v52 = vpop.eup %8002  ;;  %8022 = vrcp.f32 %v3248_v32  ;;  %v10486_v17 = vmul.f32 %v8001_v18, %v10274_v37  ;;  %3363 = vst [vmem:[#allocation2 + $0x68] sm:$0xff] %v10478_v54  ;;  %v3532_v10 = vmul.f32 %v8045_v42, %v3496_v57  ;;  %v3497_v62 = vld [vmem:[#allocation2 + $0x29] sm:$0xff]  ;;  %v7745_v32 = vld [vmem:[#allocation14 + $0x1c8] sm:$0xff]  }
 0x799   :  { %v8005_v40 = vpop.eup %8004  ;;  %8024 = vrcp.f32 %v3249_v38  ;;  %v10494_v58 = vmul.f32 %v8003_v52, %v10280_v35  ;;  %3364 = vst [vmem:[#allocation2 + $0x70] sm:$0xff] %v10482_v21  ;;  %v10497_v1 = vpack.c.bf16 %v3460_v61, %v3459_v11  ;;  %v3498_v37 = vld [vmem:[#allocation2 + $0x31] sm:$0xff]  ;;  %v3533_v15 = vmul.f32 %v8046_v0, %v3497_v62  ;;  %v3425_v48 = vld [vmem:[#allocation2 + $0x27] sm:$0xff] }
 0x79a   :  { %v8007_v63 = vpop.eup %8006  ;;  %8026 = vrcp.f32 %v3250_v43  ;;  %v10500_v28 = vmul.f32 %v8005_v40, %v10286_v59  ;;  %3365 = vst [vmem:[#allocation2 + $0x78] sm:$0xff] %v10486_v17  ;;  %v10503_v49 = vpack.c.bf16 %v3532_v10, %v3531_v34  ;;  %v8047_v35 = vld [vmem:[#allocation8 + $0x28] sm:$0xff]  ;;  %v3426_v16 = vld [vmem:[#allocation2 + $0x2f] sm:$0xff]  ;;  %v3256_v27 = vadd.f32 1.0, %v10426_v14  ;;  %v8048_v11 = vld [vmem:[#allocation8 + $0x30] sm:$0xff] }
 0x79b   :  { %v3534_v38 = vmul.f32 %v8047_v35, %v3498_v37  ;;  %v3499_v30 = vld [vmem:[#allocation2 + $0x39] sm:$0xff]  ;;  %v8009_v22 = vpop.eup %8008  ;;  %8028 = vrcp.f32 %v3251_v51  ;;  %v10507_v39 = vmul.f32 %v8007_v63, %v10292_v6  ;;  %3366 = vst [vmem:[#allocation2 + $0x80] sm:$0xff] %v10494_v58  ;;  %3893 = vmatmul.mubr.bf16.vlgmr.msra.gmra.mrb[168].mxu0 %v10497_v1  ;;  %v7725_v59 = vld [vmem:[#allocation14] sm:$0xff]   ;;  %v3500_v43 = vld [vmem:[#allocation2 + $0x41] sm:$0xff] }
 0x79c   :  { %v3535_v47 = vmul.f32 %v8048_v11, %v3499_v30  ;;  %v8011_v18 = vpop.eup %8010  ;;  %8030 = vrcp.f32 %v10459_v25  ;;  %v10513_v50 = vmul.f32 %v8009_v22, %v10298_v12  ;;  %3367 = vst [vmem:[#allocation2 + $0x88] sm:$0xff] %v10500_v28  ;;  %6988 = vmatprep.mubr.bf16.mxu1 %v10503_v49  ;;  %3900 = vmatprep.mubr.bf16.mxu0 %v10491_v3  ;;  %v8049_v14 = vld [vmem:[#allocation8 + $0x38] sm:$0xff]  ;;  %v7726_v61 = vld [vmem:[#allocation14 + $0x48] sm:$0xff]   ;;  %v8050_v12 = vld [vmem:[#allocation6 + $0x20] sm:$0xff] }
 0x79d   :  { %v10518_v6 = vpack.c.bf16 %v3534_v38, %v3533_v15  ;;  %v3536_v51 = vmul.f32 %v8049_v14, %v3500_v43  ;;  %v8013_v57 = vpop.eup %8012  ;;  %8032 = vrcp.f32 %v10466_v41  ;;  %v10522_v5 = vmul.f32 %v8011_v18, %v10304_v4  ;;  %3368 = vst [vmem:[#allocation2 + $0x90] sm:$0xff] %v10507_v39  ;;  %v8051_v34 = vld [vmem:[#allocation6 + $0x28] sm:$0xff]  ;;  %v3501_v42 = vld [vmem:[#allocation2 + $0x49] sm:$0xff]  ;;  %6529 = vmatpush3.bf16.msra.mxu0 %v7744_v7  ;;  %v7747_v0 = vld [vmem:[#allocation14 + $0x1d0] sm:$0xff]  }
 0x79e   :  { %v3461_v25 = vmul.f32 %v8050_v12, %v3425_v48  ;;  %v3462_v52 = vmul.f32 %v8051_v34, %v3426_v16  ;;  %v3502_v10 = vld [vmem:[#allocation2 + $0x51] sm:$0xff]  ;;  %v8015_v40 = vpop.eup %8014  ;;  %8034 = vrcp.f32 %v10468_v23  ;;  %v10527_v37 = vmul.f32 %v8013_v57, %v10312_v13  ;;  %3369 = vst [vmem:[#allocation2 + $0x98] sm:$0xff] %v10513_v50  ;;  %v3503_v41 = vld [vmem:[#allocation2 + $0x59] sm:$0xff]  ;;  %6530 = vmatprep.subr.bf16.mxu0 %v7745_v32 }
 0x79f   :  { %v7746_v62 = vld [vmem:[#allocation14 + $0x188] sm:$0xff]   ;;  %6989 = vmatmul.mubr.bf16.vlgmr.msra.gmra.mrb[100].mxu1 %v10518_v6  ;;  %v10531_v4 = vpack.c.bf16 %v3536_v51, %v3535_v47  ;;  %v8017_v15 = vpop.eup %8016  ;;  %8036 = vrcp.f32 %v10475_v33  ;;  %v10535_v7 = vmul.f32 %v8015_v40, %v10320_v46  ;;  %3370 = vst [vmem:[#allocation2 + $0xa0] sm:$0xff] %v10522_v5  ;;  %v3504_v23 = vld [vmem:[#allocation2 + $0x61] sm:$0xff]  ;;  %v8052_v32 = vld [vmem:[#allocation8 + $0x40] sm:$0xff] }
 0x7a0   :  { %6393 = vmatpush3.bf16.msra.mxu1 %v7725_v59  ;;  %v7727_v13 = vld [vmem:[#allocation14 + $0x8] sm:$0xff]   ;;  %v8019_v63 = vpop.eup %8018  ;;  %8038 = vrcp.f32 %v3256_v27  ;;  %v10539_v35 = vmul.f32 %v8017_v15, %v10328_v9  ;;  %3371 = vst [vmem:[#allocation2 + $0xa8] sm:$0xff] %v10527_v37  ;;  %v3537_v33 = vmul.f32 %v8052_v32, %v3501_v42  ;;  %v7728_v30 = vld [vmem:[#allocation14 + $0x50] sm:$0xff]   ;;  %v10547_v22 = vpack.c.bf16 %v3462_v52, %v3461_v25  ;;  %v8055_v59 = vld [vmem:[#allocation8 + $0x58] sm:$0xff] }
 0x7a1   :  { %6992 = vmatprep.mubr.bf16.mxu1 %v10531_v4  ;;  %6394 = vmatprep.subr.bf16.mxu1 %v7726_v61  ;;  %v8053_v38 = vld [vmem:[#allocation8 + $0x48] sm:$0xff]  ;;  %v8021_v48 = vpop.eup %8020  ;;  %v10544_v16 = vmul.f32 %v8019_v63, %v10336_v24  ;;  %3372 = vst [vmem:[#allocation2 + $0xb0] sm:$0xff] %v10535_v7  ;;  %v8054_v9 = vld [vmem:[#allocation8 + $0x50] sm:$0xff]  ;;  %v3540_v43 = vmul.f32 %v8055_v59, %v3504_v23  ;;  %v3505_v40 = vld [vmem:[#allocation2 + $0x69] sm:$0xff] }
 0x7a2   :  { %v3538_v46 = vmul.f32 %v8053_v38, %v3502_v10  ;;  %v3539_v27 = vmul.f32 %v8054_v9, %v3503_v41  ;;  %6531 = vmatpush3.bf16.msra.mxu0 %v7746_v62  ;;  %v7748_v11 = vld [vmem:[#allocation14 + $0x190] sm:$0xff]   ;;  %v8023_v47 = vpop.eup %8022  ;;  %v10550_v18 = vmul.f32 %v8021_v48, %v10344_v8  ;;  %3373 = vst [vmem:[#allocation2 + $0xb8] sm:$0xff] %v10539_v35  ;;  %v3427_v14 = vld [vmem:[#allocation2 + $0x37] sm:$0xff]  ;;  %v7750_v63 = vld [vmem:[#allocation14 + $0x198] sm:$0xff]  }
 0x7a3   :  { %v10555_v24 = vpack.c.bf16 %v10444_v45, %v10439_v26  ;;  %v3428_v51 = vld [vmem:[#allocation2 + $0x3f] sm:$0xff]  ;;  %6532 = vmatprep.subr.bf16.mxu0 %v7747_v0  ;;  %v8025_v61 = vpop.eup %8024  ;;  %v10558_v57 = vmul.f32 %v8023_v47, %v10352_v55  ;;  %3374 = vst [vmem:[#allocation2 + $0xc0] sm:$0xff] %v10544_v16  ;;  %3901 = vmatmul.mubr.bf16.gmra.mrb[172].mxu0 %v10547_v22  ;;  %v7730_v45 = vld [vmem:[#allocation14 + $0x58] sm:$0xff]   ;;  %v3506_v41 = vld [vmem:[#allocation2 + $0x71] sm:$0xff] }
 0x7a4   :  { %6395 = vmatpush3.bf16.msra.mxu1 %v7727_v13  ;;  %v7729_v8 = vld [vmem:[#allocation14 + $0x10] sm:$0xff]   ;;  %v8027_v12 = vpop.eup %8026  ;;  %v10563_v25 = vmul.f32 %v8025_v61, %v10360_v56  ;;  %3375 = vst [vmem:[#allocation2 + $0xc8] sm:$0xff] %v10550_v18  ;;  %v10567_v26 = vpack.c.bf16 %v3538_v46, %v3537_v33  ;;  %v10573_v52 = vpack.c.bf16 %v3540_v43, %v3539_v27  ;;  %v8057_v56 = vld [vmem:[#allocation6 + $0x38] sm:$0xff]  ;;  %v8059_v9 = vld [vmem:[#allocation8 + $0x68] sm:$0xff] }
 0x7a5   :  { %3908 = vmatprep.mubr.bf16.mxu0 %v10555_v24  ;;  %6396 = vmatprep.subr.bf16.mxu1 %v7728_v30  ;;  %v8029_v55 = vpop.eup %8028  ;;  %v10570_v34 = vmul.f32 %v8027_v12, %v10368_v36  ;;  %3376 = vst [vmem:[#allocation2 + $0xd0] sm:$0xff] %v10558_v57  ;;  %v8056_v42 = vld [vmem:[#allocation6 + $0x30] sm:$0xff]  ;;  %v3464_v62 = vmul.f32 %v8057_v56, %v3428_v51  ;;  %v7749_v0 = vld [vmem:[#allocation14 + $0x1d8] sm:$0xff]   ;;  %v8058_v30 = vld [vmem:[#allocation8 + $0x60] sm:$0xff] }
 0x7a6   :  { %v3463_v10 = vmul.f32 %v8056_v42, %v3427_v14  ;;  %6533 = vmatpush3.bf16.msra.mxu0 %v7748_v11  ;;  %v8031_v15 = vpop.eup %8030  ;;  %v10576_v13 = vmul.f32 %v8029_v55, %v10376_v20  ;;  %3377 = vst [vmem:[#allocation2 + $0xd8] sm:$0xff] %v10563_v25  ;;  %v3507_v36 = vld [vmem:[#allocation2 + $0x79] sm:$0xff]  ;;  %v3508_v23 = vld [vmem:[#allocation2 + $0x81] sm:$0xff]  ;;  %v3541_v48 = vmul.f32 %v8058_v30, %v3505_v40  ;;  %v7732_v59 = vld [vmem:[#allocation14 + $0x60] sm:$0xff]  }
 0x7a7   :  { %6993 = vmatmul.mubr.bf16.gmra.mrb[104].mxu1 %v10567_v26  ;;  %v8033_v32 = vpop.eup %8032  ;;  %v10581_v33 = vmul.f32 %v8031_v15, %v10382_v44  ;;  %3378 = vst [vmem:[#allocation2 + $0xe0] sm:$0xff] %v10570_v34  ;;  %v7731_v38 = vld [vmem:[#allocation14 + $0x18] sm:$0xff]   ;;  %v3542_v27 = vmul.f32 %v8059_v9, %v3506_v41  ;;  %v11287_v43 = vld [vmem:[#allocation36_spill] sm:$0xff]  ;;  %v8060_v14 = vld [vmem:[#allocation8 + $0x70] sm:$0xff]  ;;  %6534 = vmatprep.subr.bf16.mxu0 %v7749_v0 }
 0x7a8   :  { %6996 = vmatprep.mubr.bf16.mxu1 %v10573_v52  ;;  %6397 = vmatpush3.bf16.msra.mxu1 %v7729_v8  ;;  %v8035_v46 = vpop.eup %8034  ;;  %v10586_v20 = vmul.f32 %v8033_v32, %v10386_v53  ;;  %3379 = vst [vmem:[#allocation2 + $0xe8] sm:$0xff] %v10576_v13  ;;  %v10593_v47 = vpack.c.bf16 %v3464_v62, %v3463_v10  ;;  %v8061_v53 = vld [vmem:[#allocation8 + $0x78] sm:$0xff]  ;;  %v7752_v8 = vld [vmem:[#allocation14 + $0x1e0] sm:$0xff]   ;;  %v11288_v55 = vld [vmem:[#allocation42_spill] sm:$0xff] }
 0x7a9   :  { %6398 = vmatprep.subr.bf16.mxu1 %v7730_v45  ;;  %v8037_v44 = vpop.eup %8036  ;;  %v10590_v11 = vmul.f32 %v8035_v46, %v11287_v43  ;;  %3380 = vst [vmem:[#allocation2 + $0xf0] sm:$0xff] %v10581_v33  ;;  %v3543_v51 = vmul.f32 %v8060_v14, %v3507_v36  ;;  %v3544_v61 = vmul.f32 %v8061_v53, %v3508_v23  ;;  %v3429_v56 = vld [vmem:[#allocation2 + $0x47] sm:$0xff]  ;;  %v3430_v40 = vld [vmem:[#allocation2 + $0x4f] sm:$0xff]  ;;  %v8063_v23 = vld [vmem:[#allocation6 + $0x48] sm:$0xff] }
 0x7aa   :  { %v8039_v12 = vpop.eup %8038  ;;  %v10596_v42 = vmul.f32 %v8037_v44, %v11288_v55  ;;  %3381 = vst [vmem:[#allocation2 + $0xf8] sm:$0xff] %v10586_v20  ;;  %v10601_v45 = vpack.c.bf16 %v10455_v60, %v10450_v19  ;;  %6535 = vmatpush3.bf16.msra.mxu0 %v7750_v63  ;;  %v11289_v10 = vld [vmem:[#allocation30_spill] sm:$0xff]  ;;  %v7733_v41 = vld [vmem:[#allocation14 + $0x20] sm:$0xff]   ;;  %v10610_v0 = vpack.c.bf16 %v3542_v27, %v3541_v48  ;;  %v7734_v19 = vld [vmem:[#allocation14 + $0x68] sm:$0xff]  }
 0x7ab   :  { %v10604_v62 = vmul.f32 %v8039_v12, %v11289_v10  ;;  %3382 = vst [vmem:[#allocation2 + $0x100] sm:$0xff] %v10590_v11  ;;  %3909 = vmatmul.mubr.bf16.gmra.mrb[176].mxu0 %v10593_v47  ;;  %v10613_v60 = vpack.c.bf16 %v3544_v61, %v3543_v51  ;;  %v8062_v15 = vld [vmem:[#allocation6 + $0x40] sm:$0xff]  ;;  %v3466_v63 = vmul.f32 %v8063_v23, %v3430_v40  ;;  %v3511_v30 = vld [vmem:[#allocation2 + $0x99] sm:$0xff]  ;;  %v3512_v9 = vld [vmem:[#allocation2 + $0xa1] sm:$0xff] }
 0x7ac   :  { %6399 = vmatpush3.bf16.msra.mxu1 %v7731_v38  ;;  %3383 = vst [vmem:[#allocation2 + $0x108] sm:$0xff] %v10596_v42  ;;  %3916 = vmatprep.mubr.bf16.mxu0 %v10601_v45  ;;  %v3465_v36 = vmul.f32 %v8062_v15, %v3429_v56  ;;  %v3509_v32 = vld [vmem:[#allocation2 + $0x89] sm:$0xff]  ;;  %v3510_v46 = vld [vmem:[#allocation2 + $0x91] sm:$0xff]  ;;  %v7736_v51 = vld [vmem:[#allocation14 + $0x70] sm:$0xff]   ;;  %v10621_v40 = vpack.c.bf16 %v10471_v31, %v10462_v2 }
 0x7ad   :  { %6400 = vmatprep.subr.bf16.mxu1 %v7732_v59  ;;  %3384 = vst [vmem:[#allocation2 + $0x110] sm:$0xff] %v10604_v62  ;;  %6536 = vmatprep.subr.bf16.mxu0 %v7752_v8  ;;  %v7753_v38 = vld [vmem:[#allocation14 + $0x1a0] sm:$0xff]   ;;  %v7754_v48 = vld [vmem:[#allocation14 + $0x1e8] sm:$0xff]   ;;  %v8066_v61 = vld [vmem:[#allocation8 + $0x90] sm:$0xff]  ;;  %v10625_v15 = vpack.c.bf16 %v10544_v16, %v10539_v35  ;;  %v10635_v16 = vpack.c.bf16 %v10558_v57, %v10550_v18 }
 0x7ae   :  { %v7735_v27 = vld [vmem:[#allocation14 + $0x28] sm:$0xff]   ;;  %v8064_v59 = vld [vmem:[#allocation8 + $0x80] sm:$0xff]  ;;  %v10617_v53 = vpack.c.bf16 %v3466_v63, %v3465_v36  ;;  %v3547_v8 = vmul.f32 %v8066_v61, %v3511_v30  ;;  %v8067_v12 = vld [vmem:[#allocation8 + $0x98] sm:$0xff]  ;;  %6537 = vmatpush3.bf16.msra.mxu0 %v7753_v38  ;;  %v10647_v61 = vpack.c.bf16 %v10581_v33, %v10576_v13  ;;  %v10661_v13 = vpack.c.bf16 %v10604_v62, %v10596_v42 }
 0x7af   :  { %6997 = vmatmul.mubr.bf16.gmra.mrb[108].mxu1 %v10610_v0  ;;  %v3545_v44 = vmul.f32 %v8064_v59, %v3509_v32  ;;  %v8065_v43 = vld [vmem:[#allocation8 + $0x88] sm:$0xff]  ;;  %v3548_v55 = vmul.f32 %v8067_v12, %v3512_v9  ;;  %6538 = vmatprep.subr.bf16.mxu0 %v7754_v48  ;;  %v7738_v23 = vld [vmem:[#allocation14 + $0x78] sm:$0xff]   ;;  %v8068_v2 = vld [vmem:[#allocation6 + $0x50] sm:$0xff] }
 0x7b0   :  { %7000 = vmatprep.mubr.bf16.mxu1 %v10613_v60  ;;  %6401 = vmatpush3.bf16.msra.mxu1 %v7733_v41  ;;  %v3546_v14 = vmul.f32 %v8065_v43, %v3510_v46  ;;  %v7755_v56 = vld [vmem:[#allocation14 + $0x1a8] sm:$0xff]   ;;  %v8069_v32 = vld [vmem:[#allocation6 + $0x58] sm:$0xff]  ;;  %v7756_v30 = vld [vmem:[#allocation14 + $0x1f0] sm:$0xff]  }
 0x7b1   :  { %6402 = vmatprep.subr.bf16.mxu1 %v7734_v19  ;;  %v3431_v10 = vld [vmem:[#allocation2 + $0x57] sm:$0xff]  ;;  %v3432_v41 = vld [vmem:[#allocation2 + $0x5f] sm:$0xff]  ;;  %v10631_v63 = vpack.c.bf16 %v3548_v55, %v3547_v8  ;;  %v3513_v38 = vld [vmem:[#allocation2 + $0xa9] sm:$0xff] }
 0x7b2   :  { %v7737_v19 = vld [vmem:[#allocation14 + $0x30] sm:$0xff]   ;;  %v10629_v36 = vpack.c.bf16 %v3546_v14, %v3545_v44  ;;  %v3467_v31 = vmul.f32 %v8068_v2, %v3431_v10  ;;  %v3468_v46 = vmul.f32 %v8069_v32, %v3432_v41  ;;  %v3514_v35 = vld [vmem:[#allocation2 + $0xb1] sm:$0xff]  ;;  %6539 = vmatpush3.bf16.msra.mxu0 %v7755_v56  ;;  %v7739_v44 = vld [vmem:[#allocation14 + $0x38] sm:$0xff]   ;;  %v10653_v56 = vpack.c.bf16 %v10590_v11, %v10586_v20 }
 0x7b3   :  { %3917 = vmatmul.mubr.bf16.gmra.mrb[180].mxu0 %v10617_v53  ;;  %v3515_v9 = vld [vmem:[#allocation2 + $0xb9] sm:$0xff]  ;;  %v3516_v48 = vld [vmem:[#allocation2 + $0xc1] sm:$0xff]  ;;  %v8070_v43 = vld [vmem:[#allocation8 + $0xa0] sm:$0xff]  ;;  %6540 = vmatprep.subr.bf16.mxu0 %v7756_v30  ;;  %v10657_v41 = vpack.c.bf16 %v10482_v21, %v10478_v54 }
 0x7b4   :  { %6403 = vmatpush3.bf16.msra.mxu1 %v7735_v27  ;;  %3924 = vmatprep.mubr.bf16.mxu0 %v10621_v40  ;;  %v10640_v27 = vpack.c.bf16 %v10570_v34, %v10563_v25  ;;  %v7757_v59 = vld [vmem:[#allocation14 + $0x1b0] sm:$0xff]   ;;  %v3549_v14 = vmul.f32 %v8070_v43, %v3513_v38  ;;  %v10643_v57 = vld [vmem:[#allocation14 + $0x80] sm:$0xff]   ;;  %v10649_v8 = vpack.c.bf16 %v3468_v46, %v3467_v31  ;;  %v8073_v12 = vld [vmem:[#allocation8 + $0xb8] sm:$0xff] }
 0x7b5   :  { %6404 = vmatprep.subr.bf16.mxu1 %v7736_v51  ;;  %v8071_v51 = vld [vmem:[#allocation8 + $0xa8] sm:$0xff]  ;;  %v8072_v25 = vld [vmem:[#allocation8 + $0xb0] sm:$0xff]  ;;  %v3552_v55 = vmul.f32 %v8073_v12, %v3516_v48  ;;  %v7758_v10 = vld [vmem:[#allocation14 + $0x1f8] sm:$0xff]  }
 0x7b6   :  { %v3550_v18 = vmul.f32 %v8071_v51, %v3514_v35  ;;  %v3551_v34 = vmul.f32 %v8072_v25, %v3515_v9  ;;  %6541 = vmatpush3.bf16.msra.mxu0 %v7757_v59  ;;  %v7759_v33 = vld [vmem:[#allocation14 + $0x1b8] sm:$0xff]   ;;  %v8074_v54 = vld [vmem:[#allocation6 + $0x60] sm:$0xff]  ;;  %v8075_v2 = vld [vmem:[#allocation6 + $0x68] sm:$0xff]  ;;  %v10676_v51 = vpack.c.bf16 %v10494_v58, %v10486_v17 }
 0x7b7   :  { %7001 = vmatmul.mubr.bf16.gmra.mrb[112].mxu1 %v10629_v36  ;;  %v3517_v32 = vld [vmem:[#allocation2 + $0xc9] sm:$0xff]  ;;  %v3518_v42 = vld [vmem:[#allocation2 + $0xd1] sm:$0xff]  ;;  %6542 = vmatprep.subr.bf16.mxu0 %v7758_v10  ;;  %v3519_v62 = vld [vmem:[#allocation2 + $0xd9] sm:$0xff] }
 0x7b8   :  { %7004 = vmatprep.mubr.bf16.mxu1 %v10631_v63  ;;  %6405 = vmatpush3.bf16.msra.mxu1 %v7737_v19  ;;  %v3433_v19 = vld [vmem:[#allocation2 + $0x67] sm:$0xff]  ;;  %v10665_v20 = vpack.c.bf16 %v3550_v18, %v3549_v14  ;;  %v10668_v11 = vpack.c.bf16 %v3552_v55, %v3551_v34  ;;  %v8076_v38 = vld [vmem:[#allocation8 + $0xc0] sm:$0xff]  ;;  %v8077_v30 = vld [vmem:[#allocation8 + $0xc8] sm:$0xff] }
 0x7b9   :  { %6406 = vmatprep.subr.bf16.mxu1 %v7738_v23  ;;  %v3434_v23 = vld [vmem:[#allocation2 + $0x6f] sm:$0xff]  ;;  %v3469_v21 = vmul.f32 %v8074_v54, %v3433_v19  ;;  %v3520_v46 = vld [vmem:[#allocation2 + $0xe1] sm:$0xff]  ;;  %v3553_v35 = vmul.f32 %v8076_v38, %v3517_v32  ;;  %v3554_v9 = vmul.f32 %v8077_v30, %v3518_v42  ;;  %v3435_v18 = vld [vmem:[#allocation2 + $0x77] sm:$0xff]  ;;  %v10690_v30 = vpack.c.bf16 %v10507_v39, %v10500_v28 }
 0x7ba   :  { %v3470_v31 = vmul.f32 %v8075_v2, %v3434_v23  ;;  %6543 = vmatpush3.bf16.msra.mxu0 %v7759_v33  ;;  %v8078_v59 = vld [vmem:[#allocation8 + $0xd0] sm:$0xff]  ;;  %v8079_v43 = vld [vmem:[#allocation8 + $0xd8] sm:$0xff]  ;;  %v3522_v54 = vld [vmem:[#allocation2 + $0xf1] sm:$0xff] }
 0x7bb   :  { %3925 = vmatmul.mubr.bf16.gmra.mrb[184].mxu0 %v10649_v8  ;;  %v3556_v14 = vmul.f32 %v8079_v43, %v3520_v46  ;;  %v3436_v25 = vld [vmem:[#allocation2 + $0x7f] sm:$0xff]  ;;  %v10680_v34 = vpack.c.bf16 %v3554_v9, %v3553_v35  ;;  %v8081_v19 = vld [vmem:[#allocation6 + $0x78] sm:$0xff]  ;;  %v8088_v28 = vld [vmem:[#allocation8 + $0x100] sm:$0xff] }
 0x7bc   :  { %6407 = vmatpush3.bf16.msra.mxu1 %v7739_v44  ;;  %3932 = vmatprep.mubr.bf16.mxu0 %v10657_v41  ;;  %v10672_v48 = vpack.c.bf16 %v3470_v31, %v3469_v21  ;;  %v3555_v44 = vmul.f32 %v8078_v59, %v3519_v62  ;;  %v8080_v55 = vld [vmem:[#allocation6 + $0x70] sm:$0xff]  ;;  %v3472_v23 = vmul.f32 %v8081_v19, %v3436_v25  ;;  %v3521_v33 = vld [vmem:[#allocation2 + $0xe9] sm:$0xff]  ;;  %v8083_v31 = vld [vmem:[#allocation8 + $0xe8] sm:$0xff] }
 0x7bd   :  { %7020 = vmatprep.subr.bf16.mxu1 %v10643_v57  ;;  %v3471_v10 = vmul.f32 %v8080_v55, %v3435_v18  ;;  %v3523_v17 = vld [vmem:[#allocation2 + $0xf9] sm:$0xff]  ;;  %v3524_v58 = vld [vmem:[#allocation2 + $0x101] sm:$0xff]  ;;  %v8082_v21 = vld [vmem:[#allocation8 + $0xe0] sm:$0xff]  ;;  %v3558_v32 = vmul.f32 %v8083_v31, %v3522_v54 }
 0x7be   :  { %v10682_v12 = vpack.c.bf16 %v3556_v14, %v3555_v44  ;;  %v3557_v2 = vmul.f32 %v8082_v21, %v3521_v33  ;;  %v8084_v62 = vld [vmem:[#allocation8 + $0xf0] sm:$0xff]  ;;  %v8085_v38 = vld [vmem:[#allocation8 + $0xf8] sm:$0xff]  ;;  %v8086_v14 = vld [vmem:[#allocation6 + $0x80] sm:$0xff] }
 0x7bf   :  { %7005 = vmatmul.mubr.bf16.gmra.mrb[116].mxu1 %v10665_v20  ;;  %v10686_v42 = vpack.c.bf16 %v3472_v23, %v3471_v10  ;;  %v3559_v46 = vmul.f32 %v8084_v62, %v3523_v17  ;;  %v3560_v35 = vmul.f32 %v8085_v38, %v3524_v58  ;;  %v3437_v9 = vld [vmem:[#allocation2 + $0x87] sm:$0xff]  ;;  %v3438_v59 = vld [vmem:[#allocation2 + $0x8f] sm:$0xff]  ;;  %v8087_v25 = vld [vmem:[#allocation6 + $0x88] sm:$0xff]  ;;  %v10704_v17 = vpack.c.bf16 %v10522_v5, %v10513_v50 }
 0x7c0   :  { %7008 = vmatprep.mubr.bf16.mxu1 %v10668_v11  ;;  %v10694_v44 = vpack.c.bf16 %v3558_v32, %v3557_v2  ;;  %v3473_v18 = vmul.f32 %v8086_v14, %v3437_v9  ;;  %v3474_v55 = vmul.f32 %v8087_v25, %v3438_v59  ;;  %v3525_v10 = vld [vmem:[#allocation2 + $0x109] sm:$0xff]  ;;  %v3526_v19 = vld [vmem:[#allocation2 + $0x111] sm:$0xff]  ;;  %v3440_v21 = vld [vmem:[#allocation2 + $0x9f] sm:$0xff]  ;;  %v10718_v5 = vpack.c.bf16 %v10535_v7, %v10527_v37 }
 0x7c1   :  { %v10696_v43 = vpack.c.bf16 %v3560_v35, %v3559_v46  ;;  %v3561_v39 = vmul.f32 %v8088_v28, %v3525_v10  ;;  %v8089_v23 = vld [vmem:[#allocation8 + $0x108] sm:$0xff]  ;;  %v8090_v2 = vld [vmem:[#allocation2] sm:$0xff]  ;;  %v8092_v38 = vld [vmem:[#allocation6 + $0x98] sm:$0xff] }
 0x7c2   :  { %v3562_v33 = vmul.f32 %v8089_v23, %v3526_v19  ;;  %v10700_v54 = vpack.c.bf16 %v3474_v55, %v3473_v18  ;;  %v3439_v58 = vld [vmem:[#allocation2 + $0x97] sm:$0xff]  ;;  %v10707_v31 = vpack.c.bf16 %v8090_v2, %v8090_v2  ;;  %v8091_v62 = vld [vmem:[#allocation6 + $0x90] sm:$0xff]  ;;  %v3476_v35 = vmul.f32 %v8092_v38, %v3440_v21  ;;  %v3442_v59 = vld [vmem:[#allocation2 + $0xaf] sm:$0xff] }
 0x7c3   :  { %3933 = vmatmul.mubr.bf16.gmra.mrb[188].mxu0 %v10672_v48  ;;  %v3475_v46 = vmul.f32 %v8091_v62, %v3439_v58  ;;  %v3441_v9 = vld [vmem:[#allocation2 + $0xa7] sm:$0xff]  ;;  %v7741_v14 = vld [vmem:[#allocation14 + $0x88] sm:$0xff]   ;;  %v8093_v18 = vld [vmem:[#allocation6 + $0xa0] sm:$0xff] }
 0x7c4   :  { %3940 = vmatprep.mubr.bf16.mxu0 %v10676_v51  ;;  %v10710_v32 = vpack.c.bf16 %v3562_v33, %v3561_v39  ;;  %v3477_v25 = vmul.f32 %v8093_v18, %v3441_v9  ;;  %v8094_v55 = vld [vmem:[#allocation6 + $0xa8] sm:$0xff]  ;;  %v7742_v37 = vld [vmem:[#allocation14 + $0x90] sm:$0xff]   ;;  %v7751_v23 = vld [vmem:[#allocation14 + $0x98] sm:$0xff]  }
 0x7c5   :  { %v10714_v50 = vpack.c.bf16 %v3476_v35, %v3475_v46  ;;  %v3478_v10 = vmul.f32 %v8094_v55, %v3442_v59  ;;  %v11290_v19 = vld [vmem:[#allocation25_spill] sm:$0xff]  ;;  %v8095_v33 = vld [vmem:[#allocation6 + $0xb0] sm:$0xff]  ;;  %v8096_v21 = vld [vmem:[#allocation6 + $0xb8] sm:$0xff] }
 0x7c6   :  { %v3443_v28 = vld [vmem:[#allocation2 + $0xb7] sm:$0xff]  ;;  %v3444_v39 = vld [vmem:[#allocation2 + $0xbf] sm:$0xff]  ;;  %v3445_v62 = vld [vmem:[#allocation2 + $0xc7] sm:$0xff] }
 0x7c7   :  { %7009 = vmatmul.mubr.bf16.gmra.mrb[120].mxu1 %v10680_v34  ;;  %v10725_v7 = vpack.c.bf16 %v3478_v10, %v3477_v25  ;;  %v3479_v58 = vmul.f32 %v8095_v33, %v3443_v28  ;;  %v3480_v2 = vmul.f32 %v8096_v21, %v3444_v39  ;;  %v3446_v46 = vld [vmem:[#allocation2 + $0xcf] sm:$0xff]  ;;  %v7761_v38 = vld [vmem:[#allocation14 + $0xa8] sm:$0xff]  }
 0x7c8   :  { %7012 = vmatprep.mubr.bf16.mxu1 %v10682_v12  ;;  %v8097_v35 = vld [vmem:[#allocation6 + $0xc0] sm:$0xff]  ;;  %v8098_v59 = vld [vmem:[#allocation6 + $0xc8] sm:$0xff]  ;;  %v7763_v10 = vld [vmem:[#allocation14 + $0xb8] sm:$0xff]  }
 0x7c9   :  { %v3481_v9 = vmul.f32 %v8097_v35, %v3445_v62  ;;  %v3447_v25 = vld [vmem:[#allocation2 + $0xd7] sm:$0xff]  ;;  %v3448_v55 = vld [vmem:[#allocation2 + $0xdf] sm:$0xff]  ;;  %v8100_v28 = vld [vmem:[#allocation6 + $0xd8] sm:$0xff] }
 0x7ca   :  { %v3484_v39 = vmul.f32 %v8100_v28, %v3448_v55  ;;  %v3450_v21 = vld [vmem:[#allocation2 + $0xef] sm:$0xff]  ;;  %v8102_v62 = vld [vmem:[#allocation6 + $0xe8] sm:$0xff] }
 0x7cb   :  { %3941 = vmatmul.mubr.bf16.gmra.mrb[192].mxu0 %v10686_v42  ;;  %v3451_v35 = vld [vmem:[#allocation2 + $0xf7] sm:$0xff] }
 0x7cc   :  { %3948 = vmatprep.mubr.bf16.mxu0 %v10690_v30 }
 0x7cf   :  { %7013 = vmatmul.mubr.bf16.gmra.mrb[124].mxu1 %v10694_v44 }
 0x7d0   :  { %7016 = vmatprep.mubr.bf16.mxu1 %v10696_v43 }
 0x7d3   :  { %3949 = vmatmul.mubr.bf16.gmra.mrb[196].mxu0 %v10700_v54 }
 0x7d4   :  { %3956 = vmatprep.mubr.bf16.mxu0 %v10704_v17 }
 0x7d7   :  { %7017 = vmatmul.mubr.bf16.gmra.mrb[128].mxu1 %v10710_v32 }
 0x7d8   :  { %4358 = vmatprep.mubr.bf16.mxu1 %v10707_v31 }
 0x7db   :  { %3957 = vmatmul.mubr.bf16.gmra.mrb[200].mxu0 %v10714_v50 }
 0x7dc   :  { %3964 = vmatprep.mubr.bf16.mxu0 %v10718_v5 }
 0x7df   :  { %4359 = vmatmul.mubr.bf16.vlgmr.msra.gmra.mrb[132].mxu1 %v11290_v19  ;;  %v8099_v19 = vld [vmem:[#allocation6 + $0xd0] sm:$0xff] }
 0x7e0   :  { %7021 = vmatpush3.bf16.msra.mxu1 %v10643_v57  ;;  %4366 = vmatprep.mubr.bf16.mxu1 %v10436_v29  ;;  %v7760_v29 = vld [vmem:[#allocation14 + $0xa0] sm:$0xff]   ;;  %v10731_v57 = vpack.c.bf16 %v3480_v2, %v3479_v58  ;;  %v3449_v58 = vld [vmem:[#allocation2 + $0xe7] sm:$0xff] }
 0x7e1   :  { %7022 = vmatprep.subr.bf16.mxu1 %v7741_v14  ;;  %v8101_v2 = vld [vmem:[#allocation6 + $0xe0] sm:$0xff] }
 0x7e3   :  { %3965 = vmatmul.mubr.bf16.gmra.mrb[204].mxu0 %v10725_v7 }
 0x7e4   :  { %7023 = vmatpush3.bf16.msra.mxu1 %v7741_v14  ;;  %3972 = vmatprep.mubr.bf16.mxu0 %v10625_v15  ;;  %v7762_v14 = vld [vmem:[#allocation14 + $0xb0] sm:$0xff]  }
 0x7e5   :  { %7024 = vmatprep.subr.bf16.mxu1 %v7742_v37 }
 0x7e7   :  { %4367 = vmatmul.mubr.bf16.gmra.mrb[136].mxu1 %v10497_v1  ;;  %v3482_v1 = vmul.f32 %v8098_v59, %v3446_v46  ;;  %v3486_v46 = vmul.f32 %v8102_v62, %v3450_v21  ;;  %v8103_v59 = vld [vmem:[#allocation6 + $0xf0] sm:$0xff] }
 0x7e8   :  { %4374 = vmatprep.mubr.bf16.mxu1 %v10491_v3  ;;  %7025 = vmatpush3.bf16.msra.mxu1 %v7742_v37  ;;  %v3483_v37 = vmul.f32 %v8099_v19, %v3447_v25  ;;  %v3454_v19 = vld [vmem:[#allocation2 + $0x10f] sm:$0xff] }
 0x7e9   :  { %7026 = vmatprep.subr.bf16.mxu1 %v7751_v23  ;;  %v10737_v18 = vpack.c.bf16 %v3482_v1, %v3481_v9  ;;  %v3452_v9 = vld [vmem:[#allocation2 + $0xff] sm:$0xff]  ;;  %v3487_v1 = vmul.f32 %v8103_v59, %v3451_v35 }
 0x7ea   :  { %v10745_v33 = vpack.c.bf16 %v3484_v39, %v3483_v37  ;;  %v8105_v37 = vld [vmem:[#allocation6 + $0x100] sm:$0xff]  ;;  %v8106_v39 = vld [vmem:[#allocation6 + $0x108] sm:$0xff] }
 0x7eb   :  { %3973 = vmatmul.mubr.bf16.gmra.mrb[208].mxu0 %v10731_v57 }
 0x7ec   :  { %7027 = vmatpush3.bf16.msra.mxu1 %v7751_v23  ;;  %3980 = vmatprep.mubr.bf16.mxu0 %v10635_v16  ;;  %v10743_v23 = vld [vmem:[#allocation14 + $0x200] sm:$0xff]  }
 0x7ed   :  { %7028 = vmatprep.subr.bf16.mxu1 %v7760_v29 }
 0x7ef   :  { %4375 = vmatmul.mubr.bf16.gmra.mrb[140].mxu1 %v10547_v22 }
 0x7f0   :  { %4382 = vmatprep.mubr.bf16.mxu1 %v10555_v24  ;;  %7029 = vmatpush3.bf16.msra.mxu1 %v7760_v29  ;;  %v3485_v29 = vmul.f32 %v8101_v2, %v3449_v58  ;;  %v3490_v58 = vmul.f32 %v8106_v39, %v3454_v19 }
 0x7f1   :  { %7030 = vmatprep.subr.bf16.mxu1 %v7761_v38 }
 0x7f3   :  { %3981 = vmatmul.mubr.bf16.gmra.mrb[212].mxu0 %v10737_v18 }
 0x7f4   :  { %7031 = vmatpush3.bf16.msra.mxu1 %v7761_v38  ;;  %3988 = vmatprep.mubr.bf16.mxu0 %v10640_v27  ;;  %v10752_v38 = vpack.c.bf16 %v3486_v46, %v3485_v29 }
 0x7f5   :  { %7032 = vmatprep.subr.bf16.mxu1 %v7762_v14 }
 0x7f7   :  { %4383 = vmatmul.mubr.bf16.gmra.mrb[144].mxu1 %v10593_v47 }
 0x7f8   :  { %4390 = vmatprep.mubr.bf16.mxu1 %v10601_v45  ;;  %7033 = vmatpush3.bf16.msra.mxu1 %v7762_v14  ;;  %v8104_v14 = vld [vmem:[#allocation6 + $0xf8] sm:$0xff] }
 0x7f9   :  { %7034 = vmatprep.subr.bf16.mxu1 %v7763_v10  ;;  %v3488_v25 = vmul.f32 %v8104_v14, %v3452_v9 }
 0x7fb   :  { %3989 = vmatmul.mubr.bf16.gmra.mrb[216].mxu0 %v10745_v33  ;;  %v10758_v55 = vpack.c.bf16 %v3488_v25, %v3487_v1 }
 0x7fc   :  { %7035 = vmatpush3.bf16.msra.mxu1 %v7763_v10  ;;  %3996 = vmatprep.mubr.bf16.mxu0 %v10647_v61  ;;  %v3453_v10 = vld [vmem:[#allocation2 + $0x107] sm:$0xff] }
 0x7fd   :  { %7068 = vmatprep.subr.bf16.mxu1 %v10743_v23  ;;  %v3489_v28 = vmul.f32 %v8105_v37, %v3453_v10  ;;  %v3455_v10 = vld [vmem:[#allocation2 + $0x117] sm:$0xff] }
 0x7ff   :  { %4391 = vmatmul.mubr.bf16.gmra.mrb[148].mxu1 %v10617_v53  ;;  %v10764_v21 = vpack.c.bf16 %v3490_v58, %v3489_v28 }
 0x800   :  { %4398 = vmatprep.mubr.bf16.mxu1 %v10621_v40 }
 0x803   :  { %3997 = vmatmul.mubr.bf16.gmra.mrb[220].mxu0 %v10752_v38 }
 0x804   :  { %4004 = vmatprep.mubr.bf16.mxu0 %v10653_v56 }
 0x807   :  { %4399 = vmatmul.mubr.bf16.gmra.mrb[152].mxu1 %v10649_v8 }
 0x808   :  { %4406 = vmatprep.mubr.bf16.mxu1 %v10657_v41 }
 0x80b   :  { %4005 = vmatmul.mubr.bf16.gmra.mrb[224].mxu0 %v10758_v55 }
 0x80c   :  { %4012 = vmatprep.mubr.bf16.mxu0 %v10661_v13 }
 0x80f   :  { %4407 = vmatmul.mubr.bf16.gmra.mrb[156].mxu1 %v10672_v48 }
 0x810   :  { %4414 = vmatprep.mubr.bf16.mxu1 %v10676_v51 }
 0x813   :  { %4013 = vmatmul.mubr.bf16.gmra.mrb[228].mxu0 %v10764_v21 }
 0x814   :  { %4873 = vmatprep.mubr.bf16.mxu0 %v10491_v3  ;;  %v3493_v3 = vld [vmem:[#allocation2 + $0x9] sm:$0xff] }
 0x817   :  { %4415 = vmatmul.mubr.bf16.gmra.mrb[160].mxu1 %v10686_v42 }
 0x818   :  { %4422 = vmatprep.mubr.bf16.mxu1 %v10690_v30 }
 0x81b   :  { %4874 = vmatmul.mubr.bf16.vlgmr.msra.gmra.mrb[232].mxu0 %v10547_v22  ;;  %v3494_v22 = vld [vmem:[#allocation2 + $0x11] sm:$0xff] }
 0x81c   :  { %4881 = vmatprep.mubr.bf16.mxu0 %v10555_v24  ;;  %v8107_v24 = vld [vmem:[#allocation8] sm:$0xff] }
 0x81f   :  { %4423 = vmatmul.mubr.bf16.gmra.mrb[164].mxu1 %v10700_v54 }
 0x820   :  { %4430 = vmatprep.mubr.bf16.mxu1 %v10704_v17 }
 0x823   :  { %4882 = vmatmul.mubr.bf16.gmra.mrb[236].mxu0 %v10593_v47  ;;  %v3529_v47 = vmul.f32 %v8107_v24, %v3493_v3  ;;  %v11291_v3 = vld [vmem:[#allocation34_spill] sm:$0xff] }
 0x824   :  { %4889 = vmatprep.mubr.bf16.mxu0 %v10601_v45  ;;  %v8108_v45 = vld [vmem:[#allocation8 + $0x8] sm:$0xff] }
 0x827   :  { %4431 = vmatmul.mubr.bf16.gmra.mrb[168].mxu1 %v10714_v50 }
 0x828   :  { %4438 = vmatprep.mubr.bf16.mxu1 %v10718_v5 }
 0x82b   :  { %4890 = vmatmul.mubr.bf16.gmra.mrb[240].mxu0 %v10617_v53  ;;  %v3530_v53 = vmul.f32 %v8108_v45, %v3494_v22 }
 0x82c   :  { %4897 = vmatprep.mubr.bf16.mxu0 %v10621_v40 }
 0x82d   :  { %v3567_v40 = vpack.c.bf16 %v3530_v53, %v3529_v47 }
 0x82f   :  { %4439 = vmatmul.mubr.bf16.gmra.mrb[172].mxu1 %v10725_v7 }
 0x830   :  { %4446 = vmatprep.mubr.bf16.mxu1 %v10625_v15 }
 0x833   :  { %4898 = vmatmul.mubr.bf16.gmra.mrb[244].mxu0 %v10649_v8  ;;  %v7765_v8 = vld [vmem:[#allocation14 + $0x208] sm:$0xff]  }
 0x834   :  { %4905 = vmatprep.mubr.bf16.mxu0 %v10657_v41  ;;  %v7766_v41 = vld [vmem:[#allocation14 + $0x210] sm:$0xff]  }
 0x837   :  { %4447 = vmatmul.mubr.bf16.gmra.mrb[176].mxu1 %v10731_v57 }
 0x838   :  { %4454 = vmatprep.mubr.bf16.mxu1 %v10635_v16 }
 0x83b   :  { %4906 = vmatmul.mubr.bf16.gmra.mrb[248].mxu0 %v10672_v48  ;;  %v7767_v48 = vld [vmem:[#allocation14 + $0x218] sm:$0xff]  }
 0x83c   :  { %4913 = vmatprep.mubr.bf16.mxu0 %v10676_v51 }
 0x83f   :  { %4455 = vmatmul.mubr.bf16.gmra.mrb[180].mxu1 %v10737_v18 }
 0x840   :  { %4462 = vmatprep.mubr.bf16.mxu1 %v10640_v27 }
 0x843   :  { %4914 = vmatmul.mubr.bf16.gmra.mrb[252].mxu0 %v10686_v42 }
 0x844   :  { %4921 = vmatprep.mubr.bf16.mxu0 %v10690_v30 }
 0x847   :  { %4463 = vmatmul.mubr.bf16.gmra.mrb[184].mxu1 %v10745_v33 }
 0x848   :  { %4470 = vmatprep.mubr.bf16.mxu1 %v10647_v61 }
 0x84b   :  { %4922 = vmatmul.mubr.bf16.gmra.mrb[4].mxu0 %v10700_v54  ;;  %v7770_v54 = vld [vmem:[#allocation14 + $0x230] sm:$0xff]  }
 0x84c   :  { %4929 = vmatprep.mubr.bf16.mxu0 %v10704_v17 }
 0x84f   :  { %4471 = vmatmul.mubr.bf16.gmra.mrb[188].mxu1 %v10752_v38 }
 0x850   :  { %4478 = vmatprep.mubr.bf16.mxu1 %v10653_v56 }
 0x853   :  { %4930 = vmatmul.mubr.bf16.gmra.mrb[8].mxu0 %v10714_v50 }
 0x854   :  { %4937 = vmatprep.mubr.bf16.mxu0 %v10718_v5 }
 0x857   :  { %4479 = vmatmul.mubr.bf16.gmra.mrb[192].mxu1 %v10758_v55 }
 0x858   :  { %7036 = vmatprep.mubr.bf16.mxu1 %v3567_v40 }
 0x85b   :  { %4938 = vmatmul.mubr.bf16.gmra.mrb[12].mxu0 %v10725_v7 }
 0x85c   :  { %4945 = vmatprep.mubr.bf16.mxu0 %v10625_v15  ;;  %v7769_v15 = vld [vmem:[#allocation14 + $0x228] sm:$0xff]  }
 0x85f   :  { %7037 = vmatmul.mubr.bf16.vlgmr.msra.gmra.mrb[100].mxu1 %v10503_v49  ;;  %v7768_v49 = vld [vmem:[#allocation14 + $0x220] sm:$0xff]  }
 0x860   :  { %7069 = vmatpush3.bf16.msra.mxu1 %v10743_v23  ;;  %7040 = vmatprep.mubr.bf16.mxu1 %v10518_v6  ;;  %v7772_v23 = vld [vmem:[#allocation15] sm:$0xff]  }
 0x861   :  { %7070 = vmatprep.subr.bf16.mxu1 %v7765_v8 }
 0x863   :  { %4946 = vmatmul.mubr.bf16.gmra.mrb[16].mxu0 %v10731_v57 }
 0x864   :  { %7071 = vmatpush3.bf16.msra.mxu1 %v7765_v8  ;;  %4953 = vmatprep.mubr.bf16.mxu0 %v10635_v16  ;;  %v7773_v8 = vld [vmem:[#allocation15 + $0x8] sm:$0xff]  }
 0x865   :  { %7072 = vmatprep.subr.bf16.mxu1 %v7766_v41 }
 0x867   :  { %7041 = vmatmul.mubr.bf16.gmra.mrb[104].mxu1 %v10531_v4 }
 0x868   :  { %7044 = vmatprep.mubr.bf16.mxu1 %v10567_v26  ;;  %7073 = vmatpush3.bf16.msra.mxu1 %v7766_v41 }
 0x869   :  { %7074 = vmatprep.subr.bf16.mxu1 %v7767_v48 }
 0x86b   :  { %4954 = vmatmul.mubr.bf16.gmra.mrb[20].mxu0 %v10737_v18 }
 0x86c   :  { %7075 = vmatpush3.bf16.msra.mxu1 %v7767_v48  ;;  %4961 = vmatprep.mubr.bf16.mxu0 %v10640_v27  ;;  %v7771_v27 = vld [vmem:[#allocation14 + $0x238] sm:$0xff]  }
 0x86d   :  { %7076 = vmatprep.subr.bf16.mxu1 %v7768_v49 }
 0x86e   :  { %v6272_v51 = vpop.f32.mrb[168].mxu0 }
 0x86f   :  { %7045 = vmatmul.mubr.bf16.gmra.mrb[108].mxu1 %v10573_v52  ;;  %v6273_v16 = vpop.f32.mrb[169].mxu0 }
 0x870   :  { %7048 = vmatprep.mubr.bf16.mxu1 %v10610_v0  ;;  %7077 = vmatpush3.bf16.msra.mxu1 %v7768_v49  ;;  %v10814_v42 = vadd.f32 %v6273_v16, %v6272_v51  ;;  %v6275_v30 = vpop.f32.mrb[170].mxu0 }
 0x871   :  { %7078 = vmatprep.subr.bf16.mxu1 %v7769_v15  ;;  %v6276_v17 = vpop.f32.mrb[171].mxu0 }
 0x872   :  { %v10816_v50 = vadd.f32 %v6276_v17, %v6275_v30  ;;  %v7775_v30 = vld [vmem:[#allocation15 + $0x18] sm:$0xff]  }
 0x873   :  { %4962 = vmatmul.mubr.bf16.gmra.mrb[24].mxu0 %v10745_v33 }
 0x874   :  { %7079 = vmatpush3.bf16.msra.mxu1 %v7769_v15  ;;  %4969 = vmatprep.mubr.bf16.mxu0 %v10647_v61 }
 0x875   :  { %7080 = vmatprep.subr.bf16.mxu1 %v7770_v54 }
 0x876   :  { %v6278_v5 = vpop.f32.mrb[172].mxu0 }
 0x877   :  { %7049 = vmatmul.mubr.bf16.gmra.mrb[112].mxu1 %v10613_v60  ;;  %v6279_v7 = vpop.f32.mrb[173].mxu0 }
 0x878   :  { %7052 = vmatprep.mubr.bf16.mxu1 %v10629_v36  ;;  %7081 = vmatpush3.bf16.msra.mxu1 %v7770_v54  ;;  %v10822_v57 = vadd.f32 %v6279_v7, %v6278_v5  ;;  %v6281_v18 = vpop.f32.mrb[174].mxu0 }
 0x879   :  { %7082 = vmatprep.subr.bf16.mxu1 %v7771_v27  ;;  %v6282_v2 = vpop.f32.mrb[175].mxu0 }
 0x87a   :  { %v10824_v29 = vadd.f32 %v6282_v2, %v6281_v18  ;;  %v7777_v18 = vld [vmem:[#allocation15 + $0x28] sm:$0xff]  }
 0x87b   :  { %4970 = vmatmul.mubr.bf16.gmra.mrb[28].mxu0 %v10752_v38 }
 0x87c   :  { %7083 = vmatpush3.bf16.msra.mxu1 %v7771_v27  ;;  %4977 = vmatprep.mubr.bf16.mxu0 %v10653_v56  ;;  %v7776_v27 = vld [vmem:[#allocation15 + $0x20] sm:$0xff]  }
 0x87d   :  { %7116 = vmatprep.subr.bf16.mxu1 %v7772_v23 }
 0x87e   :  { %v6284_v61 = vpop.f32.mrb[176].mxu0 }
 0x87f   :  { %7053 = vmatmul.mubr.bf16.gmra.mrb[116].mxu1 %v10631_v63  ;;  %v6285_v33 = vpop.f32.mrb[177].mxu0 }
 0x880   :  { %7056 = vmatprep.mubr.bf16.mxu1 %v10665_v20  ;;  %v10830_v62 = vadd.f32 %v6285_v33, %v6284_v61  ;;  %v6287_v46 = vpop.f32.mrb[178].mxu0  ;;  %v7778_v61 = vld [vmem:[#allocation15 + $0x30] sm:$0xff]  }
 0x881   :  { %v6288_v35 = vpop.f32.mrb[179].mxu0 }
 0x882   :  { %v10832_v9 = vadd.f32 %v6288_v35, %v6287_v46 }
 0x883   :  { %4978 = vmatmul.mubr.bf16.gmra.mrb[32].mxu0 %v10758_v55  ;;  %v8109_v55 = vld [vmem:[#allocation6 + $0x110] sm:$0xff] }
 0x884   :  { %4985 = vmatprep.mubr.bf16.mxu0 %v10661_v13  ;;  %v3491_v19 = vmul.f32 %v8109_v55, %v3455_v10 }
 0x886   :  { %v6290_v56 = vpop.f32.mrb[180].mxu0  ;;  %v3616_v22 = vpack.c.bf16 %v11291_v3, %v3491_v19 }
 0x887   :  { %7057 = vmatmul.mubr.bf16.gmra.mrb[120].mxu1 %v10668_v11  ;;  %v6291_v38 = vpop.f32.mrb[181].mxu0 }
 0x888   :  { %7060 = vmatprep.mubr.bf16.mxu1 %v10680_v34  ;;  %v10838_v59 = vadd.f32 %v6291_v38, %v6290_v56  ;;  %v6293_v1 = vpop.f32.mrb[182].mxu0 }
 0x889   :  { %v6294_v14 = vpop.f32.mrb[183].mxu0 }
 0x88a   :  { %v10840_v25 = vadd.f32 %v6294_v14, %v6293_v1 }
 0x88b   :  { %4986 = vmatmul.mubr.bf16.gmra.mrb[36].mxu0 %v10764_v21 }
 0x88c   :  { %4993 = vmatprep.mubr.bf16.mxu0 %v10707_v31 }
 0x88e   :  { %v6296_v13 = vpop.f32.mrb[184].mxu0 }
 0x88f   :  { %7061 = vmatmul.mubr.bf16.gmra.mrb[124].mxu1 %v10682_v12  ;;  %v6297_v37 = vpop.f32.mrb[185].mxu0 }
 0x890   :  { %7064 = vmatprep.mubr.bf16.mxu1 %v10694_v44  ;;  %v10846_v28 = vadd.f32 %v6297_v37, %v6296_v13  ;;  %v6299_v39 = vpop.f32.mrb[186].mxu0 }
 0x891   :  { %v6300_v58 = vpop.f32.mrb[187].mxu0 }
 0x892   :  { %v10849_v24 = vadd.f32 %v6300_v58, %v6299_v39 }
 0x893   :  { %4994 = vmatmul.mubr.bf16.gmra.mrb[40].mxu0 %v3616_v22 }
 0x896   :  { %v6302_v31 = vpop.f32.mrb[188].mxu0 }
 0x897   :  { %7065 = vmatmul.mubr.bf16.gmra.mrb[128].mxu1 %v10696_v43  ;;  %v6303_v21 = vpop.f32.mrb[189].mxu0 }
 0x898   :  { %7084 = vmatprep.mubr.bf16.mxu1 %v10518_v6  ;;  %v10853_v47 = vadd.f32 %v6303_v21, %v6302_v31  ;;  %v6305_v45 = vpop.f32.mrb[190].mxu0  ;;  %v7774_v6 = vld [vmem:[#allocation15 + $0x10] sm:$0xff]  }
 0x899   :  { %v6306_v53 = vpop.f32.mrb[191].mxu0 }
 0x89a   :  { %v10855_v40 = vadd.f32 %v6306_v53, %v6305_v45 }
 0x89e   :  { %v6308_v41 = vpop.f32.mrb[192].mxu0 }
 0x89f   :  { %7085 = vmatmul.mubr.bf16.vlgmr.msra.gmra.mrb[100].mxu1 %v10531_v4  ;;  %v6309_v48 = vpop.f32.mrb[193].mxu0 }
 0x8a0   :  { %7117 = vmatpush3.bf16.msra.mxu1 %v7772_v23  ;;  %7088 = vmatprep.mubr.bf16.mxu1 %v10567_v26  ;;  %v10859_v49 = vadd.f32 %v6309_v48, %v6308_v41  ;;  %v6311_v15 = vpop.f32.mrb[194].mxu0 }
 0x8a1   :  { %7118 = vmatprep.subr.bf16.mxu1 %v7773_v8  ;;  %v6312_v51 = vpop.f32.mrb[195].mxu0 }
 0x8a2   :  { %v10861_v16 = vadd.f32 %v6312_v51, %v6311_v15 }
 0x8a4   :  { %7119 = vmatpush3.bf16.msra.mxu1 %v7773_v8 }
 0x8a5   :  { %7120 = vmatprep.subr.bf16.mxu1 %v7774_v6 }
 0x8a6   :  { %v6314_v54 = vpop.f32.mrb[196].mxu0 }
 0x8a7   :  { %7089 = vmatmul.mubr.bf16.gmra.mrb[104].mxu1 %v10573_v52  ;;  %v6315_v4 = vpop.f32.mrb[197].mxu0 }
 0x8a8   :  { %7092 = vmatprep.mubr.bf16.mxu1 %v10610_v0  ;;  %7121 = vmatpush3.bf16.msra.mxu1 %v7774_v6  ;;  %v10865_v26 = vadd.f32 %v6315_v4, %v6314_v54  ;;  %v6317_v17 = vpop.f32.mrb[198].mxu0 }
 0x8a9   :  { %7122 = vmatprep.subr.bf16.mxu1 %v7775_v30  ;;  %v6318_v5 = vpop.f32.mrb[199].mxu0 }
 0x8aa   :  { %v10867_v7 = vadd.f32 %v6318_v5, %v6317_v17 }
 0x8ac   :  { %7123 = vmatpush3.bf16.msra.mxu1 %v7775_v30 }
 0x8ad   :  { %7124 = vmatprep.subr.bf16.mxu1 %v7776_v27 }
 0x8ae   :  { %v6320_v23 = vpop.f32.mrb[200].mxu0 }
 0x8af   :  { %7093 = vmatmul.mubr.bf16.gmra.mrb[108].mxu1 %v10613_v60  ;;  %v6321_v52 = vpop.f32.mrb[201].mxu0  ;;  %v7779_v60 = vld [vmem:[#allocation15 + $0x38] sm:$0xff]  }
 0x8b0   :  { %7096 = vmatprep.mubr.bf16.mxu1 %v10629_v36  ;;  %7125 = vmatpush3.bf16.msra.mxu1 %v7776_v27  ;;  %v10871_v0 = vadd.f32 %v6321_v52, %v6320_v23  ;;  %v6323_v2 = vpop.f32.mrb[202].mxu0 }
 0x8b1   :  { %7126 = vmatprep.subr.bf16.mxu1 %v7777_v18  ;;  %v6324_v46 = vpop.f32.mrb[203].mxu0 }
 0x8b2   :  { %v6408_v33 = vpop.f32.mrb[132].mxu1  ;;  %v10873_v56 = vadd.f32 %v6324_v46, %v6323_v2  ;;  %v3527_v46 = vld [vmem:[#allocation2 + $0x119] sm:$0xff] }
 0x8b3   :  { %v6409_v35 = vpop.f32.mrb[133].mxu1 }
 0x8b4   :  { %v6410_v38 = vadd.f32 %v6409_v35, %v6408_v33  ;;  %v6411_v1 = vpop.f32.mrb[134].mxu1  ;;  %7127 = vmatpush3.bf16.msra.mxu1 %v7777_v18  ;;  %v3528_v35 = vld [vmem:[#allocation2 + $0x121] sm:$0xff] }
 0x8b5   :  { %v6412_v14 = vpop.f32.mrb[135].mxu1  ;;  %7128 = vmatprep.subr.bf16.mxu1 %v7778_v61 }
 0x8b6   :  { %v10876_v36 = vadd.f32 %v6410_v38, %v10814_v42  ;;  %v6413_v10 = vadd.f32 %v6412_v14, %v6411_v1  ;;  %v6326_v55 = vpop.f32.mrb[204].mxu0  ;;  %v8110_v1 = vld [vmem:[#allocation8 + $0x110] sm:$0xff] }
 0x8b7   :  { %7097 = vmatmul.mubr.bf16.gmra.mrb[112].mxu1 %v10631_v63  ;;  %v6327_v13 = vpop.f32.mrb[205].mxu0  ;;  %v3563_v14 = vmul.f32 %v8110_v1, %v3527_v46 }
 0x8b8   :  { %v10880_v19 = vadd.f32 %v6413_v10, %v10816_v50  ;;  %7100 = vmatprep.mubr.bf16.mxu1 %v10665_v20  ;;  %7129 = vmatpush3.bf16.msra.mxu1 %v7778_v61  ;;  %v10883_v37 = vadd.f32 %v6327_v13, %v6326_v55  ;;  %v6329_v39 = vpop.f32.mrb[206].mxu0 }
 0x8b9   :  { %7130 = vmatprep.subr.bf16.mxu1 %v7779_v60  ;;  %v6330_v3 = vpop.f32.mrb[207].mxu0 }
 0x8ba   :  { %v6414_v58 = vpop.f32.mrb[136].mxu1  ;;  %v10885_v42 = vadd.f32 %v6330_v3, %v6329_v39 }
 0x8bb   :  { %v6415_v22 = vpop.f32.mrb[137].mxu1 }
 0x8bc   :  { %v6416_v31 = vadd.f32 %v6415_v22, %v6414_v58  ;;  %v6417_v21 = vpop.f32.mrb[138].mxu1  ;;  %7131 = vmatpush3.bf16.msra.mxu1 %v7779_v60  ;;  %v8111_v60 = vld [vmem:[#allocation8 + $0x118] sm:$0xff] }
 0x8bd   :  { %v6418_v63 = vpop.f32.mrb[139].mxu1  ;;  %v3564_v10 = vmul.f32 %v8111_v60, %v3528_v35 }
 0x8be   :  { %v10888_v50 = vadd.f32 %v6416_v31, %v10822_v57  ;;  %v6419_v45 = vadd.f32 %v6418_v63, %v6417_v21  ;;  %v6332_v20 = vpop.f32.mrb[208].mxu0 }
 0x8bf   :  { %7101 = vmatmul.mubr.bf16.gmra.mrb[116].mxu1 %v10668_v11  ;;  %v6333_v8 = vpop.f32.mrb[209].mxu0 }
 0x8c0   :  { %v10892_v53 = vadd.f32 %v6419_v45, %v10824_v29  ;;  %7104 = vmatprep.mubr.bf16.mxu1 %v10680_v34  ;;  %v10895_v41 = vadd.f32 %v6333_v8, %v6332_v20  ;;  %v6335_v48 = vpop.f32.mrb[210].mxu0  ;;  %v8112_v45 = vld [vmem:[#allocation3] sm:$0xff]  ;;  %v8113_v20 = vld [vmem:[#allocation3 + $0x8] sm:$0xff] }
 0x8c1   :  { %v6336_v6 = vpop.f32.mrb[211].mxu0  ;;  %v5195_v8 = vpack.c.bf16 %v8113_v20, %v8112_v45  ;;  %v8121_v45 = vld [vmem:[#allocation3 + $0x48] sm:$0xff] }
 0x8c2   :  { %v6420_v15 = vpop.f32.mrb[140].mxu1  ;;  %v10897_v30 = vadd.f32 %v6336_v6, %v6335_v48 }
 0x8c3   :  { %v6421_v51 = vpop.f32.mrb[141].mxu1 }
 0x8c4   :  { %v6422_v57 = vadd.f32 %v6421_v51, %v6420_v15  ;;  %v6423_v54 = vpop.f32.mrb[142].mxu1 }
 0x8c5   :  { %v6424_v4 = vpop.f32.mrb[143].mxu1 }
 0x8c6   :  { %v10900_v11 = vadd.f32 %v6422_v57, %v10830_v62  ;;  %v6425_v17 = vadd.f32 %v6424_v4, %v6423_v54  ;;  %v6338_v29 = vpop.f32.mrb[212].mxu0 }
 0x8c7   :  { %7105 = vmatmul.mubr.bf16.gmra.mrb[120].mxu1 %v10682_v12  ;;  %v6339_v27 = vpop.f32.mrb[213].mxu0 }
 0x8c8   :  { %v10904_v34 = vadd.f32 %v6425_v17, %v10832_v9  ;;  %7108 = vmatprep.mubr.bf16.mxu1 %v10694_v44  ;;  %v10907_v5 = vadd.f32 %v6339_v27, %v6338_v29  ;;  %v6341_v18 = vpop.f32.mrb[214].mxu0 }
 0x8c9   :  { %v6342_v52 = vpop.f32.mrb[215].mxu0 }
 0x8ca   :  { %v6426_v23 = vpop.f32.mrb[144].mxu1  ;;  %v10909_v61 = vadd.f32 %v6342_v52, %v6341_v18  ;;  %v8114_v18 = vld [vmem:[#allocation3 + $0x10] sm:$0xff] }
 0x8cb   :  { %v6427_v2 = vpop.f32.mrb[145].mxu1 }
 0x8cc   :  { %v6428_v62 = vadd.f32 %v6427_v2, %v6426_v23  ;;  %v6429_v33 = vpop.f32.mrb[146].mxu1  ;;  %v8115_v23 = vld [vmem:[#allocation3 + $0x18] sm:$0xff] }
 0x8cd   :  { %v6430_v12 = vpop.f32.mrb[147].mxu1 }
 0x8ce   :  { %v10912_v38 = vadd.f32 %v6428_v62, %v10838_v59  ;;  %v6431_v9 = vadd.f32 %v6430_v12, %v6429_v33  ;;  %v6344_v44 = vpop.f32.mrb[216].mxu0  ;;  %v8116_v62 = vld [vmem:[#allocation3 + $0x20] sm:$0xff]  ;;  %v8117_v33 = vld [vmem:[#allocation3 + $0x28] sm:$0xff] }
 0x8cf   :  { %7109 = vmatmul.mubr.bf16.gmra.mrb[124].mxu1 %v10696_v43  ;;  %v6345_v13 = vpop.f32.mrb[217].mxu0  ;;  %v3618_v43 = vpack.c.bf16 %v3564_v10, %v3563_v14  ;;  %v5197_v46 = vpack.c.bf16 %v8117_v33, %v8116_v62  ;;  %v8124_v33 = vld [vmem:[#allocation3 + $0x60] sm:$0xff] }
 0x8d0   :  { %v10916_v55 = vadd.f32 %v6431_v9, %v10840_v25  ;;  %7112 = vmatprep.mubr.bf16.mxu1 %v10710_v32  ;;  %v10919_v39 = vadd.f32 %v6345_v13, %v6344_v44  ;;  %v6347_v58 = vpop.f32.mrb[218].mxu0 }
 0x8d1   :  { %v6348_v59 = vpop.f32.mrb[219].mxu0 }
 0x8d2   :  { %v6432_v3 = vpop.f32.mrb[148].mxu1  ;;  %v10921_v31 = vadd.f32 %v6348_v59, %v6347_v58  ;;  %v8118_v59 = vld [vmem:[#allocation3 + $0x30] sm:$0xff] }
 0x8d3   :  { %v6433_v22 = vpop.f32.mrb[149].mxu1 }
 0x8d4   :  { %v6434_v21 = vadd.f32 %v6433_v22, %v6432_v3  ;;  %v6435_v63 = vpop.f32.mrb[150].mxu1  ;;  %v8119_v22 = vld [vmem:[#allocation3 + $0x38] sm:$0xff] }
 0x8d5   :  { %v6436_v48 = vpop.f32.mrb[151].mxu1 }
 0x8d6   :  { %v10924_v25 = vadd.f32 %v6434_v21, %v10846_v28  ;;  %v6437_v32 = vadd.f32 %v6436_v48, %v6435_v63  ;;  %v6350_v15 = vpop.f32.mrb[220].mxu0  ;;  %v5196_v28 = vpack.c.bf16 %v8115_v23, %v8114_v18  ;;  %v8120_v63 = vld [vmem:[#allocation3 + $0x40] sm:$0xff] }
 0x8d7   :  { %7113 = vmatmul.mubr.bf16.gmra.mrb[128].mxu1 %v3618_v43  ;;  %v6351_v51 = vpop.f32.mrb[221].mxu0  ;;  %v5199_v20 = vpack.c.bf16 %v8121_v45, %v8120_v63  ;;  %v8127_v63 = vld [vmem:[#allocation3 + $0x78] sm:$0xff] }
 0x8d8   :  { %v10927_v6 = vadd.f32 %v6437_v32, %v10849_v24  ;;  %7132 = vmatprep.mubr.bf16.mxu1 %v5195_v8  ;;  %v10929_v57 = vadd.f32 %v6351_v51, %v6350_v15  ;;  %v6353_v54 = vpop.f32.mrb[222].mxu0 }
 0x8d9   :  { %v6354_v17 = vpop.f32.mrb[223].mxu0 }
 0x8da   :  { %v6438_v4 = vpop.f32.mrb[152].mxu1  ;;  %v10931_v27 = vadd.f32 %v6354_v17, %v6353_v54 }
 0x8db   :  { %v6439_v29 = vpop.f32.mrb[153].mxu1 }
 0x8dc   :  { %v6440_v52 = vadd.f32 %v6439_v29, %v6438_v4  ;;  %v6441_v2 = vpop.f32.mrb[154].mxu1 }
 0x8dd   :  { %v6442_v24 = vpop.f32.mrb[155].mxu1 }
 0x8de   :  { %v10934_v35 = vadd.f32 %v6440_v52, %v10853_v47  ;;  %v6443_v12 = vadd.f32 %v6442_v24, %v6441_v2  ;;  %v6356_v9 = vpop.f32.mrb[224].mxu0  ;;  %v5198_v47 = vpack.c.bf16 %v8119_v22, %v8118_v59  ;;  %v8123_v52 = vld [vmem:[#allocation3 + $0x58] sm:$0xff] }
 0x8df   :  { %7133 = vmatmul.mubr.bf16.vlgmr.msra.gmra.mrb[100].mxu1 %v5196_v28  ;;  %v6357_v1 = vpop.f32.mrb[225].mxu0  ;;  %v8122_v28 = vld [vmem:[#allocation3 + $0x50] sm:$0xff] }
 0x8e0   :  { %v10937_v44 = vadd.f32 %v6443_v12, %v10855_v40  ;;  %7136 = vmatprep.mubr.bf16.mxu1 %v5197_v46  ;;  %v10939_v14 = vadd.f32 %v6357_v1, %v6356_v9  ;;  %v6359_v60 = vpop.f32.mrb[226].mxu0  ;;  %v8125_v46 = vld [vmem:[#allocation3 + $0x68] sm:$0xff] }
 0x8e1   :  { %v6360_v13 = vpop.f32.mrb[227].mxu0  ;;  %v5201_v24 = vpack.c.bf16 %v8125_v46, %v8124_v33 }
 0x8e2   :  { %v6444_v10 = vpop.f32.mrb[156].mxu1  ;;  %v10941_v3 = vadd.f32 %v6360_v13, %v6359_v60 }
 0x8e3   :  { %v6445_v58 = vpop.f32.mrb[157].mxu1 }
 0x8e4   :  { %v6446_v43 = vadd.f32 %v6445_v58, %v6444_v10  ;;  %v6447_v21 = vpop.f32.mrb[158].mxu1 }
 0x8e5   :  { %v6448_v40 = vpop.f32.mrb[159].mxu1 }
 0x8e6   :  { %v10944_v8 = vadd.f32 %v6446_v43, %v10859_v49  ;;  %v6449_v48 = vadd.f32 %v6448_v40, %v6447_v21  ;;  %v6362_v32 = vpop.f32.mrb[228].mxu0  ;;  %v5200_v49 = vpack.c.bf16 %v8123_v52, %v8122_v28  ;;  %v8126_v21 = vld [vmem:[#allocation3 + $0x70] sm:$0xff] }
 0x8e7   :  { %7137 = vmatmul.mubr.bf16.gmra.mrb[104].mxu1 %v5198_v47  ;;  %v6363_v51 = vpop.f32.mrb[229].mxu0  ;;  %v5202_v45 = vpack.c.bf16 %v8127_v63, %v8126_v21 }
 0x8e8   :  { %v10947_v15 = vadd.f32 %v6449_v48, %v10861_v16  ;;  %7140 = vmatprep.mubr.bf16.mxu1 %v5199_v20  ;;  %v10949_v54 = vadd.f32 %v6363_v51, %v6362_v32  ;;  %v6365_v4 = vpop.f32.mrb[230].mxu0  ;;  %v8128_v48 = vld [vmem:[#allocation3 + $0x80] sm:$0xff]  ;;  %v8129_v32 = vld [vmem:[#allocation3 + $0x88] sm:$0xff] }
 0x8e9   :  { %v6366_v29 = vpop.f32.mrb[231].mxu0 }
 0x8ea   :  { %v6450_v17 = vpop.f32.mrb[160].mxu1  ;;  %v10951_v23 = vadd.f32 %v6366_v29, %v6365_v4 }
 0x8eb   :  { %v6451_v18 = vpop.f32.mrb[161].mxu1 }
 0x8ec   :  { %v6452_v2 = vadd.f32 %v6451_v18, %v6450_v17  ;;  %v6453_v62 = vpop.f32.mrb[162].mxu1 }
 0x8ed   :  { %v6454_v16 = vpop.f32.mrb[163].mxu1 }
 0x8ee   :  { %v10954_v12 = vadd.f32 %v6452_v2, %v10865_v26  ;;  %v6455_v9 = vadd.f32 %v6454_v16, %v6453_v62  ;;  %v6544_v1 = vpop.f32.mrb[232].mxu0 }
 0x8ef   :  { %7141 = vmatmul.mubr.bf16.gmra.mrb[108].mxu1 %v5200_v49  ;;  %v6545_v10 = vpop.f32.mrb[233].mxu0 }
 0x8f0   :  { %v10957_v60 = vadd.f32 %v6455_v9, %v10867_v7  ;;  %7144 = vmatprep.mubr.bf16.mxu1 %v5201_v24  ;;  %v6546_v13 = vadd.f32 %v6545_v10, %v6544_v1  ;;  %v6547_v58 = vpop.f32.mrb[234].mxu0  ;;  %v5203_v7 = vpack.c.bf16 %v8129_v32, %v8128_v48  ;;  %v8130_v24 = vld [vmem:[#allocation3 + $0x90] sm:$0xff]  ;;  %v8132_v10 = vld [vmem:[#allocation3 + $0xa0] sm:$0xff] }
 0x8f1   :  { %v6548_v22 = vpop.f32.mrb[235].mxu0 }
 0x8f2   :  { %v6456_v59 = vpop.f32.mrb[164].mxu1  ;;  %v6549_v43 = vadd.f32 %v6548_v22, %v6547_v58  ;;  %v10960_v26 = vadd.f32 %v10876_v36, %v6546_v13  ;;  %v8133_v13 = vld [vmem:[#allocation3 + $0xa8] sm:$0xff] }
 0x8f3   :  { %v6457_v47 = vpop.f32.mrb[165].mxu1 }
 0x8f4   :  { %v6458_v20 = vadd.f32 %v6457_v47, %v6456_v59  ;;  %v6459_v40 = vpop.f32.mrb[166].mxu1  ;;  %v10963_v4 = vadd.f32 %v10880_v19, %v6549_v43  ;;  %v8131_v19 = vld [vmem:[#allocation3 + $0x98] sm:$0xff] }
 0x8f5   :  { %v6460_v51 = vpop.f32.mrb[167].mxu1  ;;  %v5204_v16 = vpack.c.bf16 %v8131_v19, %v8130_v24 }
 0x8f6   :  { %v10966_v17 = vadd.f32 %v6458_v20, %v10871_v0  ;;  %v6461_v29 = vadd.f32 %v6460_v51, %v6459_v40  ;;  %v6550_v18 = vpop.f32.mrb[236].mxu0 }
 0x8f7   :  { %7145 = vmatmul.mubr.bf16.gmra.mrb[112].mxu1 %v5202_v45  ;;  %v6551_v36 = vpop.f32.mrb[237].mxu0 }
 0x8f8   :  { %v10969_v28 = vadd.f32 %v6461_v29, %v10873_v56  ;;  %7148 = vmatprep.mubr.bf16.mxu1 %v5203_v7  ;;  %v6552_v52 = vadd.f32 %v6551_v36, %v6550_v18  ;;  %v6553_v49 = vpop.f32.mrb[238].mxu0  ;;  %v5205_v56 = vpack.c.bf16 %v8133_v13, %v8132_v10  ;;  %v8134_v7 = vld [vmem:[#allocation3 + $0xb0] sm:$0xff]  ;;  %v8136_v36 = vld [vmem:[#allocation3 + $0xc0] sm:$0xff] }
 0x8f9   :  { %v6554_v62 = vpop.f32.mrb[239].mxu0 }
 0x8fa   :  { %v6462_v2 = vpop.f32.mrb[168].mxu1  ;;  %v6555_v46 = vadd.f32 %v6554_v62, %v6553_v49  ;;  %v10972_v0 = vadd.f32 %v10888_v50, %v6552_v52  ;;  %v8137_v52 = vld [vmem:[#allocation3 + $0xc8] sm:$0xff] }
 0x8fb   :  { %v6463_v33 = vpop.f32.mrb[169].mxu1 }
 0x8fc   :  { %v6464_v9 = vadd.f32 %v6463_v33, %v6462_v2  ;;  %v6465_v1 = vpop.f32.mrb[170].mxu1  ;;  %v10975_v59 = vadd.f32 %v10892_v53, %v6555_v46  ;;  %v8135_v53 = vld [vmem:[#allocation3 + $0xb8] sm:$0xff] }
 0x8fd   :  { %v6466_v58 = vpop.f32.mrb[171].mxu1  ;;  %v5206_v51 = vpack.c.bf16 %v8135_v53, %v8134_v7 }
 0x8fe   :  { %v10978_v22 = vadd.f32 %v6464_v9, %v10883_v37  ;;  %v6467_v47 = vadd.f32 %v6466_v58, %v6465_v1  ;;  %v6556_v43 = vpop.f32.mrb[240].mxu0 }
 0x8ff   :  { %7149 = vmatmul.mubr.bf16.gmra.mrb[116].mxu1 %v5204_v16  ;;  %v6557_v50 = vpop.f32.mrb[241].mxu0 }
 0x900   :  { %v10981_v21 = vadd.f32 %v6467_v47, %v10885_v42  ;;  %7152 = vmatprep.mubr.bf16.mxu1 %v5205_v56  ;;  %v6558_v63 = vadd.f32 %v6557_v50, %v6556_v43  ;;  %v6559_v45 = vpop.f32.mrb[242].mxu0  ;;  %v5207_v42 = vpack.c.bf16 %v8137_v52, %v8136_v36  ;;  %v8138_v56 = vld [vmem:[#allocation3 + $0xd0] sm:$0xff]  ;;  %v8140_v50 = vld [vmem:[#allocation3 + $0xe0] sm:$0xff] }
 0x901   :  { %v6560_v40 = vpop.f32.mrb[243].mxu0 }
 0x902   :  { %v6468_v20 = vpop.f32.mrb[172].mxu1  ;;  %v6561_v32 = vadd.f32 %v6560_v40, %v6559_v45  ;;  %v10984_v37 = vadd.f32 %v10900_v11, %v6558_v63  ;;  %v8141_v63 = vld [vmem:[#allocation3 + $0xe8] sm:$0xff] }
 0x903   :  { %v6469_v48 = vpop.f32.mrb[173].mxu1 }
 0x904   :  { %v6470_v29 = vadd.f32 %v6469_v48, %v6468_v20  ;;  %v6471_v18 = vpop.f32.mrb[174].mxu1  ;;  %v10987_v2 = vadd.f32 %v10904_v34, %v6561_v32  ;;  %v8139_v34 = vld [vmem:[#allocation3 + $0xd8] sm:$0xff] }
 0x905   :  { %v6472_v49 = vpop.f32.mrb[175].mxu1  ;;  %v5208_v58 = vpack.c.bf16 %v8139_v34, %v8138_v56 }
 0x906   :  { %v10990_v62 = vadd.f32 %v6470_v29, %v10895_v41  ;;  %v6473_v33 = vadd.f32 %v6472_v49, %v6471_v18  ;;  %v6562_v46 = vpop.f32.mrb[244].mxu0 }
 0x907   :  { %7153 = vmatmul.mubr.bf16.gmra.mrb[120].mxu1 %v5206_v51  ;;  %v6563_v11 = vpop.f32.mrb[245].mxu0 }
 0x908   :  { %v10993_v24 = vadd.f32 %v6473_v33, %v10897_v30  ;;  %7156 = vmatprep.mubr.bf16.mxu1 %v5207_v42  ;;  %v6564_v19 = vadd.f32 %v6563_v11, %v6562_v46  ;;  %v6565_v16 = vpop.f32.mrb[246].mxu0  ;;  %v5209_v30 = vpack.c.bf16 %v8141_v63, %v8140_v50  ;;  %v8142_v42 = vld [vmem:[#allocation3 + $0xf0] sm:$0xff] }
 0x909   :  { %v6566_v1 = vpop.f32.mrb[247].mxu0 }
 0x90a   :  { %v6474_v9 = vpop.f32.mrb[176].mxu1  ;;  %v6567_v13 = vadd.f32 %v6566_v1, %v6565_v16  ;;  %v10996_v41 = vadd.f32 %v10912_v38, %v6564_v19 }
 0x90b   :  { %v6475_v10 = vpop.f32.mrb[177].mxu1 }
 0x90c   :  { %v6476_v47 = vadd.f32 %v6475_v10, %v6474_v9  ;;  %v6477_v43 = vpop.f32.mrb[178].mxu1  ;;  %v10999_v20 = vadd.f32 %v10916_v55, %v6567_v13  ;;  %v8143_v55 = vld [vmem:[#allocation3 + $0xf8] sm:$0xff] }
 0x90d   :  { %v6478_v45 = vpop.f32.mrb[179].mxu1  ;;  %v5210_v49 = vpack.c.bf16 %v8143_v55, %v8142_v42 }
 0x90e   :  { %v11002_v40 = vadd.f32 %v6476_v47, %v10907_v5  ;;  %v6479_v48 = vadd.f32 %v6478_v45, %v6477_v43  ;;  %v6568_v32 = vpop.f32.mrb[248].mxu0 }
 0x90f   :  { %7157 = vmatmul.mubr.bf16.gmra.mrb[124].mxu1 %v5208_v58  ;;  %v6569_v38 = vpop.f32.mrb[249].mxu0 }
 0x910   :  { %v11005_v7 = vadd.f32 %v6479_v48, %v10909_v61  ;;  %7160 = vmatprep.mubr.bf16.mxu1 %v5209_v30  ;;  %v6570_v53 = vadd.f32 %v6569_v38, %v6568_v32  ;;  %v6571_v51 = vpop.f32.mrb[250].mxu0 }
 0x911   :  { %v6572_v18 = vpop.f32.mrb[251].mxu0 }
 0x912   :  { %v6480_v29 = vpop.f32.mrb[180].mxu1  ;;  %v6573_v52 = vadd.f32 %v6572_v18, %v6571_v51  ;;  %v11008_v5 = vadd.f32 %v10924_v25, %v6570_v53 }
 0x913   :  { %v6481_v36 = vpop.f32.mrb[181].mxu1 }
 0x914   :  { %v6482_v33 = vadd.f32 %v6481_v36, %v6480_v29  ;;  %v6483_v46 = vpop.f32.mrb[182].mxu1  ;;  %v11011_v61 = vadd.f32 %v10927_v6, %v6573_v52 }
 0x915   :  { %v6484_v11 = vpop.f32.mrb[183].mxu1 }
 0x916   :  { %v11014_v19 = vadd.f32 %v6482_v33, %v10919_v39  ;;  %v6485_v16 = vadd.f32 %v6484_v11, %v6483_v46  ;;  %v6574_v9 = vpop.f32.mrb[252].mxu0 }
 0x917   :  { %7161 = vmatmul.mubr.bf16.gmra.mrb[128].mxu1 %v5210_v49  ;;  %v6575_v10 = vpop.f32.mrb[253].mxu0 }
 0x918   :  { %v11017_v1 = vadd.f32 %v6485_v16, %v10921_v31  ;;  %v6576_v13 = vadd.f32 %v6575_v10, %v6574_v9  ;;  %v6577_v56 = vpop.f32.mrb[254].mxu0 }
 0x919   :  { %v6578_v34 = vpop.f32.mrb[255].mxu0 }
 0x91a   :  { %v6486_v25 = vpop.f32.mrb[184].mxu1  ;;  %v6579_v47 = vadd.f32 %v6578_v34, %v6577_v56  ;;  %v11020_v43 = vadd.f32 %v10934_v35, %v6576_v13 }
 0x91b   :  { %v6487_v58 = vpop.f32.mrb[185].mxu1 }
 0x91c   :  { %v6488_v6 = vadd.f32 %v6487_v58, %v6486_v25  ;;  %v6489_v50 = vpop.f32.mrb[186].mxu1  ;;  %v11023_v63 = vadd.f32 %v10937_v44, %v6579_v47 }
 0x91d   :  { %v6490_v39 = vpop.f32.mrb[187].mxu1 }
 0x91e   :  { %v11026_v30 = vadd.f32 %v6488_v6, %v10929_v57  ;;  %v6491_v31 = vadd.f32 %v6490_v39, %v6489_v50  ;;  %v6580_v45 = vpop.f32.mrb[4].mxu0 }
 0x91f   :  { %v6581_v32 = vpop.f32.mrb[5].mxu0 }
 0x920   :  { %v11029_v48 = vadd.f32 %v6491_v31, %v10931_v27  ;;  %v6582_v38 = vadd.f32 %v6581_v32, %v6580_v45  ;;  %v6583_v53 = vpop.f32.mrb[6].mxu0 }
 0x921   :  { %v6584_v35 = vpop.f32.mrb[7].mxu0 }
 0x922   :  { %v6492_v51 = vpop.f32.mrb[188].mxu1  ;;  %v6585_v18 = vadd.f32 %v6584_v35, %v6583_v53  ;;  %v11032_v36 = vadd.f32 %v10944_v8, %v6582_v38 }
 0x923   :  { %v6493_v29 = vpop.f32.mrb[189].mxu1 }
 0x924   :  { %v6494_v44 = vadd.f32 %v6493_v29, %v6492_v51  ;;  %v6495_v52 = vpop.f32.mrb[190].mxu1  ;;  %v11035_v57 = vadd.f32 %v10947_v15, %v6585_v18 }
 0x925   :  { %v6496_v42 = vpop.f32.mrb[191].mxu1 }
 0x926   :  { %v11038_v55 = vadd.f32 %v6494_v44, %v10939_v14  ;;  %v6497_v27 = vadd.f32 %v6496_v42, %v6495_v52  ;;  %v6586_v49 = vpop.f32.mrb[8].mxu0 }
 0x927   :  { %v6587_v46 = vpop.f32.mrb[9].mxu0 }
 0x928   :  { %v11041_v33 = vadd.f32 %v6497_v27, %v10941_v3  ;;  %v6588_v11 = vadd.f32 %v6587_v46, %v6586_v49  ;;  %v6589_v16 = vpop.f32.mrb[10].mxu0 }
 0x929   :  { %v6590_v8 = vpop.f32.mrb[11].mxu0 }
 0x92a   :  { %v6498_v9 = vpop.f32.mrb[192].mxu1  ;;  %v6591_v13 = vadd.f32 %v6590_v8, %v6589_v16  ;;  %v11044_v56 = vadd.f32 %v10954_v12, %v6588_v11 }
 0x92b   :  { %v6499_v10 = vpop.f32.mrb[193].mxu1 }
 0x92c   :  { %v6500_v15 = vadd.f32 %v6499_v10, %v6498_v9  ;;  %v6501_v25 = vpop.f32.mrb[194].mxu1  ;;  %v11047_v14 = vadd.f32 %v10957_v60, %v6591_v13 }
 0x92d   :  { %v6502_v34 = vpop.f32.mrb[195].mxu1 }
 0x92e   :  { %v11050_v58 = vadd.f32 %v6500_v15, %v10949_v54  ;;  %v6503_v3 = vadd.f32 %v6502_v34, %v6501_v25  ;;  %v6592_v47 = vpop.f32.mrb[12].mxu0 }
 0x92f   :  { %v6593_v50 = vpop.f32.mrb[13].mxu0 }
 0x930   :  { %v11053_v6 = vadd.f32 %v6503_v3, %v10951_v23  ;;  %v6594_v39 = vadd.f32 %v6593_v50, %v6592_v47  ;;  %v6595_v31 = vpop.f32.mrb[14].mxu0 }
 0x931   :  { %v6596_v45 = vpop.f32.mrb[15].mxu0 }
 0x932   :  { %v6597_v12 = vadd.f32 %v6596_v45, %v6595_v31  ;;  %v11056_v32 = vadd.f32 %v10966_v17, %v6594_v39 }
 0x934   :  { %v11059_v38 = vadd.f32 %v10969_v28, %v6597_v12 }
 0x936   :  { %v6598_v60 = vpop.f32.mrb[16].mxu0 }
 0x937   :  { %v6599_v53 = vpop.f32.mrb[17].mxu0 }
 0x938   :  { %v6600_v54 = vadd.f32 %v6599_v53, %v6598_v60  ;;  %v6601_v51 = vpop.f32.mrb[18].mxu0 }
 0x939   :  { %v6602_v35 = vpop.f32.mrb[19].mxu0 }
 0x93a   :  { %v6603_v29 = vadd.f32 %v6602_v35, %v6601_v51  ;;  %v11062_v23 = vadd.f32 %v10978_v22, %v6600_v54 }
 0x93c   :  { %v11065_v18 = vadd.f32 %v10981_v21, %v6603_v29 }
 0x93e   :  { %v6604_v44 = vpop.f32.mrb[20].mxu0 }
 0x93f   :  { %v6605_v52 = vpop.f32.mrb[21].mxu0 }
 0x940   :  { %v6606_v42 = vadd.f32 %v6605_v52, %v6604_v44  ;;  %v6607_v17 = vpop.f32.mrb[22].mxu0 }
 0x941   :  { %v6608_v27 = vpop.f32.mrb[23].mxu0 }
 0x942   :  { %v6609_v49 = vadd.f32 %v6608_v27, %v6607_v17  ;;  %v11068_v28 = vadd.f32 %v10990_v62, %v6606_v42 }
 0x944   :  { %v11071_v46 = vadd.f32 %v10993_v24, %v6609_v49 }
 0x946   :  { %v6610_v11 = vpop.f32.mrb[24].mxu0 }
 0x947   :  { %v6611_v16 = vpop.f32.mrb[25].mxu0 }
 0x948   :  { %v6612_v9 = vadd.f32 %v6611_v16, %v6610_v11  ;;  %v6613_v22 = vpop.f32.mrb[26].mxu0 }
 0x949   :  { %v6614_v8 = vpop.f32.mrb[27].mxu0 }
 0x94a   :  { %v6615_v10 = vadd.f32 %v6614_v8, %v6613_v22  ;;  %v11074_v21 = vadd.f32 %v11002_v40, %v6612_v9 }
 0x94c   :  { %v11077_v13 = vadd.f32 %v11005_v7, %v6615_v10 }
 0x94e   :  { %v6616_v15 = vpop.f32.mrb[28].mxu0 }
 0x94f   :  { %v6617_v25 = vpop.f32.mrb[29].mxu0 }
 0x950   :  { %v6618_v34 = vadd.f32 %v6617_v25, %v6616_v15  ;;  %v6619_v62 = vpop.f32.mrb[30].mxu0 }
 0x951   :  { %v6620_v3 = vpop.f32.mrb[31].mxu0 }
 0x952   :  { %v6621_v47 = vadd.f32 %v6620_v3, %v6619_v62  ;;  %v11080_v24 = vadd.f32 %v11014_v19, %v6618_v34 }
 0x954   :  { %v11083_v50 = vadd.f32 %v11017_v1, %v6621_v47 }
 0x956   :  { %v6622_v39 = vpop.f32.mrb[32].mxu0 }
 0x957   :  { %v6623_v31 = vpop.f32.mrb[33].mxu0 }
 0x958   :  { %v6624_v45 = vadd.f32 %v6623_v31, %v6622_v39  ;;  %v6625_v40 = vpop.f32.mrb[34].mxu0 }
 0x959   :  { %v6626_v12 = vpop.f32.mrb[35].mxu0 }
 0x95a   :  { %v6627_v60 = vadd.f32 %v6626_v12, %v6625_v40  ;;  %v11086_v7 = vadd.f32 %v11026_v30, %v6624_v45 }
 0x95c   :  { %v11089_v53 = vadd.f32 %v11029_v48, %v6627_v60 }
 0x95e   :  { %v6628_v54 = vpop.f32.mrb[36].mxu0 }
 0x95f   :  { %v6629_v51 = vpop.f32.mrb[37].mxu0 }
 0x960   :  { %v6630_v35 = vadd.f32 %v6629_v51, %v6628_v54  ;;  %v6631_v19 = vpop.f32.mrb[38].mxu0 }
 0x961   :  { %v6632_v29 = vpop.f32.mrb[39].mxu0 }
 0x962   :  { %v6633_v44 = vadd.f32 %v6632_v29, %v6631_v19  ;;  %v11092_v1 = vadd.f32 %v11038_v55, %v6630_v35  ;;  %v11106_v55 = vld [vmem:[%s11199_s12] ss:$0 sm:$0xff]  ;;  %s8369_s12 = smov [#allocation17]  }
 0x963   :  { %s5544_s24 = sshll.u32 %s8369_s12, 4  ;;  %s5545_s24 = int_to_ptr.vmem [resolvable:$true] %s5544_s24 }
 0x964   :  { %v11095_v52 = vadd.f32 %v11041_v33, %v6633_v44  ;;  %s8320_s19 = scalar_lea.vmem %s5545_s24, 4096  ;;  %p8325_p9 = scmp.lt.s32.totalorder %s5545_s24, %s5545_s24 }
 0x965   :  { %p8321_p8 = scmp.ne.s32.totalorder %s5545_s24, %s8320_s19  ;;  %p8326_p10 = scmp.lt.s32.totalorder %s8320_s19, %s8320_s19 }
 0x966   :  { %v6634_v42 = vpop.f32.mrb[40].mxu0 }
 0x967   :  { %v6635_v17 = vpop.f32.mrb[41].mxu0  ;;  %p8327_p11 = por %p8326_p10, %p8325_p9 }
 0x968   :  { %v6636_v27 = vadd.f32 %v6635_v17, %v6634_v42  ;;  %v6637_v30 = vpop.f32.mrb[42].mxu0 }
 0x969   :  { %v6638_v49 = vpop.f32.mrb[43].mxu0  ;;  %p8328_p12 = pnand %p8327_p11, %p8321_p8 }
 0x96a   :  { %v6639_v11 = vadd.f32 %v6638_v49, %v6637_v30  ;;  %v11098_v48 = vadd.f32 %v11050_v58, %v6636_v27 }
 0x96c   :  { %v11101_v16 = vadd.f32 %v11053_v6, %v6639_v11 }
 0x9b2   :  { %v7134_v9 = vpop.f32.mrb[100].mxu1 }
 0x9b3   :  { %v7390_v33 = vadd.f32 %v10972_v0, %v7134_v9  ;;  %v5309_v22 = vpop.f32.mrb[101].mxu1 }
 0x9b4   :  { %v7393_v8 = vadd.f32 %v10960_v26, %v5309_v22  ;;  %v7135_v10 = vpop.f32.mrb[102].mxu1 }
 0x9b5   :  { %v5477_v15 = vadd.f32 %v7390_v33, %v11106_v55  ;;  %v7396_v58 = vadd.f32 %v10975_v59, %v7135_v10  ;;  %v5312_v25 = vpop.f32.mrb[103].mxu1 }
 0x9b6   :  { %v5475_v6 = vadd.f32 %v7393_v8, %v11106_v55  ;;  %v7399_v34 = vadd.f32 %v10963_v4, %v5312_v25 }
 0x9b7   :  { %5509 = vst [vmem:[#allocation17 + $0x10] sm:$0xff] %v5477_v15  ;;  %v5478_v62 = vadd.f32 %v7396_v58, %v11106_v55 }
 0x9b8   :  { %5507 = vst [vmem:[#allocation17] sm:$0xff] %v5475_v6  ;;  %v5476_v3 = vadd.f32 %v7399_v34, %v11106_v55 }
 0x9b9   :  { %5510 = vst [vmem:[#allocation17 + $0x18] sm:$0xff] %v5478_v62 }
 0x9ba   :  { %5508 = vst [vmem:[#allocation17 + $0x8] sm:$0xff] %v5476_v3  ;;  %v7138_v0 = vpop.f32.mrb[104].mxu1 }
 0x9bb   :  { %v7402_v26 = vadd.f32 %v10996_v41, %v7138_v0  ;;  %v5325_v47 = vpop.f32.mrb[105].mxu1 }
 0x9bc   :  { %v7405_v39 = vadd.f32 %v10984_v37, %v5325_v47  ;;  %v7139_v59 = vpop.f32.mrb[106].mxu1 }
 0x9bd   :  { %v5481_v31 = vadd.f32 %v7402_v26, %v11106_v55  ;;  %v7408_v45 = vadd.f32 %v10999_v20, %v7139_v59  ;;  %v5328_v4 = vpop.f32.mrb[107].mxu1 }
 0x9be   :  { %v5479_v40 = vadd.f32 %v7405_v39, %v11106_v55  ;;  %v7411_v12 = vadd.f32 %v10987_v2, %v5328_v4 }
 0x9bf   :  { %5513 = vst [vmem:[#allocation17 + $0x30] sm:$0xff] %v5481_v31  ;;  %v5482_v60 = vadd.f32 %v7408_v45, %v11106_v55 }
 0x9c0   :  { %5511 = vst [vmem:[#allocation17 + $0x20] sm:$0xff] %v5479_v40  ;;  %v5480_v54 = vadd.f32 %v7411_v12, %v11106_v55 }
 0x9c1   :  { %5514 = vst [vmem:[#allocation17 + $0x38] sm:$0xff] %v5482_v60 }
 0x9c2   :  { %5512 = vst [vmem:[#allocation17 + $0x28] sm:$0xff] %v5480_v54  ;;  %v7142_v41 = vpop.f32.mrb[108].mxu1 }
 0x9c3   :  { %v7414_v37 = vadd.f32 %v11020_v43, %v7142_v41  ;;  %v5341_v51 = vpop.f32.mrb[109].mxu1 }
 0x9c4   :  { %v7417_v35 = vadd.f32 %v11008_v5, %v5341_v51  ;;  %v7143_v20 = vpop.f32.mrb[110].mxu1 }
 0x9c5   :  { %v5485_v19 = vadd.f32 %v7414_v37, %v11106_v55  ;;  %v7420_v29 = vadd.f32 %v11023_v63, %v7143_v20  ;;  %v5344_v2 = vpop.f32.mrb[111].mxu1 }
 0x9c6   :  { %v5483_v44 = vadd.f32 %v7417_v35, %v11106_v55  ;;  %v7423_v42 = vadd.f32 %v11011_v61, %v5344_v2 }
 0x9c7   :  { %5517 = vst [vmem:[#allocation17 + $0x50] sm:$0xff] %v5485_v19  ;;  %v5486_v17 = vadd.f32 %v7420_v29, %v11106_v55 }
 0x9c8   :  { %5515 = vst [vmem:[#allocation17 + $0x40] sm:$0xff] %v5483_v44  ;;  %v5484_v27 = vadd.f32 %v7423_v42, %v11106_v55 }
 0x9c9   :  { %5518 = vst [vmem:[#allocation17 + $0x58] sm:$0xff] %v5486_v17 }
 0x9ca   :  { %5516 = vst [vmem:[#allocation17 + $0x48] sm:$0xff] %v5484_v27  ;;  %v7146_v43 = vpop.f32.mrb[112].mxu1 }
 0x9cb   :  { %v7426_v5 = vadd.f32 %v11044_v56, %v7146_v43  ;;  %v5357_v30 = vpop.f32.mrb[113].mxu1 }
 0x9cc   :  { %v7429_v49 = vadd.f32 %v11032_v36, %v5357_v30  ;;  %v7147_v63 = vpop.f32.mrb[114].mxu1 }
 0x9cd   :  { %v5489_v11 = vadd.f32 %v7426_v5, %v11106_v55  ;;  %v7432_v9 = vadd.f32 %v11047_v14, %v7147_v63  ;;  %v5360_v61 = vpop.f32.mrb[115].mxu1 }
 0x9ce   :  { %v5487_v33 = vadd.f32 %v7429_v49, %v11106_v55  ;;  %v7435_v22 = vadd.f32 %v11035_v57, %v5360_v61 }
 0x9cf   :  { %5521 = vst [vmem:[#allocation17 + $0x70] sm:$0xff] %v5489_v11  ;;  %v5490_v8 = vadd.f32 %v7432_v9, %v11106_v55 }
 0x9d0   :  { %5519 = vst [vmem:[#allocation17 + $0x60] sm:$0xff] %v5487_v33  ;;  %v5488_v10 = vadd.f32 %v7435_v22, %v11106_v55 }
 0x9d1   :  { %5522 = vst [vmem:[#allocation17 + $0x78] sm:$0xff] %v5490_v8 }
 0x9d2   :  { %5520 = vst [vmem:[#allocation17 + $0x68] sm:$0xff] %v5488_v10  ;;  %v7150_v56 = vpop.f32.mrb[116].mxu1 }
 0x9d3   :  { %v7438_v36 = vadd.f32 %v11062_v23, %v7150_v56  ;;  %v5373_v15 = vpop.f32.mrb[117].mxu1 }
 0x9d4   :  { %v7441_v58 = vadd.f32 %v11056_v32, %v5373_v15  ;;  %v7151_v14 = vpop.f32.mrb[118].mxu1 }
 0x9d5   :  { %v5493_v25 = vadd.f32 %v7438_v36, %v11106_v55  ;;  %v7444_v6 = vadd.f32 %v11065_v18, %v7151_v14  ;;  %v5376_v57 = vpop.f32.mrb[119].mxu1 }
 0x9d6   :  { %v5491_v34 = vadd.f32 %v7441_v58, %v11106_v55  ;;  %v7447_v62 = vadd.f32 %v11059_v38, %v5376_v57 }
 0x9d7   :  { %5525 = vst [vmem:[#allocation17 + $0x90] sm:$0xff] %v5493_v25  ;;  %v5494_v3 = vadd.f32 %v7444_v6, %v11106_v55 }
 0x9d8   :  { %5523 = vst [vmem:[#allocation17 + $0x80] sm:$0xff] %v5491_v34  ;;  %v5492_v0 = vadd.f32 %v7447_v62, %v11106_v55 }
 0x9d9   :  { %5526 = vst [vmem:[#allocation17 + $0x98] sm:$0xff] %v5494_v3 }
 0x9da   :  { %5524 = vst [vmem:[#allocation17 + $0x88] sm:$0xff] %v5492_v0  ;;  %v7154_v23 = vpop.f32.mrb[120].mxu1 }
 0x9db   :  { %v7450_v32 = vadd.f32 %v11074_v21, %v7154_v23  ;;  %v5389_v26 = vpop.f32.mrb[121].mxu1 }
 0x9dc   :  { %v7453_v47 = vadd.f32 %v11068_v28, %v5389_v26  ;;  %v7155_v18 = vpop.f32.mrb[122].mxu1 }
 0x9dd   :  { %v5497_v39 = vadd.f32 %v7450_v32, %v11106_v55  ;;  %v7456_v59 = vadd.f32 %v11077_v13, %v7155_v18  ;;  %v5392_v38 = vpop.f32.mrb[123].mxu1 }
 0x9de   :  { %v5495_v31 = vadd.f32 %v7453_v47, %v11106_v55  ;;  %v7459_v45 = vadd.f32 %v11071_v46, %v5392_v38 }
 0x9df   :  { %5529 = vst [vmem:[#allocation17 + $0xb0] sm:$0xff] %v5497_v39  ;;  %v5498_v4 = vadd.f32 %v7456_v59, %v11106_v55 }
 0x9e0   :  { %5527 = vst [vmem:[#allocation17 + $0xa0] sm:$0xff] %v5495_v31  ;;  %v5496_v40 = vadd.f32 %v7459_v45, %v11106_v55 }
 0x9e1   :  { %5530 = vst [vmem:[#allocation17 + $0xb8] sm:$0xff] %v5498_v4 }
 0x9e2   :  { %5528 = vst [vmem:[#allocation17 + $0xa8] sm:$0xff] %v5496_v40  ;;  %v7158_v21 = vpop.f32.mrb[124].mxu1 }
 0x9e3   :  { %v7462_v28 = vadd.f32 %v11086_v7, %v7158_v21  ;;  %v5405_v12 = vpop.f32.mrb[125].mxu1 }
 0x9e4   :  { %v7465_v60 = vadd.f32 %v11080_v24, %v5405_v12  ;;  %v7159_v13 = vpop.f32.mrb[126].mxu1 }
 0x9e5   :  { %v5501_v54 = vadd.f32 %v7462_v28, %v11106_v55  ;;  %v7468_v41 = vadd.f32 %v11089_v53, %v7159_v13  ;;  %v5408_v46 = vpop.f32.mrb[127].mxu1 }
 0x9e6   :  { %v5499_v37 = vadd.f32 %v7465_v60, %v11106_v55  ;;  %v7471_v51 = vadd.f32 %v11083_v50, %v5408_v46 }
 0x9e7   :  { %5533 = vst [vmem:[#allocation17 + $0xd0] sm:$0xff] %v5501_v54  ;;  %v5502_v35 = vadd.f32 %v7468_v41, %v11106_v55 }
 0x9e8   :  { %5531 = vst [vmem:[#allocation17 + $0xc0] sm:$0xff] %v5499_v37  ;;  %v5500_v20 = vadd.f32 %v7471_v51, %v11106_v55 }
 0x9e9   :  { %5534 = vst [vmem:[#allocation17 + $0xd8] sm:$0xff] %v5502_v35 }
 0x9ea   :  { %5532 = vst [vmem:[#allocation17 + $0xc8] sm:$0xff] %v5500_v20  ;;  %v7162_v7 = vpop.f32.mrb[128].mxu1 }
 0x9eb   :  { %v7474_v24 = vadd.f32 %v11098_v48, %v7162_v7  ;;  %v5421_v19 = vpop.f32.mrb[129].mxu1 }
 0x9ec   :  { %v7477_v29 = vadd.f32 %v11092_v1, %v5421_v19  ;;  %v7163_v53 = vpop.f32.mrb[130].mxu1 }
 0x9ed   :  { %v5505_v2 = vadd.f32 %v7474_v24, %v11106_v55  ;;  %v7480_v44 = vadd.f32 %v11101_v16, %v7163_v53  ;;  %v5424_v50 = vpop.f32.mrb[131].mxu1 }
 0x9ee   :  { %v5503_v42 = vadd.f32 %v7477_v29, %v11106_v55  ;;  %v7483_v17 = vadd.f32 %v11095_v52, %v5424_v50 }
 0x9ef   :  { %5537 = vst [vmem:[#allocation17 + $0xf0] sm:$0xff] %v5505_v2  ;;  %v5506_v27 = vadd.f32 %v7480_v44, %v11106_v55 }
 0x9f0   :  { %5535 = vst [vmem:[#allocation17 + $0xe0] sm:$0xff] %v5503_v42  ;;  %v5504_v48 = vadd.f32 %v7483_v17, %v11106_v55 }
 0x9f1   :  { %5538 = vst [vmem:[#allocation17 + $0xf8] sm:$0xff] %v5506_v27 }
 0x9f2   :  { %5536 = vst [vmem:[#allocation17 + $0xe8] sm:$0xff] %v5504_v48 }
 0x9f3   :  { %8331 = shalt.err (!%p8328_p12)
}
 0x9f4   :  { %s8332_s21 = scalar_lea.hbm %s11201_s14, 4096 }
 0x9f5   :  { %p8333_p13 = scmp.ne.s32.totalorder %s11201_s14, %s8332_s21  ;;  %p8336_p0 = scmp.lt.u32.totalorder %s8332_s21, %s11201_s14 }
 0x9f7   :  { %p8338_p1 = pnand %p8336_p0, %p8333_p13 }
 0x9f9   :  { %8341 = shalt.err (!%p8338_p1)
}
 0x9fa   :  { %5550 = dma.vmem_to_hbm [thread:$0]  %s5545_s24, 4096, %s11201_s14, [#allocation5], %s8356_s25, %s8356_s25, %s8357_s26  }
 0x9fb   :  { %8352 = dma.done.wait [#allocation5], 4096  }
 0x9fc   :  { %8353 = vsyncadd [#allocation5], 4294963200 }
 0x9fd   :  { %5554 = vsyncpa [#allocation4], 1 }
 0x9fe   :  { %5555 = vsyncpa [#allocation7], 1 }
 0x9ff   :  { %5556 = vsyncpa [#allocation10], 1 }
 0xa00   :  { %5557 = vsyncpa [#allocation13], 1 }
 0xa01   :  { %5558 = vsyncpa [#allocation16], 1 }
 0xa02   :  { %5559 = vsyncpa [#allocation5], 1 }

</bundles_post_ra>
